<compile_context>
chip_gen: v6e
topology: v6e:2x2x1
jax: 0.10.0
libtpu: 0.0.40
codegen_flags: <defaults>
</compile_context>

<pallas_src>
import jax
import jax.numpy as jnp
import numpy as np
from jax.experimental import pallas as pl
from jax.experimental.pallas import tpu as pltpu


def _round_up(x, m):
    return (x + m - 1) // m * m


def _tnet_kernel(x_ref,
                 c1w_ref, c1b_ref, c2w_ref, c2b_ref, c3w_ref, c3b_ref,
                 f1w_ref, f1b_ref, f2w_ref, f2b_ref, f3w_ref, f3b_ref,
                 o_ref, acc_ref):
    si = pl.program_id(1)
    ts = x_ref.shape[0]          # point slices in this block (leading axis)
    cdt = c1w_ref.dtype          # compute dtype (bf16 default); accum stays f32

    @pl.when(si == 0)
    def _():
        acc_ref[...] = jnp.full(acc_ref.shape, -jnp.inf, dtype=acc_ref.dtype)

    # Stream one point slice at a time: conv1+ReLU, conv2+ReLU, conv3 (raw —
    # bias/ReLU deferred), fold into the running max.  Never materializes the
    # (TB*TS, 1024) slab.
    @pl.loop(0, ts)
    def _(j):
        xj = x_ref[j]                                                # (TB, n)
        h = jnp.dot(xj, c1w_ref[...], preferred_element_type=jnp.float32)
        h = jnp.maximum(h + c1b_ref[...], 0.0)                       # (TB, 64)
        h = jnp.dot(h.astype(cdt), c2w_ref[...],
                    preferred_element_type=jnp.float32)
        h = jnp.maximum(h + c2b_ref[...], 0.0)                       # (TB, 128)
        h = jnp.dot(h.astype(cdt), c3w_ref[...],
                    preferred_element_type=jnp.float32)              # (TB, 1024) raw
        acc_ref[...] = jnp.maximum(acc_ref[...], h)

    @pl.when(si == pl.num_programs(1) - 1)
    def _():
        # Deferred conv3 bias + ReLU (exact w.r.t. the per-point formulation).
        g = jnp.maximum(acc_ref[...] + c3b_ref[...], 0.0)            # (TB, 1024)
        f = jnp.dot(g.astype(cdt), f1w_ref[...],
                    preferred_element_type=jnp.float32)
        f = jnp.maximum(f + f1b_ref[...], 0.0)                       # (TB, 512)
        f = jnp.dot(f.astype(cdt), f2w_ref[...],
                    preferred_element_type=jnp.float32)
        f = jnp.maximum(f + f2b_ref[...], 0.0)                       # (TB, 256)
        out = jnp.dot(f.astype(cdt), f3w_ref[...],
                      preferred_element_type=jnp.float32)
        o_ref[...] = (out + f3b_ref[...]).astype(o_ref.dtype)        # (TB, 128)


def tnet_forward(x, params, *, n=3, tb=128, ts=64,
                 compute_dtype=jnp.bfloat16):
    """x: (B, S, n) float32 point cloud. Returns (B, n, n) float32."""
    B, S, n_in = x.shape
    assert n_in == n

    out_cols = n * n
    out_pad = _round_up(out_cols, 128)           # lane-dense output slab

    # ---- batch tiling (keep >= 2 "parallel" tiles when B >= 16 so both
    #      v7x TensorCores get work; v5e/v6e are single-TC and unaffected) ----
    if B > tb:
        TB = max(8, (tb // 8) * 8)
    elif B >= 16:
        TB = _round_up((B + 1) // 2, 8)
    else:
        TB = B
    B_pad = _round_up(B, TB)

    # ---- point tiling (leading, non-tiled block axis: no 8/128 constraint) --
    TS = min(ts, S)
    S_pad = _round_up(S, TS)

    if S_pad > S:   # replicate last point: does not change the max-pool
        x = jnp.concatenate(
            [x, jnp.broadcast_to(x[:, -1:, :], (B, S_pad - S, n))], axis=1)
    if B_pad > B:   # zero rows, sliced off below
        x = jnp.concatenate(
            [x, jnp.zeros((B_pad - B, S_pad, n), x.dtype)], axis=0)

    # ---- parameter prep: compute_dtype x/weights, f32 biases ----------------
    cdt = compute_dtype
    # Point-major layout (S, B, n): the kernel walks point slices with a
    # dynamic first-axis index -> no in-kernel transpose / reshape needed.
    x_t = jnp.transpose(x, (1, 0, 2)).astype(cdt)

    w = lambda k: params[k].astype(cdt)
    f3w = jnp.zeros((256, out_pad), cdt).at[:, :out_cols].set(w("f3w"))
    iden = jnp.eye(n, dtype=jnp.float32).reshape(1, out_cols)
    f3b = jnp.zeros((1, out_pad), jnp.float32).at[:, :out_cols].set(
        params["f3b"] + iden)                    # identity folded into fc3 bias

    operands = (x_t,
                w("c1w"), params["c1b"], w("c2w"), params["c2b"],
                w("c3w"), params["c3b"],
                w("f1w"), params["f1b"], w("f2w"), params["f2b"],
                f3w, f3b)

    # Weights/biases: constant index_map -> VMEM-resident across the grid.
    resident = lambda shp: pl.BlockSpec(shp, lambda i, s: (0,) * len(shp))
    in_specs = [pl.BlockSpec((TS, TB, n), lambda i, s: (s, i, 0))]
    in_specs += [resident(op.shape) for op in operands[1:]]
    out_specs = pl.BlockSpec((TB, out_pad), lambda i, s: (i, 0))

    flops = (2 * B_pad * S_pad * (n * 64 + 64 * 128 + 128 * 1024)
             + 2 * B_pad * (1024 * 512 + 512 * 256 + 256 * out_pad))
    bytes_accessed = (sum(int(np.prod(op.shape)) * op.dtype.itemsize
                          for op in operands)
                      + B_pad * out_pad * 4)

    out = pl.pallas_call(
        _tnet_kernel,
        out_shape=jax.ShapeDtypeStruct((B_pad, out_pad), jnp.float32),
        grid=(B_pad // TB, S_pad // TS),
        in_specs=in_specs,
        out_specs=out_specs,
        scratch_shapes=[pltpu.VMEM((TB, 1024), jnp.float32)],
        compiler_params=pltpu.CompilerParams(
            dimension_semantics=("parallel", "arbitrary"),
            vmem_limit_bytes=48 * 1024 * 1024),
        cost_estimate=pl.CostEstimate(
            flops=flops, transcendentals=0, bytes_accessed=bytes_accessed),
    )(*operands)

    return out[:B, :out_cols].reshape(B, n, n)


def init_params(key, n=3):
    """nn.Conv1d / nn.Linear default init (uniform +/- 1/sqrt(fan_in)).
    Weights stored pre-transposed as (in, out); biases as (1, out)."""
    sizes = {"c1": (n, 64), "c2": (64, 128), "c3": (128, 1024),
             "f1": (1024, 512), "f2": (512, 256), "f3": (256, n * n)}
    params = {}
    keys = jax.random.split(key, 2 * len(sizes))
    for i, (name, (fan_in, fan_out)) in enumerate(sizes.items()):
        bound = 1.0 / np.sqrt(fan_in)
        params[name + "w"] = jax.random.uniform(
            keys[2 * i], (fan_in, fan_out), minval=-bound, maxval=bound,
            dtype=jnp.float32)
        params[name + "b"] = jax.random.uniform(
            keys[2 * i + 1], (1, fan_out), minval=-bound, maxval=bound,
            dtype=jnp.float32)
    return params


def reference_forward(x, params, n=3):
    h = jnp.maximum(x @ params["c1w"] + params["c1b"], 0.0)
    h = jnp.maximum(h @ params["c2w"] + params["c2b"], 0.0)
    h = jnp.maximum(h @ params["c3w"] + params["c3b"], 0.0)
    g = jnp.max(h, axis=1)                                   # max over points
    f = jnp.maximum(g @ params["f1w"] + params["f1b"], 0.0)
    f = jnp.maximum(f @ params["f2w"] + params["f2b"], 0.0)
    out = f @ params["f3w"] + params["f3b"] + jnp.eye(n).reshape(1, n * n)
    return out.reshape(-1, n, n)


if __name__ == "__main__":
    key = jax.random.PRNGKey(0)
    k_inp, k_par, k_inp2 = jax.random.split(key, 3)

    B, S, N = 2, 16, 3
    x = jax.random.normal(k_inp, (B, S, N), dtype=jnp.float32)
    params = init_params(k_par, n=N)
    ref = reference_forward(x, params, n=N)

    # f32 compute path.  Tolerance allows for MXU matmul-precision differences
    # between the XLA reference and the in-kernel dots; structural bugs would
    # show up as O(0.1-1) errors.
    out_f32 = jax.block_until_ready(
        tnet_forward(x, params, n=N, compute_dtype=jnp.float32))
    assert out_f32.shape == (B, N, N)
    np.testing.assert_allclose(np.asarray(out_f32), np.asarray(ref),
                               rtol=2e-2, atol=2e-2)

    # Default bf16 compute path (bf16 matmul inputs, f32 accumulation).
    out_bf16 = jax.block_until_ready(tnet_forward(x, params, n=N))
    assert out_bf16.shape == (B, N, N)
    assert bool(jnp.all(jnp.isfinite(out_bf16)))
    np.testing.assert_allclose(np.asarray(out_bf16), np.asarray(ref),
                               rtol=1e-1, atol=1e-1)

    # Multi-tile grid + point-padding path (S not a multiple of TS) to
    # exercise the running-max accumulator across grid steps.
    B2, S2 = 4, 200
    x2 = jax.random.normal(k_inp2, (B2, S2, N), dtype=jnp.float32)
    ref2 = reference_forward(x2, params, n=N)
    out2 = jax.block_until_ready(
        tnet_forward(x2, params, n=N, ts=64, compute_dtype=jnp.float32))
    np.testing.assert_allclose(np.asarray(out2), np.asarray(ref2),
                               rtol=2e-2, atol=2e-2)

    print("KERNEL_OK")
</pallas_src>

<mosaic_0001>
module attributes {stable_mosaic.version = 11 : i64} {
  func.func @_tnet_kernel(%arg0: i32, %arg1: i32, %arg2: memref<16x2x3xf32, #tpu.memory_space<vmem>>, %arg3: memref<3x64xf32, #tpu.memory_space<vmem>>, %arg4: memref<1x64xf32, #tpu.memory_space<vmem>>, %arg5: memref<64x128xf32, #tpu.memory_space<vmem>>, %arg6: memref<1x128xf32, #tpu.memory_space<vmem>>, %arg7: memref<128x1024xf32, #tpu.memory_space<vmem>>, %arg8: memref<1x1024xf32, #tpu.memory_space<vmem>>, %arg9: memref<1024x512xf32, #tpu.memory_space<vmem>>, %arg10: memref<1x512xf32, #tpu.memory_space<vmem>>, %arg11: memref<512x256xf32, #tpu.memory_space<vmem>>, %arg12: memref<1x256xf32, #tpu.memory_space<vmem>>, %arg13: memref<256x128xf32, #tpu.memory_space<vmem>>, %arg14: memref<1x128xf32, #tpu.memory_space<vmem>>, %arg15: memref<2x128xf32, #tpu.memory_space<vmem>>, %arg16: memref<2x1024xf32, #tpu.memory_space<vmem>>) attributes {dimension_semantics = [#tpu.dimension_semantics<parallel>, #tpu.dimension_semantics<arbitrary>], iteration_bounds = array<i64: 1, 1>, scalar_prefetch = 0 : i64, scratch_operands = 1 : i64, tpu.core_type = #tpu.core_type<tc>, window_params = [{transform_indices = @transform_0, window_bounds = array<i64: 16, 2, 3>}, {pipeline_mode = #tpu.pipeline_mode<synchronous>, transform_indices = @transform_1, window_bounds = array<i64: 3, 64>}, {pipeline_mode = #tpu.pipeline_mode<synchronous>, transform_indices = @transform_2, window_bounds = array<i64: 1, 64>}, {pipeline_mode = #tpu.pipeline_mode<synchronous>, transform_indices = @transform_3, window_bounds = array<i64: 64, 128>}, {pipeline_mode = #tpu.pipeline_mode<synchronous>, transform_indices = @transform_4, window_bounds = array<i64: 1, 128>}, {pipeline_mode = #tpu.pipeline_mode<synchronous>, transform_indices = @transform_5, window_bounds = array<i64: 128, 1024>}, {pipeline_mode = #tpu.pipeline_mode<synchronous>, transform_indices = @transform_6, window_bounds = array<i64: 1, 1024>}, {pipeline_mode = #tpu.pipeline_mode<synchronous>, transform_indices = @transform_7, window_bounds = array<i64: 1024, 512>}, {pipeline_mode = #tpu.pipeline_mode<synchronous>, transform_indices = @transform_8, window_bounds = array<i64: 1, 512>}, {pipeline_mode = #tpu.pipeline_mode<synchronous>, transform_indices = @transform_9, window_bounds = array<i64: 512, 256>}, {pipeline_mode = #tpu.pipeline_mode<synchronous>, transform_indices = @transform_10, window_bounds = array<i64: 1, 256>}, {pipeline_mode = #tpu.pipeline_mode<synchronous>, transform_indices = @transform_11, window_bounds = array<i64: 256, 128>}, {pipeline_mode = #tpu.pipeline_mode<synchronous>, transform_indices = @transform_12, window_bounds = array<i64: 1, 128>}, {transform_indices = @transform_13, window_bounds = array<i64: 2, 128>}]} {
    %c0_i32 = arith.constant 0 : i32
    %0 = arith.cmpi eq, %arg1, %c0_i32 : i32
    %1 = arith.extui %0 : i1 to i32
    %c0_i32_0 = arith.constant 0 : i32
    %2 = arith.cmpi ne, %1, %c0_i32_0 : i32
    scf.if %2 {
      %cst = arith.constant 0xFF800000 : f32
      %7 = vector.broadcast %cst : f32 to vector<2x1024xf32>
      %c0 = arith.constant 0 : index
      %c0_5 = arith.constant 0 : index
      %8 = vector.load %arg16[%c0, %c0_5] : memref<2x1024xf32, #tpu.memory_space<vmem>>, vector<2x1024xf32>
      tpu.vector_store %arg16[%c0, %c0_5], %7 {strides = array<i32>} : memref<2x1024xf32, #tpu.memory_space<vmem>>, vector<2x1024xf32>,
    } else {
    }
    %c0_i32_1 = arith.constant 0 : i32
    %c16_i32 = arith.constant 16 : i32
    %3 = arith.addi %c0_i32_1, %c16_i32 : i32
    %c1_i32 = arith.constant 1 : i32
    scf.for %arg17 = %c0_i32_1 to %3 step %c1_i32  : i32 {
      %c1_i32_5 = arith.constant 1 : i32
      %7 = arith.muli %arg17, %c1_i32_5 : i32
      %c0_i32_6 = arith.constant 0 : i32
      %8 = arith.addi %c0_i32_6, %7 : i32
      %9 = arith.index_cast %8 : i32 to index
      %c0 = arith.constant 0 : index
      %c0_7 = arith.constant 0 : index
      %10 = vector.load %arg2[%9, %c0, %c0_7] : memref<16x2x3xf32, #tpu.memory_space<vmem>>, vector<1x2x3xf32>
      %11 = vector.shape_cast %10 : vector<1x2x3xf32> to vector<2x3xf32>
      %c0_8 = arith.constant 0 : index
      %c0_9 = arith.constant 0 : index
      %12 = vector.load %arg3[%c0_8, %c0_9] : memref<3x64xf32, #tpu.memory_space<vmem>>, vector<3x64xf32>
      %cst = arith.constant dense<0.000000e+00> : vector<2x64xf32>
      %13 = tpu.matmul %11, %12, %cst {dimension_numbers = #tpu.dot_dimension_numbers<[1], [0], [0], [1], [0, 0, 1, 1], [], []>} : vector<2x3xf32>, vector<3x64xf32>, vector<2x64xf32> -> vector<2x64xf32>
      %c0_10 = arith.constant 0 : index
      %c0_11 = arith.constant 0 : index
      %14 = vector.load %arg4[%c0_10, %c0_11] : memref<1x64xf32, #tpu.memory_space<vmem>>, vector<1x64xf32>
      %15 = vector.broadcast %14 : vector<1x64xf32> to vector<2x64xf32>
      %16 = arith.addf %13, %15 : vector<2x64xf32>
      %cst_12 = arith.constant 0.000000e+00 : f32
      %17 = vector.broadcast %cst_12 : f32 to vector<2x64xf32>
      %18 = arith.maximumf %16, %17 : vector<2x64xf32>
      %c0_13 = arith.constant 0 : index
      %c0_14 = arith.constant 0 : index
      %19 = vector.load %arg5[%c0_13, %c0_14] : memref<64x128xf32, #tpu.memory_space<vmem>>, vector<64x128xf32>
      %cst_15 = arith.constant dense<0.000000e+00> : vector<2x128xf32>
      %20 = tpu.matmul %18, %19, %cst_15 {dimension_numbers = #tpu.dot_dimension_numbers<[1], [0], [0], [1], [0, 0, 1, 1], [], []>} : vector<2x64xf32>, vector<64x128xf32>, vector<2x128xf32> -> vector<2x128xf32>
      %c0_16 = arith.constant 0 : index
      %c0_17 = arith.constant 0 : index
      %21 = vector.load %arg6[%c0_16, %c0_17] : memref<1x128xf32, #tpu.memory_space<vmem>>, vector<1x128xf32>
      %22 = vector.broadcast %21 : vector<1x128xf32> to vector<2x128xf32>
      %23 = arith.addf %20, %22 : vector<2x128xf32>
      %cst_18 = arith.constant 0.000000e+00 : f32
      %24 = vector.broadcast %cst_18 : f32 to vector<2x128xf32>
      %25 = arith.maximumf %23, %24 : vector<2x128xf32>
      %c0_19 = arith.constant 0 : index
      %c0_20 = arith.constant 0 : index
      %26 = vector.load %arg7[%c0_19, %c0_20] : memref<128x1024xf32, #tpu.memory_space<vmem>>, vector<128x1024xf32>
      %cst_21 = arith.constant dense<0.000000e+00> : vector<2x1024xf32>
      %27 = tpu.matmul %25, %26, %cst_21 {dimension_numbers = #tpu.dot_dimension_numbers<[1], [0], [0], [1], [0, 0, 1, 1], [], []>} : vector<2x128xf32>, vector<128x1024xf32>, vector<2x1024xf32> -> vector<2x1024xf32>
      %c0_22 = arith.constant 0 : index
      %c0_23 = arith.constant 0 : index
      %28 = vector.load %arg16[%c0_22, %c0_23] : memref<2x1024xf32, #tpu.memory_space<vmem>>, vector<2x1024xf32>
      %29 = arith.maximumf %28, %27 : vector<2x1024xf32>
      %c0_24 = arith.constant 0 : index
      %c0_25 = arith.constant 0 : index
      %30 = vector.load %arg16[%c0_24, %c0_25] : memref<2x1024xf32, #tpu.memory_space<vmem>>, vector<2x1024xf32>
      tpu.vector_store %arg16[%c0_24, %c0_25], %29 {strides = array<i32>} : memref<2x1024xf32, #tpu.memory_space<vmem>>, vector<2x1024xf32>,
    }
    %c16_i32_2 = arith.constant 16 : i32
    %c0_i32_3 = arith.constant 0 : i32
    %4 = arith.cmpi eq, %arg1, %c0_i32_3 : i32
    %5 = arith.extui %4 : i1 to i32
    %c0_i32_4 = arith.constant 0 : i32
    %6 = arith.cmpi ne, %5, %c0_i32_4 : i32
    scf.if %6 {
      %c0 = arith.constant 0 : index
      %c0_5 = arith.constant 0 : index
      %7 = vector.load %arg16[%c0, %c0_5] : memref<2x1024xf32, #tpu.memory_space<vmem>>, vector<2x1024xf32>
      %c0_6 = arith.constant 0 : index
      %c0_7 = arith.constant 0 : index
      %8 = vector.load %arg8[%c0_6, %c0_7] : memref<1x1024xf32, #tpu.memory_space<vmem>>, vector<1x1024xf32>
      %9 = vector.broadcast %8 : vector<1x1024xf32> to vector<2x1024xf32>
      %10 = arith.addf %7, %9 : vector<2x1024xf32>
      %cst = arith.constant 0.000000e+00 : f32
      %11 = vector.broadcast %cst : f32 to vector<2x1024xf32>
      %12 = arith.maximumf %10, %11 : vector<2x1024xf32>
      %c0_8 = arith.constant 0 : index
      %c0_9 = arith.constant 0 : index
      %13 = vector.load %arg9[%c0_8, %c0_9] : memref<1024x512xf32, #tpu.memory_space<vmem>>, vector<1024x512xf32>
      %cst_10 = arith.constant dense<0.000000e+00> : vector<2x512xf32>
      %14 = tpu.matmul %12, %13, %cst_10 {dimension_numbers = #tpu.dot_dimension_numbers<[1], [0], [0], [1], [0, 0, 1, 1], [], []>} : vector<2x1024xf32>, vector<1024x512xf32>, vector<2x512xf32> -> vector<2x512xf32>
      %c0_11 = arith.constant 0 : index
      %c0_12 = arith.constant 0 : index
      %15 = vector.load %arg10[%c0_11, %c0_12] : memref<1x512xf32, #tpu.memory_space<vmem>>, vector<1x512xf32>
      %16 = vector.broadcast %15 : vector<1x512xf32> to vector<2x512xf32>
      %17 = arith.addf %14, %16 : vector<2x512xf32>
      %cst_13 = arith.constant 0.000000e+00 : f32
      %18 = vector.broadcast %cst_13 : f32 to vector<2x512xf32>
      %19 = arith.maximumf %17, %18 : vector<2x512xf32>
      %c0_14 = arith.constant 0 : index
      %c0_15 = arith.constant 0 : index
      %20 = vector.load %arg11[%c0_14, %c0_15] : memref<512x256xf32, #tpu.memory_space<vmem>>, vector<512x256xf32>
      %cst_16 = arith.constant dense<0.000000e+00> : vector<2x256xf32>
      %21 = tpu.matmul %19, %20, %cst_16 {dimension_numbers = #tpu.dot_dimension_numbers<[1], [0], [0], [1], [0, 0, 1, 1], [], []>} : vector<2x512xf32>, vector<512x256xf32>, vector<2x256xf32> -> vector<2x256xf32>
      %c0_17 = arith.constant 0 : index
      %c0_18 = arith.constant 0 : index
      %22 = vector.load %arg12[%c0_17, %c0_18] : memref<1x256xf32, #tpu.memory_space<vmem>>, vector<1x256xf32>
      %23 = vector.broadcast %22 : vector<1x256xf32> to vector<2x256xf32>
      %24 = arith.addf %21, %23 : vector<2x256xf32>
      %cst_19 = arith.constant 0.000000e+00 : f32
      %25 = vector.broadcast %cst_19 : f32 to vector<2x256xf32>
      %26 = arith.maximumf %24, %25 : vector<2x256xf32>
      %c0_20 = arith.constant 0 : index
      %c0_21 = arith.constant 0 : index
      %27 = vector.load %arg13[%c0_20, %c0_21] : memref<256x128xf32, #tpu.memory_space<vmem>>, vector<256x128xf32>
      %cst_22 = arith.constant dense<0.000000e+00> : vector<2x128xf32>
      %28 = tpu.matmul %26, %27, %cst_22 {dimension_numbers = #tpu.dot_dimension_numbers<[1], [0], [0], [1], [0, 0, 1, 1], [], []>} : vector<2x256xf32>, vector<256x128xf32>, vector<2x128xf32> -> vector<2x128xf32>
      %c0_23 = arith.constant 0 : index
      %c0_24 = arith.constant 0 : index
      %29 = vector.load %arg14[%c0_23, %c0_24] : memref<1x128xf32, #tpu.memory_space<vmem>>, vector<1x128xf32>
      %30 = vector.broadcast %29 : vector<1x128xf32> to vector<2x128xf32>
      %31 = arith.addf %28, %30 : vector<2x128xf32>
      %c0_25 = arith.constant 0 : index
      %c0_26 = arith.constant 0 : index
      %32 = vector.load %arg15[%c0_25, %c0_26] : memref<2x128xf32, #tpu.memory_space<vmem>>, vector<2x128xf32>
      tpu.vector_store %arg15[%c0_25, %c0_26], %31 {strides = array<i32>} : memref<2x128xf32, #tpu.memory_space<vmem>>, vector<2x128xf32>,
    } else {
    }
    return
  }
  func.func @transform_0(%arg0: i32, %arg1: i32) -> (i32, i32, i32) {
    %c0_i32 = arith.constant 0 : i32
    %c0_i32_0 = arith.constant 0 : i32
    return %arg1, %arg0, %c0_i32 : i32, i32, i32
  }
  func.func @transform_1(%arg0: i32, %arg1: i32) -> (i32, i32) {
    %c0_i32 = arith.constant 0 : i32
    %c0_i32_0 = arith.constant 0 : i32
    %c0_i32_1 = arith.constant 0 : i32
    return %c0_i32, %c0_i32_0 : i32, i32
  }
  func.func @transform_2(%arg0: i32, %arg1: i32) -> (i32, i32) {
    %c0_i32 = arith.constant 0 : i32
    %c0_i32_0 = arith.constant 0 : i32
    %c0_i32_1 = arith.constant 0 : i32
    return %c0_i32, %c0_i32_0 : i32, i32
  }
  func.func @transform_3(%arg0: i32, %arg1: i32) -> (i32, i32) {
    %c0_i32 = arith.constant 0 : i32
    %c0_i32_0 = arith.constant 0 : i32
    %c0_i32_1 = arith.constant 0 : i32
    return %c0_i32, %c0_i32_0 : i32, i32
  }
  func.func @transform_4(%arg0: i32, %arg1: i32) -> (i32, i32) {
    %c0_i32 = arith.constant 0 : i32
    %c0_i32_0 = arith.constant 0 : i32
    %c0_i32_1 = arith.constant 0 : i32
    return %c0_i32, %c0_i32_0 : i32, i32
  }
  func.func @transform_5(%arg0: i32, %arg1: i32) -> (i32, i32) {
    %c0_i32 = arith.constant 0 : i32
    %c0_i32_0 = arith.constant 0 : i32
    %c0_i32_1 = arith.constant 0 : i32
    return %c0_i32, %c0_i32_0 : i32, i32
  }
  func.func @transform_6(%arg0: i32, %arg1: i32) -> (i32, i32) {
    %c0_i32 = arith.constant 0 : i32
    %c0_i32_0 = arith.constant 0 : i32
    %c0_i32_1 = arith.constant 0 : i32
    return %c0_i32, %c0_i32_0 : i32, i32
  }
  func.func @transform_7(%arg0: i32, %arg1: i32) -> (i32, i32) {
    %c0_i32 = arith.constant 0 : i32
    %c0_i32_0 = arith.constant 0 : i32
    %c0_i32_1 = arith.constant 0 : i32
    return %c0_i32, %c0_i32_0 : i32, i32
  }
  func.func @transform_8(%arg0: i32, %arg1: i32) -> (i32, i32) {
    %c0_i32 = arith.constant 0 : i32
    %c0_i32_0 = arith.constant 0 : i32
    %c0_i32_1 = arith.constant 0 : i32
    return %c0_i32, %c0_i32_0 : i32, i32
  }
  func.func @transform_9(%arg0: i32, %arg1: i32) -> (i32, i32) {
    %c0_i32 = arith.constant 0 : i32
    %c0_i32_0 = arith.constant 0 : i32
    %c0_i32_1 = arith.constant 0 : i32
    return %c0_i32, %c0_i32_0 : i32, i32
  }
  func.func @transform_10(%arg0: i32, %arg1: i32) -> (i32, i32) {
    %c0_i32 = arith.constant 0 : i32
    %c0_i32_0 = arith.constant 0 : i32
    %c0_i32_1 = arith.constant 0 : i32
    return %c0_i32, %c0_i32_0 : i32, i32
  }
  func.func @transform_11(%arg0: i32, %arg1: i32) -> (i32, i32) {
    %c0_i32 = arith.constant 0 : i32
    %c0_i32_0 = arith.constant 0 : i32
    %c0_i32_1 = arith.constant 0 : i32
    return %c0_i32, %c0_i32_0 : i32, i32
  }
  func.func @transform_12(%arg0: i32, %arg1: i32) -> (i32, i32) {
    %c0_i32 = arith.constant 0 : i32
    %c0_i32_0 = arith.constant 0 : i32
    %c0_i32_1 = arith.constant 0 : i32
    return %c0_i32, %c0_i32_0 : i32, i32
  }
  func.func @transform_13(%arg0: i32, %arg1: i32) -> (i32, i32) {
    %c0_i32 = arith.constant 0 : i32
    %c0_i32_0 = arith.constant 0 : i32
    return %arg0, %c0_i32 : i32, i32
  }
}

</mosaic_0001>

<bundles_post_ra>
// kernel: tpu_custom_call.1
= control target key start
LH: loop header
LB: loop body
LE: loop exit
PB: predicated region body
PF: predicated region fallthrough
CT: control target
= control target key end

     0   :  { %18 = vsyncpa [#allocation4], 0  ;;  %s3165_s0 = inlined_call_operand.vmem [shape: f32[16,2,3], index: 0, kind: input, shape index: {}]   ;;  %s3166_s1 = inlined_call_operand.hbm [shape: f32[3,64], index: 1, kind: input, shape index: {}]   ;;  %s3167_s2 = inlined_call_operand.hbm [shape: f32[1,64], index: 2, kind: input, shape index: {}]   ;;  %s3168_s3 = inlined_call_operand.hbm [shape: f32[64,128], index: 3, kind: input, shape index: {}]   ;;  %s3169_s4 = inlined_call_operand.hbm [shape: f32[1,128], index: 4, kind: input, shape index: {}]   ;;  %s3170_s5 = inlined_call_operand.hbm [shape: f32[128,1024], index: 5, kind: input, shape index: {}]   ;;  %s3171_s6 = inlined_call_operand.hbm [shape: f32[1,1024], index: 6, kind: input, shape index: {}]   ;;  %s3172_s7 = inlined_call_operand.hbm [shape: f32[1024,512], index: 7, kind: input, shape index: {}]   ;;  %s3173_s8 = inlined_call_operand.hbm [shape: f32[1,512], index: 8, kind: input, shape index: {}]   ;;  %s3174_s9 = inlined_call_operand.hbm [shape: f32[512,256], index: 9, kind: input, shape index: {}]   ;;  %s3175_s10 = inlined_call_operand.hbm [shape: f32[1,256], index: 10, kind: input, shape index: {}]   ;;  %s3176_s11 = inlined_call_operand.hbm [shape: f32[256,128], index: 11, kind: input, shape index: {}]   ;;  %s3177_s12 = inlined_call_operand.hbm [shape: f32[1,128], index: 12, kind: input, shape index: {}]   ;;  %s3178_s13 = inlined_call_operand.hbm [shape: f32[2,128], index: 13, kind: output, shape index: {}]  }
   0x1   :  { %19 = vsyncpa [#allocation7], 0 }
   0x2   :  { %20 = vsyncpa [#allocation10], 0 }
   0x3   :  { %21 = vsyncpa [#allocation13], 0 }
   0x4   :  { %22 = vsyncpa [#allocation16], 0 }
   0x5   :  { %23 = vsyncpa [#allocation19], 0 }
   0x6   :  { %24 = vsyncpa [#allocation22], 0 }
   0x7   :  { %25 = vsyncpa [#allocation5], 0  ;;  %s2893_s25 = smov [#allocation6]   ;;  %s2894_s27 = smov [#allocation9]  }
   0x8   :  { %s44_s26 = sshll.u32 %s2893_s25, 4  ;;  %s66_s28 = sshll.u32 %s2894_s27, 4  ;;  %s45_s26 = int_to_ptr.vmem [resolvable:$true] %s44_s26  ;;  %s67_s28 = int_to_ptr.vmem [resolvable:$true] %s66_s28 }
   0x9   :  { %s2617_s29 = scalar_lea.vmem %s45_s26, 16  ;;  %s2621_s30 = scalar_lea.vmem %s45_s26, 32 }
   0xa   :  { %p2618_p0 = scmp.ne.s32.totalorder %s45_s26, %s2617_s29  ;;  %p2622_p1 = scmp.lt.s32.totalorder %s45_s26, %s45_s26 }
   0xb   :  { %p2623_p2 = scmp.lt.s32.totalorder %s2621_s30, %s2617_s29 }
   0xd   :  { %p2624_p3 = por %p2623_p2, %p2622_p1 }
   0xf   :  { %p2625_p4 = pnand %p2624_p3, %p2618_p0 }
  0x11   :  { %2628 = shalt.err (!%p2625_p4)
}
  0x12   :  { %47 = dma.hbm_to_vmem [thread:$0]  %s3167_s2, 16, %s45_s26, [#allocation7]  }
  0x13   :  { %s2637_s16 = scalar_lea.vmem %s67_s28, 16  ;;  %s2641_s17 = scalar_lea.vmem %s67_s28, 32 }
  0x14   :  { %p2638_p5 = scmp.ne.s32.totalorder %s67_s28, %s2637_s16  ;;  %p2642_p6 = scmp.lt.s32.totalorder %s67_s28, %s67_s28 }
  0x15   :  { %p2643_p7 = scmp.lt.s32.totalorder %s2641_s17, %s2637_s16 }
  0x17   :  { %p2644_p8 = por %p2643_p7, %p2642_p6 }
  0x19   :  { %p2645_p9 = pnand %p2644_p8, %p2638_p5 }
  0x1b   :  { %2648 = shalt.err (!%p2645_p9)
}
  0x1c   :  { %69 = dma.hbm_to_vmem [thread:$0]  %s3169_s4, 16, %s67_s28, [#allocation10]  }
  0x1d   :  { %s2895_s20 = smov [#allocation12]   ;;  %s2896_s22 = smov [#allocation15]  }
  0x1e   :  { %s88_s21 = sshll.u32 %s2895_s20, 4  ;;  %s110_s23 = sshll.u32 %s2896_s22, 4  ;;  %s89_s21 = int_to_ptr.vmem [resolvable:$true] %s88_s21  ;;  %s111_s23 = int_to_ptr.vmem [resolvable:$true] %s110_s23 }
  0x1f   :  { %s2657_s24 = scalar_lea.vmem %s89_s21, 128  ;;  %p2662_p11 = scmp.lt.s32.totalorder %s89_s21, %s89_s21 }
  0x20   :  { %p2658_p10 = scmp.ne.s32.totalorder %s89_s21, %s2657_s24  ;;  %p2663_p12 = scmp.lt.s32.totalorder %s2657_s24, %s2657_s24 }
  0x22   :  { %p2664_p13 = por %p2663_p12, %p2662_p11 }
  0x24   :  { %p2665_p0 = pnand %p2664_p13, %p2658_p10 }
  0x26   :  { %2668 = shalt.err (!%p2665_p0)
}
  0x27   :  { %91 = dma.hbm_to_vmem [thread:$0]  %s3171_s6, 128, %s89_s21, [#allocation13]  }
  0x28   :  { %s2677_s26 = scalar_lea.vmem %s111_s23, 64  ;;  %p2682_p2 = scmp.lt.s32.totalorder %s111_s23, %s111_s23 }
  0x29   :  { %p2678_p1 = scmp.ne.s32.totalorder %s111_s23, %s2677_s26  ;;  %p2683_p3 = scmp.lt.s32.totalorder %s2677_s26, %s2677_s26 }
  0x2b   :  { %p2684_p4 = por %p2683_p3, %p2682_p2 }
  0x2d   :  { %p2685_p5 = pnand %p2684_p4, %p2678_p1 }
  0x2f   :  { %2688 = shalt.err (!%p2685_p5)
}
  0x30   :  { %113 = dma.hbm_to_vmem [thread:$0]  %s3173_s8, 64, %s111_s23, [#allocation16]  }
  0x31   :  { %s2897_s28 = smov [#allocation18]   ;;  %s2898_s30 = smov [#allocation3]  }
  0x32   :  { %s132_s29 = sshll.u32 %s2897_s28, 4  ;;  %s34_s14 = sshll.u32 %s2898_s30, 4  ;;  %s133_s29 = int_to_ptr.vmem [resolvable:$true] %s132_s29  ;;  %s35_s14 = int_to_ptr.vmem [resolvable:$true] %s34_s14 }
  0x33   :  { %s2697_s15 = scalar_lea.vmem %s133_s29, 32  ;;  %p2702_p7 = scmp.lt.s32.totalorder %s133_s29, %s133_s29 }
  0x34   :  { %p2698_p6 = scmp.ne.s32.totalorder %s133_s29, %s2697_s15  ;;  %p2703_p8 = scmp.lt.s32.totalorder %s2697_s15, %s2697_s15 }
  0x36   :  { %p2704_p9 = por %p2703_p8, %p2702_p7 }
  0x38   :  { %p2705_p10 = pnand %p2704_p9, %p2698_p6 }
  0x3a   :  { %2708 = shalt.err (!%p2705_p10)
}
  0x3b   :  { %135 = dma.hbm_to_vmem [thread:$0]  %s3175_s10, 32, %s133_s29, [#allocation19]  }
  0x3c   :  { %s2717_s17 = scalar_lea.vmem %s35_s14, 64  ;;  %p2722_p12 = scmp.lt.s32.totalorder %s35_s14, %s35_s14 }
  0x3d   :  { %p2718_p11 = scmp.ne.s32.totalorder %s35_s14, %s2717_s17  ;;  %p2723_p13 = scmp.lt.s32.totalorder %s2717_s17, %s2717_s17 }
  0x3f   :  { %p2724_p0 = por %p2723_p13, %p2722_p12 }
  0x41   :  { %p2725_p1 = pnand %p2724_p0, %p2718_p11 }
  0x43   :  { %2728 = shalt.err (!%p2725_p1)
}
  0x44   :  { %37 = dma.hbm_to_vmem [thread:$0]  %s3166_s1, 64, %s35_s14, [#allocation4]  }
  0x45   :  { %s2899_s19 = smov [#allocation8]  }
  0x46   :  { %s53_s20 = sshll.u32 %s2899_s19, 4  ;;  %s54_s20 = int_to_ptr.vmem [resolvable:$true] %s53_s20 }
  0x47   :  { %s2737_s21 = scalar_lea.vmem %s54_s20, 1024  ;;  %p2742_p3 = scmp.lt.s32.totalorder %s54_s20, %s54_s20 }
  0x48   :  { %p2738_p2 = scmp.ne.s32.totalorder %s54_s20, %s2737_s21  ;;  %p2743_p4 = scmp.lt.s32.totalorder %s2737_s21, %s2737_s21 }
  0x4a   :  { %p2744_p5 = por %p2743_p4, %p2742_p3 }
  0x4c   :  { %p2745_p6 = pnand %p2744_p5, %p2738_p2 }
  0x4e   :  { %2748 = shalt.err (!%p2745_p6)
}
  0x4f   :  { %s2900_s10 = smov 128   ;;  %s2901_s22 = smov 8  }
  0x50   :  { %59 = dma.hbm_to_vmem [thread:$0]  %s3168_s3, 1024, %s54_s20, [#allocation7], %s2900_s10, %s2900_s10, %s2901_s22  }
  0x51   :  { %s2902_s1 = smov [#allocation11]  }
  0x52   :  { %s75_s2 = sshll.u32 %s2902_s1, 4  ;;  %s76_s2 = int_to_ptr.vmem [resolvable:$true] %s75_s2 }
  0x53   :  { %s2757_s25 = scalar_lea.vmem %s76_s2, 16384  ;;  %p2762_p8 = scmp.lt.s32.totalorder %s76_s2, %s76_s2 }
  0x54   :  { %p2758_p7 = scmp.ne.s32.totalorder %s76_s2, %s2757_s25  ;;  %p2763_p9 = scmp.lt.s32.totalorder %s2757_s25, %s2757_s25 }
  0x56   :  { %p2764_p10 = por %p2763_p9, %p2762_p8 }
  0x58   :  { %p2765_p11 = pnand %p2764_p10, %p2758_p7 }
  0x5a   :  { %2768 = shalt.err (!%p2765_p11)
}
  0x5b   :  { %s2903_s26 = smov 1024   ;;  %s2904_s4 = smov 64  }
  0x5c   :  { %81 = dma.hbm_to_vmem [thread:$0]  %s3170_s5, 16384, %s76_s2, [#allocation10], %s2903_s26, %s2903_s26, %s2904_s4  }
  0x5d   :  { %s2905_s29 = smov [#allocation14]  }
  0x5e   :  { %s97_s30 = sshll.u32 %s2905_s29, 4  ;;  %s98_s30 = int_to_ptr.vmem [resolvable:$true] %s97_s30 }
  0x5f   :  { %s2777_s3 = scalar_lea.vmem %s98_s30, 65536  ;;  %p2782_p13 = scmp.lt.s32.totalorder %s98_s30, %s98_s30 }
  0x60   :  { %p2778_p12 = scmp.ne.s32.totalorder %s98_s30, %s2777_s3  ;;  %p2783_p0 = scmp.lt.s32.totalorder %s2777_s3, %s2777_s3 }
  0x62   :  { %p2784_p1 = por %p2783_p0, %p2782_p13 }
  0x64   :  { %p2785_p2 = pnand %p2784_p1, %p2778_p12 }
  0x66   :  { %2788 = shalt.err (!%p2785_p2)
}
  0x67   :  { %s2906_s14 = smov 512   ;;  %s2907_s15 = smov 32  }
  0x68   :  { %103 = dma.hbm_to_vmem [thread:$0]  %s3172_s7, 65536, %s98_s30, [#allocation13], %s2906_s14, %s2906_s14, %s2907_s15  }
  0x69   :  { %s2908_s17 = smov [#allocation17]  }
  0x6a   :  { %s119_s8 = sshll.u32 %s2908_s17, 4  ;;  %s120_s8 = int_to_ptr.vmem [resolvable:$true] %s119_s8 }
  0x6b   :  { %s2797_s5 = scalar_lea.vmem %s120_s8, 16384  ;;  %p2802_p4 = scmp.lt.s32.totalorder %s120_s8, %s120_s8 }
  0x6c   :  { %p2798_p3 = scmp.ne.s32.totalorder %s120_s8, %s2797_s5  ;;  %p2803_p5 = scmp.lt.s32.totalorder %s2797_s5, %s2797_s5 }
  0x6e   :  { %p2804_p6 = por %p2803_p5, %p2802_p4 }
  0x70   :  { %p2805_p7 = pnand %p2804_p6, %p2798_p3 }
  0x72   :  { %2808 = shalt.err (!%p2805_p7)
}
  0x73   :  { %s2909_s18 = smov 256   ;;  %s2910_s19 = smov 16  }
  0x74   :  { %125 = dma.hbm_to_vmem [thread:$0]  %s3174_s9, 16384, %s120_s8, [#allocation16], %s2909_s18, %s2909_s18, %s2910_s19  }
  0x75   :  { %s2911_s23 = smov [#allocation20]   ;;  %s2912_s1 = smov [#allocation21]  }
  0x76   :  { %s141_s24 = sshll.u32 %s2911_s23, 4  ;;  %s154_s7 = sshll.u32 %s2912_s1, 4  ;;  %s142_s24 = int_to_ptr.vmem [resolvable:$true] %s141_s24  ;;  %s155_s7 = int_to_ptr.vmem [resolvable:$true] %s154_s7 }
  0x77   :  { %s2817_s2 = scalar_lea.vmem %s142_s24, 4096  ;;  %p2822_p9 = scmp.lt.s32.totalorder %s142_s24, %s142_s24 }
  0x78   :  { %p2818_p8 = scmp.ne.s32.totalorder %s142_s24, %s2817_s2  ;;  %p2823_p10 = scmp.lt.s32.totalorder %s2817_s2, %s2817_s2 }
  0x7a   :  { %p2824_p11 = por %p2823_p10, %p2822_p9 }
  0x7c   :  { %p2825_p12 = pnand %p2824_p11, %p2818_p8 }
  0x7e   :  { %2828 = shalt.err (!%p2825_p12)
}
  0x7f   :  { %147 = dma.hbm_to_vmem [thread:$0]  %s3176_s11, 4096, %s142_s24, [#allocation19], %s2900_s10, %s2900_s10, %s2901_s22  }
  0x80   :  { %s2837_s9 = scalar_lea.vmem %s155_s7, 16  ;;  %s2841_s4 = scalar_lea.vmem %s155_s7, 32 }
  0x81   :  { %p2838_p13 = scmp.ne.s32.totalorder %s155_s7, %s2837_s9  ;;  %p2842_p0 = scmp.lt.s32.totalorder %s155_s7, %s155_s7 }
  0x82   :  { %p2843_p1 = scmp.lt.s32.totalorder %s2841_s4, %s2837_s9 }
  0x84   :  { %p2844_p2 = por %p2843_p1, %p2842_p0 }
  0x86   :  { %p2845_p3 = pnand %p2844_p2, %p2838_p13 }
  0x88   :  { %2848 = shalt.err (!%p2845_p3)
}
  0x89   :  { %157 = dma.hbm_to_vmem [thread:$0]  %s3177_s12, 16, %s155_s7, [#allocation22]  }
  0x8a   :  { %2873 = dma.done.wait [#allocation4], 64  }
  0x8b   :  { %2874 = vsyncadd [#allocation4], 4294967232 }
  0x8c   :  { %2875 = dma.done.wait [#allocation7], 1040  }
  0x8d   :  { %2876 = vsyncadd [#allocation7], 4294966256 }
  0x8e   :  { %2877 = dma.done.wait [#allocation10], 16400  }
  0x8f   :  { %2878 = vsyncadd [#allocation10], 4294950896 }
  0x90   :  { %2879 = dma.done.wait [#allocation13], 65664  }
  0x91   :  { %2880 = vsyncadd [#allocation13], 4294901632 }
  0x92   :  { %2881 = dma.done.wait [#allocation16], 16448  }
  0x93   :  { %2882 = vsyncadd [#allocation16], 4294950848 }
  0x94   :  { %2883 = dma.done.wait [#allocation19], 4128  }
  0x95   :  { %2884 = vsyncadd [#allocation19], 4294963168 }
  0x96   :  { %2885 = dma.done.wait [#allocation22], 16  }
  0x97   :  { %2886 = vsyncadd [#allocation22], 4294967280  ;;  %v2913_v0 = vmov -inf   ;;  %s3030_s11 = smov 0  }
  0x98   :  { %198 = vst [vmem:[#allocation2] sm:$0xff] %v2913_v0  ;;  %199 = vst [vmem:[#allocation2 + $0x8] sm:$0xff] %v2913_v0 }
  0x99 LB: > { %v209_v1 = vld [vmem:[#allocation3] sm:$0x7]  ;;  %vm221_vm0 = vcmask 1042432   ;;  %v2914_v2 = vmov 0.0   ;;  %vm2915_vm1 = vmmov 0   ;;  %s2499_s12 = sshll.u32 %s2891_s11, 1  ;;  %s2891_s11 = sphi %s3030_s11, %s205_s11  }
  0x9a   : > { %2552 = vmatprep.subr.mxu0 %v2914_v2  ;;  %2554 = vmatprep.mubr.msk.f32.mxu0 %vm2915_vm1, %v2914_v2  ;;  %v303_v3 = vld [vmem:[#allocation8 + $0x38] sm:$0xff]  ;;  %vm217_vm2 = vcmask 23552   ;;  %v302_v4 = vld [vmem:[#allocation8 + $0x30] sm:$0xff]  ;;  %s207_s29 = scalar_lea.vmem %s3165_s0, %s2499_s12  ;;  %v301_v6 = vld [vmem:[#allocation8 + $0x28] sm:$0xff]  ;;  %vm311_vm3 = vcmask 523264   ;;  %s205_s11 = sadd.s32 1, %s2891_s11  }
  0x9b   : > { %2553 = vmatpush3.msk.msra.mxu0 %vm221_vm0, %v209_v1  ;;  %2557 = vmatprep.subr.mxu1 %v2914_v2  ;;  %v208_v5 = vld [vmem:[%s207_s29] sm:$0x3]  ;;  %v300_v7 = vld [vmem:[#allocation8 + $0x20] sm:$0xff]  ;;  %v299_v8 = vld [vmem:[#allocation8 + $0x18] sm:$0xff]  ;;  %p202_p4 = scmp.ge.s32.totalorder %s205_s11, 16  }
  0x9c   : > { %2558 = vmatpush3.msra.mxu1 %v303_v3  ;;  %2573 = vmatprep.mubr.msk.f32.mxu1 %vm2915_vm1, %v2914_v2  ;;  %v298_v9 = vld [vmem:[#allocation8 + $0x10] sm:$0xff]  ;;  %v297_v10 = vld [vmem:[#allocation8 + $0x8] sm:$0xff]  ;;  %v296_v11 = vld [vmem:[#allocation8] sm:$0xff]  ;;  %s2917_s0 = smov (%p202_p4), [#allocation23]  }
  0x9d   : > { %2559 = vmatprep.subr.mxu1 %v2914_v2  ;;  %2555 = vmatmul.mubr.msk.f32.vlgmr.msra.gmra.mxu0 %vm217_vm2, %v208_v5  ;;  %v507_v12 = vld [vmem:[#allocation11 + $0x3c8] sm:$0xff]  ;;  %v509_v13 = vld [vmem:[#allocation11 + $0x3d8] sm:$0xff]  ;;  %v506_v14 = vld [vmem:[#allocation11 + $0x3c0] sm:$0xff]  ;;  %s2477_s30 = sshll.u32 (%p202_p4), %s2917_s0, 4  ;;  %s2478_s30 = int_to_ptr.vmem [resolvable:$true] %s2477_s30 }
  0x9e   : > { %2560 = vmatpush3.msra.mxu1 %v302_v4  ;;  %578 = vmatprep.mubr.f32.mxu0 %v2914_v2  ;;  %v499_v15 = vld [vmem:[#allocation11 + $0x388] sm:$0xff]  ;;  %v498_v16 = vld [vmem:[#allocation11 + $0x380] sm:$0xff]  ;;  %v2500_v41 = vld [vmem:[#allocation6] ss:$0 sm:$0xff]  ;;  %s2849_s3 = scalar_lea.vmem (%p202_p4), %s2478_s30, 32  ;;  %p2854_p6 = scmp.lt.s32.totalorder (%p202_p4), %s2478_s30, %s2478_s30 }
  0x9f   : > { %2561 = vmatprep.subr.mxu1 %v2914_v2  ;;  %514 = vmatprep.subr.mxu0 %v507_v12  ;;  %v491_v17 = vld [vmem:[#allocation11 + $0x348] sm:$0xff]  ;;  %v490_v18 = vld [vmem:[#allocation11 + $0x340] sm:$0xff]  ;;  %v508_v46 = vld [vmem:[#allocation11 + $0x3d0] sm:$0xff]  ;;  %p2850_p5 = scmp.ne.s32.totalorder (%p202_p4), %s2478_s30, %s2849_s3  ;;  %p2855_p7 = scmp.lt.s32.totalorder (%p202_p4), %s2849_s3, %s2849_s3 }
  0xa0   : > { %2562 = vmatpush3.msra.mxu1 %v301_v6  ;;  %515 = vmatpush1.msra.mxu0 %v506_v14  ;;  %v483_v19 = vld [vmem:[#allocation11 + $0x308] sm:$0xff]  ;;  %v482_v20 = vld [vmem:[#allocation11 + $0x300] sm:$0xff]  ;;  %v501_v47 = vld [vmem:[#allocation11 + $0x398] sm:$0xff] }
  0xa1   : > { %2563 = vmatprep.subr.mxu1 %v2914_v2  ;;  %516 = vmatprep.subr.mxu0 %v499_v15  ;;  %v475_v21 = vld [vmem:[#allocation11 + $0x2c8] sm:$0xff]  ;;  %v474_v22 = vld [vmem:[#allocation11 + $0x2c0] sm:$0xff]  ;;  %v500_v48 = vld [vmem:[#allocation11 + $0x390] sm:$0xff]  ;;  %p2856_p8 = por (%p202_p4), %p2855_p7, %p2854_p6 }
  0xa2   : > { %2564 = vmatpush3.msra.mxu1 %v300_v7  ;;  %517 = vmatpush1.msra.mxu0 %v498_v16  ;;  %v467_v23 = vld [vmem:[#allocation11 + $0x288] sm:$0xff]  ;;  %v466_v24 = vld [vmem:[#allocation11 + $0x280] sm:$0xff]  ;;  %v493_v49 = vld [vmem:[#allocation11 + $0x358] sm:$0xff] }
  0xa3   : > { %2565 = vmatprep.subr.mxu1 %v2914_v2  ;;  %518 = vmatprep.subr.mxu0 %v491_v17  ;;  %v459_v25 = vld [vmem:[#allocation11 + $0x248] sm:$0xff]  ;;  %v458_v26 = vld [vmem:[#allocation11 + $0x240] sm:$0xff]  ;;  %v492_v50 = vld [vmem:[#allocation11 + $0x350] sm:$0xff]  ;;  %p2857_p9 = pnand (%p202_p4), %p2856_p8, %p2850_p5 }
  0xa4   : > { %2566 = vmatpush3.msra.mxu1 %v299_v8  ;;  %519 = vmatpush1.msra.mxu0 %v490_v18  ;;  %v451_v27 = vld [vmem:[#allocation11 + $0x208] sm:$0xff]  ;;  %v450_v28 = vld [vmem:[#allocation11 + $0x200] sm:$0xff]  ;;  %v485_v51 = vld [vmem:[#allocation11 + $0x318] sm:$0xff] }
  0xa5   : > { %2567 = vmatprep.subr.mxu1 %v2914_v2  ;;  %520 = vmatprep.subr.mxu0 %v483_v19  ;;  %v443_v29 = vld [vmem:[#allocation11 + $0x1c8] sm:$0xff]  ;;  %v442_v30 = vld [vmem:[#allocation11 + $0x1c0] sm:$0xff]  ;;  %v484_v52 = vld [vmem:[#allocation11 + $0x310] sm:$0xff] }
  0xa6   : > { %2568 = vmatpush3.msra.mxu1 %v298_v9  ;;  %521 = vmatpush1.msra.mxu0 %v482_v20  ;;  %v435_v31 = vld [vmem:[#allocation11 + $0x188] sm:$0xff]  ;;  %v434_v32 = vld [vmem:[#allocation11 + $0x180] sm:$0xff]  ;;  %v477_v53 = vld [vmem:[#allocation11 + $0x2d8] sm:$0xff] }
  0xa7   : > { %2569 = vmatprep.subr.mxu1 %v2914_v2  ;;  %522 = vmatprep.subr.mxu0 %v475_v21  ;;  %v427_v33 = vld [vmem:[#allocation11 + $0x148] sm:$0xff]  ;;  %v426_v34 = vld [vmem:[#allocation11 + $0x140] sm:$0xff]  ;;  %v476_v54 = vld [vmem:[#allocation11 + $0x2d0] sm:$0xff] }
  0xa8   : > { %2570 = vmatpush3.msra.mxu1 %v297_v10  ;;  %523 = vmatpush1.msra.mxu0 %v474_v22  ;;  %v419_v35 = vld [vmem:[#allocation11 + $0x108] sm:$0xff]  ;;  %v418_v36 = vld [vmem:[#allocation11 + $0x100] sm:$0xff]  ;;  %v469_v55 = vld [vmem:[#allocation11 + $0x298] sm:$0xff] }
  0xa9   : > { %2571 = vmatprep.subr.mxu1 %v2914_v2  ;;  %524 = vmatprep.subr.mxu0 %v467_v23  ;;  %v411_v37 = vld [vmem:[#allocation11 + $0xc8] sm:$0xff]  ;;  %v410_v38 = vld [vmem:[#allocation11 + $0xc0] sm:$0xff]  ;;  %v468_v56 = vld [vmem:[#allocation11 + $0x290] sm:$0xff] }
  0xaa   : > { %2572 = vmatpush3.msra.mxu1 %v296_v11  ;;  %525 = vmatpush1.msra.mxu0 %v466_v24  ;;  %v403_v39 = vld [vmem:[#allocation11 + $0x88] sm:$0xff]  ;;  %v402_v40 = vld [vmem:[#allocation11 + $0x80] sm:$0xff]  ;;  %v461_v57 = vld [vmem:[#allocation11 + $0x258] sm:$0xff] }
  0xab   : > { %585 = vmatprep.subr.mxu1 %v509_v13  ;;  %526 = vmatprep.subr.mxu0 %v459_v25  ;;  %v460_v58 = vld [vmem:[#allocation11 + $0x250] sm:$0xff]  ;;  %v453_v59 = vld [vmem:[#allocation11 + $0x218] sm:$0xff]  ;;  %v395_v10 = vld [vmem:[#allocation11 + $0x48] sm:$0xff] }
  0xac   : > { %527 = vmatpush1.msra.mxu0 %v458_v26  ;;  %v452_v60 = vld [vmem:[#allocation11 + $0x210] sm:$0xff]  ;;  %v445_v61 = vld [vmem:[#allocation11 + $0x1d8] sm:$0xff]  ;;  %v394_v12 = vld [vmem:[#allocation11 + $0x40] sm:$0xff] }
  0xad   : > { %528 = vmatprep.subr.mxu0 %v451_v27  ;;  %v444_v62 = vld [vmem:[#allocation11 + $0x1d0] sm:$0xff]  ;;  %v437_v63 = vld [vmem:[#allocation11 + $0x198] sm:$0xff]  ;;  %v387_v14 = vld [vmem:[#allocation11 + $0x8] sm:$0xff] }
  0xae   : > { %529 = vmatpush1.msra.mxu0 %v450_v28  ;;  %v436_v0 = vld [vmem:[#allocation11 + $0x190] sm:$0xff]  ;;  %v429_v1 = vld [vmem:[#allocation11 + $0x158] sm:$0xff]  ;;  %v386_v16 = vld [vmem:[#allocation11] sm:$0xff] }
  0xaf   : > { %530 = vmatprep.subr.mxu0 %v443_v29  ;;  %v428_v3 = vld [vmem:[#allocation11 + $0x150] sm:$0xff]  ;;  %v421_v4 = vld [vmem:[#allocation11 + $0x118] sm:$0xff]  ;;  %v511_v18 = vld [vmem:[#allocation11 + $0x3e8] sm:$0xff] }
  0xb0   : > { %531 = vmatpush1.msra.mxu0 %v442_v30  ;;  %v420_v5 = vld [vmem:[#allocation11 + $0x110] sm:$0xff]  ;;  %v413_v6 = vld [vmem:[#allocation11 + $0xd8] sm:$0xff]  ;;  %v510_v25 = vld [vmem:[#allocation11 + $0x3e0] sm:$0xff] }
  0xb1   : > { %532 = vmatprep.subr.mxu0 %v435_v31  ;;  %v412_v7 = vld [vmem:[#allocation11 + $0xd0] sm:$0xff]  ;;  %v405_v8 = vld [vmem:[#allocation11 + $0x98] sm:$0xff]  ;;  %v503_v27 = vld [vmem:[#allocation11 + $0x3a8] sm:$0xff] }
  0xb2   : > { %533 = vmatpush1.msra.mxu0 %v434_v32  ;;  %v404_v9 = vld [vmem:[#allocation11 + $0x90] sm:$0xff]  ;;  %v397_v11 = vld [vmem:[#allocation11 + $0x58] sm:$0xff]  ;;  %v502_v29 = vld [vmem:[#allocation11 + $0x3a0] sm:$0xff] }
  0xb3   : > { %534 = vmatprep.subr.mxu0 %v427_v33  ;;  %v396_v13 = vld [vmem:[#allocation11 + $0x50] sm:$0xff]  ;;  %v389_v15 = vld [vmem:[#allocation11 + $0x18] sm:$0xff]  ;;  %v495_v31 = vld [vmem:[#allocation11 + $0x368] sm:$0xff] }
  0xb4   : > { %535 = vmatpush1.msra.mxu0 %v426_v34  ;;  %v388_v17 = vld [vmem:[#allocation11 + $0x10] sm:$0xff]  ;;  %v513_v19 = vld [vmem:[#allocation11 + $0x3f8] sm:$0xff]  ;;  %v494_v33 = vld [vmem:[#allocation11 + $0x360] sm:$0xff] }
  0xb5   : > { %536 = vmatprep.subr.mxu0 %v419_v35  ;;  %v2503_v20 = vld [vmem:[#allocation9] ss:$0 sm:$0xff]  ;;  %v512_v26 = vld [vmem:[#allocation11 + $0x3f0] sm:$0xff]  ;;  %v487_v35 = vld [vmem:[#allocation11 + $0x328] sm:$0xff] }
  0xb6   : > { %537 = vmatpush1.msra.mxu0 %v418_v36  ;;  %v505_v28 = vld [vmem:[#allocation11 + $0x3b8] sm:$0xff]  ;;  %v504_v30 = vld [vmem:[#allocation11 + $0x3b0] sm:$0xff] }
  0xb7   : > { %538 = vmatprep.subr.mxu0 %v411_v37  ;;  %v497_v32 = vld [vmem:[#allocation11 + $0x378] sm:$0xff]  ;;  %v496_v34 = vld [vmem:[#allocation11 + $0x370] sm:$0xff]  ;;  %v486_v37 = vld [vmem:[#allocation11 + $0x320] sm:$0xff] }
  0xb8   : > { %539 = vmatpush1.msra.mxu0 %v410_v38  ;;  %v489_v36 = vld [vmem:[#allocation11 + $0x338] sm:$0xff]  ;;  %v488_v38 = vld [vmem:[#allocation11 + $0x330] sm:$0xff] }
  0xb9   : > { %540 = vmatprep.subr.mxu0 %v403_v39  ;;  %v479_v39 = vld [vmem:[#allocation11 + $0x2e8] sm:$0xff] }
  0xba   : > { %541 = vmatpush1.msra.mxu0 %v402_v40  ;;  %v481_v40 = vld [vmem:[#allocation11 + $0x2f8] sm:$0xff] }
  0xbb   : > { %542 = vmatprep.subr.mxu0 %v395_v10  ;;  %v414_v10 = vld [vmem:[#allocation11 + $0xe0] sm:$0xff] }
  0xbc   : > { %543 = vmatpush1.msra.mxu0 %v394_v12  ;;  %v407_v12 = vld [vmem:[#allocation11 + $0xa8] sm:$0xff] }
  0xbd   : > { %544 = vmatprep.subr.mxu0 %v387_v14  ;;  %v406_v14 = vld [vmem:[#allocation11 + $0xa0] sm:$0xff] }
  0xbe   : > { %545 = vmatpush1.msra.mxu0 %v386_v16  ;;  %v399_v16 = vld [vmem:[#allocation11 + $0x68] sm:$0xff] }
  0xbf   : > { %656 = vmatprep.subr.mxu0 %v511_v18  ;;  %v398_v18 = vld [vmem:[#allocation11 + $0x60] sm:$0xff] }
 0x15d   : > { %v291_v42 = vpop.f32.mrf.mxu0 }
 0x15e   : > { %v292_v43 = vadd.f32 %v2500_v41, %v291_v42  ;;  %v478_v41 = vld [vmem:[#allocation11 + $0x2e0] sm:$0xff]  ;;  %v480_v42 = vld [vmem:[#allocation11 + $0x2f0] sm:$0xff] }
 0x15f   : > { %v2556_v44 = vpop.f32.mrf.mxu0 }
 0x160   : > { %v295_v45 = vmax.f32 %v292_v43, 0.0  ;;  %v471_v43 = vld [vmem:[#allocation11 + $0x2a8] sm:$0xff]  ;;  %v473_v44 = vld [vmem:[#allocation11 + $0x2b8] sm:$0xff] }
 0x162   : > { %2574 = vmatmul.mubr.msk.f32.vlgmr.msra.gmra.mxu1 %vm311_vm3, %v295_v45  ;;  %v470_v45 = vld [vmem:[#allocation11 + $0x2a0] sm:$0xff] }
 0x163   : > { %586 = vmatpush1.msra.mxu1 %v508_v46  ;;  %649 = vmatprep.mubr.f32.mxu1 %v2914_v2  ;;  %v472_v46 = vld [vmem:[#allocation11 + $0x2b0] sm:$0xff] }
 0x164   : > { %587 = vmatprep.subr.mxu1 %v501_v47  ;;  %v463_v47 = vld [vmem:[#allocation11 + $0x268] sm:$0xff] }
 0x165   : > { %588 = vmatpush1.msra.mxu1 %v500_v48  ;;  %v465_v48 = vld [vmem:[#allocation11 + $0x278] sm:$0xff] }
 0x166   : > { %589 = vmatprep.subr.mxu1 %v493_v49  ;;  %v462_v49 = vld [vmem:[#allocation11 + $0x260] sm:$0xff] }
 0x167   : > { %590 = vmatpush1.msra.mxu1 %v492_v50  ;;  %v464_v50 = vld [vmem:[#allocation11 + $0x270] sm:$0xff] }
 0x168   : > { %591 = vmatprep.subr.mxu1 %v485_v51  ;;  %v455_v51 = vld [vmem:[#allocation11 + $0x228] sm:$0xff] }
 0x169   : > { %592 = vmatpush1.msra.mxu1 %v484_v52  ;;  %v457_v52 = vld [vmem:[#allocation11 + $0x238] sm:$0xff] }
 0x16a   : > { %593 = vmatprep.subr.mxu1 %v477_v53  ;;  %v454_v53 = vld [vmem:[#allocation11 + $0x220] sm:$0xff] }
 0x16b   : > { %594 = vmatpush1.msra.mxu1 %v476_v54  ;;  %v456_v54 = vld [vmem:[#allocation11 + $0x230] sm:$0xff] }
 0x16c   : > { %595 = vmatprep.subr.mxu1 %v469_v55  ;;  %v447_v55 = vld [vmem:[#allocation11 + $0x1e8] sm:$0xff] }
 0x16d   : > { %596 = vmatpush1.msra.mxu1 %v468_v56  ;;  %v449_v56 = vld [vmem:[#allocation11 + $0x1f8] sm:$0xff] }
 0x16e   : > { %597 = vmatprep.subr.mxu1 %v461_v57  ;;  %v446_v57 = vld [vmem:[#allocation11 + $0x1e0] sm:$0xff] }
 0x16f   : > { %598 = vmatpush1.msra.mxu1 %v460_v58  ;;  %v448_v58 = vld [vmem:[#allocation11 + $0x1f0] sm:$0xff] }
 0x170   : > { %599 = vmatprep.subr.mxu1 %v453_v59  ;;  %v439_v59 = vld [vmem:[#allocation11 + $0x1a8] sm:$0xff] }
 0x171   : > { %600 = vmatpush1.msra.mxu1 %v452_v60  ;;  %v441_v60 = vld [vmem:[#allocation11 + $0x1b8] sm:$0xff] }
 0x172   : > { %601 = vmatprep.subr.mxu1 %v445_v61  ;;  %v438_v61 = vld [vmem:[#allocation11 + $0x1a0] sm:$0xff] }
 0x173   : > { %602 = vmatpush1.msra.mxu1 %v444_v62  ;;  %v440_v62 = vld [vmem:[#allocation11 + $0x1b0] sm:$0xff] }
 0x174   : > { %603 = vmatprep.subr.mxu1 %v437_v63  ;;  %v431_v63 = vld [vmem:[#allocation11 + $0x168] sm:$0xff] }
 0x175   : > { %604 = vmatpush1.msra.mxu1 %v436_v0  ;;  %v433_v0 = vld [vmem:[#allocation11 + $0x178] sm:$0xff] }
 0x176   : > { %605 = vmatprep.subr.mxu1 %v429_v1  ;;  %v430_v1 = vld [vmem:[#allocation11 + $0x160] sm:$0xff] }
 0x177   : > { %606 = vmatpush1.msra.mxu1 %v428_v3  ;;  %v432_v3 = vld [vmem:[#allocation11 + $0x170] sm:$0xff] }
 0x178   : > { %607 = vmatprep.subr.mxu1 %v421_v4  ;;  %v423_v4 = vld [vmem:[#allocation11 + $0x128] sm:$0xff] }
 0x179   : > { %608 = vmatpush1.msra.mxu1 %v420_v5  ;;  %v425_v5 = vld [vmem:[#allocation11 + $0x138] sm:$0xff] }
 0x17a   : > { %609 = vmatprep.subr.mxu1 %v413_v6  ;;  %v422_v6 = vld [vmem:[#allocation11 + $0x120] sm:$0xff] }
 0x17b   : > { %610 = vmatpush1.msra.mxu1 %v412_v7  ;;  %v424_v7 = vld [vmem:[#allocation11 + $0x130] sm:$0xff] }
 0x17c   : > { %611 = vmatprep.subr.mxu1 %v405_v8  ;;  %v415_v8 = vld [vmem:[#allocation11 + $0xe8] sm:$0xff] }
 0x17d   : > { %612 = vmatpush1.msra.mxu1 %v404_v9  ;;  %v417_v9 = vld [vmem:[#allocation11 + $0xf8] sm:$0xff] }
 0x17e   : > { %613 = vmatprep.subr.mxu1 %v397_v11  ;;  %v416_v11 = vld [vmem:[#allocation11 + $0xf0] sm:$0xff] }
 0x17f   : > { %614 = vmatpush1.msra.mxu1 %v396_v13  ;;  %v409_v13 = vld [vmem:[#allocation11 + $0xb8] sm:$0xff] }
 0x180   : > { %615 = vmatprep.subr.mxu1 %v389_v15  ;;  %v408_v15 = vld [vmem:[#allocation11 + $0xb0] sm:$0xff] }
 0x181   : > { %616 = vmatpush1.msra.mxu1 %v388_v17  ;;  %v401_v17 = vld [vmem:[#allocation11 + $0x78] sm:$0xff] }
 0x182   : > { %727 = vmatprep.subr.mxu1 %v513_v19  ;;  %v400_v19 = vld [vmem:[#allocation11 + $0x70] sm:$0xff] }
 0x222   : > { %v381_v21 = vpop.f32.mrf.mxu1 }
 0x223   : > { %v382_v22 = vadd.f32 %v2503_v20, %v381_v21  ;;  %v391_v20 = vld [vmem:[#allocation11 + $0x28] sm:$0xff]  ;;  %v393_v21 = vld [vmem:[#allocation11 + $0x38] sm:$0xff] }
 0x224   : > { %v2575_v23 = vpop.f32.mrf.mxu1 }
 0x225   : > { %v3052_v24 = vmax.f32 %v382_v22, 0.0  ;;  %v390_v22 = vld [vmem:[#allocation11 + $0x20] sm:$0xff]  ;;  %v392_v23 = vld [vmem:[#allocation11 + $0x30] sm:$0xff] }
 0x227   : > { %579 = vmatmul.mubr.f32.vlgmr.msra.gmra.mxu0 %v3052_v24  ;;  %650 = vmatmul.mubr.f32.vlgmr.msra.gmra.mxu1 %v3052_v24 }
 0x228   : > { %657 = vmatpush1.msra.mxu0 %v510_v25  ;;  %728 = vmatpush1.msra.mxu1 %v512_v26  ;;  %v2916_v25 = vmov 1983009808  }
 0x229   : > { %658 = vmatprep.subr.mxu0 %v503_v27  ;;  %729 = vmatprep.subr.mxu1 %v505_v28  ;;  %v811_v26 = vunpack.c.l.s4 %v2916_v25  ;;  %v813_v27 = vlaneseq  ;;  %v952_v25 = vld [vmem:[#allocation14 + $0xc8] sm:$0xff] (%p202_p4) }
 0x22a   : > { %659 = vmatpush1.msra.mxu0 %v502_v29  ;;  %730 = vmatpush1.msra.mxu1 %v504_v30 }
 0x22b   : > { %660 = vmatprep.subr.mxu0 %v495_v31  ;;  %731 = vmatprep.subr.mxu1 %v497_v32  ;;  %v812_v28 = vunpack.c.0.s8 %v811_v26  ;;  %v3060_v29 = vshrl.u32 %v813_v27, 7  ;;  %v1080_v26 = vld [vmem:[#allocation14 + $0x4c8] sm:$0xff] (%p202_p4)  ;;  %v951_v27 = vld [vmem:[#allocation14 + $0xc0] sm:$0xff] (%p202_p4) }
 0x22c   : > { %661 = vmatpush1.msra.mxu0 %v494_v33  ;;  %732 = vmatpush1.msra.mxu1 %v496_v34 }
 0x22d   : > { %662 = vmatprep.subr.mxu0 %v487_v35  ;;  %733 = vmatprep.subr.mxu1 %v489_v36  ;;  %v3063_v32 = vsub.s32 %v812_v28, %v3060_v29  ;;  %v1079_v28 = vld [vmem:[#allocation14 + $0x4c0] sm:$0xff] (%p202_p4) }
 0x22e   : > { %663 = vmatpush1.msra.mxu0 %v486_v37  ;;  %734 = vmatpush1.msra.mxu1 %v488_v38 }
 0x22f   : > { %664 = vmatprep.subr.mxu0 %v479_v39  ;;  %735 = vmatprep.subr.mxu1 %v481_v40 }
 0x230   : > { %665 = vmatpush1.msra.mxu0 %v478_v41  ;;  %736 = vmatpush1.msra.mxu1 %v480_v42 }
 0x231   : > { %666 = vmatprep.subr.mxu0 %v471_v43  ;;  %737 = vmatprep.subr.mxu1 %v473_v44 }
 0x232   : > { %667 = vmatpush1.msra.mxu0 %v470_v45  ;;  %738 = vmatpush1.msra.mxu1 %v472_v46 }
 0x233   : > { %668 = vmatprep.subr.mxu0 %v463_v47  ;;  %739 = vmatprep.subr.mxu1 %v465_v48  ;;  %v799_v48 = vld [vmem:[#allocation2 + $0x8] sm:$0xff] }
 0x234   : > { %669 = vmatpush1.msra.mxu0 %v462_v49  ;;  %740 = vmatpush1.msra.mxu1 %v464_v50 }
 0x235   : > { %670 = vmatprep.subr.mxu0 %v455_v51  ;;  %741 = vmatprep.subr.mxu1 %v457_v52  ;;  %v988_v51 = vld [vmem:[#allocation14 + $0x1e8] sm:$0xff] (%p202_p4) }
 0x236   : > { %671 = vmatpush1.msra.mxu0 %v454_v53  ;;  %742 = vmatpush1.msra.mxu1 %v456_v54  ;;  %v1116_v52 = vld [vmem:[#allocation14 + $0x5e8] sm:$0xff] (%p202_p4)  ;;  %v987_v53 = vld [vmem:[#allocation14 + $0x1e0] sm:$0xff] (%p202_p4) }
 0x237   : > { %672 = vmatprep.subr.mxu0 %v447_v55  ;;  %743 = vmatprep.subr.mxu1 %v449_v56  ;;  %v1115_v54 = vld [vmem:[#allocation14 + $0x5e0] sm:$0xff] (%p202_p4)  ;;  %v984_v55 = vld [vmem:[#allocation14 + $0x1c8] sm:$0xff] (%p202_p4) }
 0x238   : > { %673 = vmatpush1.msra.mxu0 %v446_v57  ;;  %744 = vmatpush1.msra.mxu1 %v448_v58  ;;  %v1112_v56 = vld [vmem:[#allocation14 + $0x5c8] sm:$0xff] (%p202_p4)  ;;  %v983_v57 = vld [vmem:[#allocation14 + $0x1c0] sm:$0xff] (%p202_p4) }
 0x239   : > { %674 = vmatprep.subr.mxu0 %v439_v59  ;;  %745 = vmatprep.subr.mxu1 %v441_v60  ;;  %v1111_v58 = vld [vmem:[#allocation14 + $0x5c0] sm:$0xff] (%p202_p4)  ;;  %v980_v59 = vld [vmem:[#allocation14 + $0x1a8] sm:$0xff] (%p202_p4) }
 0x23a   : > { %675 = vmatpush1.msra.mxu0 %v438_v61  ;;  %746 = vmatpush1.msra.mxu1 %v440_v62  ;;  %v1108_v60 = vld [vmem:[#allocation14 + $0x5a8] sm:$0xff] (%p202_p4)  ;;  %v979_v61 = vld [vmem:[#allocation14 + $0x1a0] sm:$0xff] (%p202_p4) }
 0x23b   : > { %676 = vmatprep.subr.mxu0 %v431_v63  ;;  %747 = vmatprep.subr.mxu1 %v433_v0  ;;  %v1107_v62 = vld [vmem:[#allocation14 + $0x5a0] sm:$0xff] (%p202_p4)  ;;  %v976_v63 = vld [vmem:[#allocation14 + $0x188] sm:$0xff] (%p202_p4) }
 0x23c   : > { %677 = vmatpush1.msra.mxu0 %v430_v1  ;;  %748 = vmatpush1.msra.mxu1 %v432_v3  ;;  %v1104_v0 = vld [vmem:[#allocation14 + $0x588] sm:$0xff] (%p202_p4)  ;;  %v975_v1 = vld [vmem:[#allocation14 + $0x180] sm:$0xff] (%p202_p4) }
 0x23d   : > { %678 = vmatprep.subr.mxu0 %v423_v4  ;;  %749 = vmatprep.subr.mxu1 %v425_v5  ;;  %v1103_v3 = vld [vmem:[#allocation14 + $0x580] sm:$0xff] (%p202_p4)  ;;  %v972_v4 = vld [vmem:[#allocation14 + $0x168] sm:$0xff] (%p202_p4) }
 0x23e   : > { %679 = vmatpush1.msra.mxu0 %v422_v6  ;;  %750 = vmatpush1.msra.mxu1 %v424_v7  ;;  %v1100_v5 = vld [vmem:[#allocation14 + $0x568] sm:$0xff] (%p202_p4)  ;;  %v971_v6 = vld [vmem:[#allocation14 + $0x160] sm:$0xff] (%p202_p4) }
 0x23f   : > { %680 = vmatprep.subr.mxu0 %v415_v8  ;;  %751 = vmatprep.subr.mxu1 %v417_v9  ;;  %v1099_v7 = vld [vmem:[#allocation14 + $0x560] sm:$0xff] (%p202_p4)  ;;  %v968_v8 = vld [vmem:[#allocation14 + $0x148] sm:$0xff] (%p202_p4) }
 0x240   : > { %681 = vmatpush1.msra.mxu0 %v414_v10  ;;  %752 = vmatpush1.msra.mxu1 %v416_v11  ;;  %v1096_v9 = vld [vmem:[#allocation14 + $0x548] sm:$0xff] (%p202_p4)  ;;  %v967_v10 = vld [vmem:[#allocation14 + $0x140] sm:$0xff] (%p202_p4) }
 0x241   : > { %682 = vmatprep.subr.mxu0 %v407_v12  ;;  %753 = vmatprep.subr.mxu1 %v409_v13  ;;  %v1095_v11 = vld [vmem:[#allocation14 + $0x540] sm:$0xff] (%p202_p4)  ;;  %v964_v12 = vld [vmem:[#allocation14 + $0x128] sm:$0xff] (%p202_p4) }
 0x242   : > { %683 = vmatpush1.msra.mxu0 %v406_v14  ;;  %754 = vmatpush1.msra.mxu1 %v408_v15  ;;  %v1092_v13 = vld [vmem:[#allocation14 + $0x528] sm:$0xff] (%p202_p4)  ;;  %v963_v14 = vld [vmem:[#allocation14 + $0x120] sm:$0xff] (%p202_p4) }
 0x243   : > { %684 = vmatprep.subr.mxu0 %v399_v16  ;;  %755 = vmatprep.subr.mxu1 %v401_v17  ;;  %v1091_v15 = vld [vmem:[#allocation14 + $0x520] sm:$0xff] (%p202_p4)  ;;  %v960_v16 = vld [vmem:[#allocation14 + $0x108] sm:$0xff] (%p202_p4) }
 0x244   : > { %685 = vmatpush1.msra.mxu0 %v398_v18  ;;  %756 = vmatpush1.msra.mxu1 %v400_v19  ;;  %v1088_v17 = vld [vmem:[#allocation14 + $0x508] sm:$0xff] (%p202_p4)  ;;  %v959_v18 = vld [vmem:[#allocation14 + $0x100] sm:$0xff] (%p202_p4) }
 0x245   : > { %686 = vmatprep.subr.mxu0 %v391_v20  ;;  %757 = vmatprep.subr.mxu1 %v393_v21  ;;  %v1087_v19 = vld [vmem:[#allocation14 + $0x500] sm:$0xff] (%p202_p4)  ;;  %v956_v20 = vld [vmem:[#allocation14 + $0xe8] sm:$0xff] (%p202_p4) }
 0x246   : > { %687 = vmatpush1.msra.mxu0 %v390_v22  ;;  %720 = vmatprep.mubr.f32.mxu0 %v2914_v2  ;;  %v1084_v21 = vld [vmem:[#allocation14 + $0x4e8] sm:$0xff] (%p202_p4)  ;;  %v955_v22 = vld [vmem:[#allocation14 + $0xe0] sm:$0xff] (%p202_p4) }
 0x247   : > { %758 = vmatpush1.msra.mxu1 %v392_v23  ;;  %791 = vmatprep.mubr.f32.mxu1 %v2914_v2  ;;  %v1083_v23 = vld [vmem:[#allocation14 + $0x4e0] sm:$0xff] (%p202_p4) }
 0x248   : > { %721 = vmatmul.mubr.f32.vlgmr.msra.gmra.mxu0 %v3052_v24  ;;  %792 = vmatmul.mubr.f32.vlgmr.msra.gmra.mxu1 %v3052_v24  ;;  %v798_v24 = vld [vmem:[#allocation2] sm:$0xff] }
 0x249   :  { %1505 = vmatprep.subr.mxu0 (%p202_p4), %v988_v51  ;;  %1576 = vmatprep.subr.mxu1 (%p202_p4), %v1116_v52  ;;  %v927_v51 = vld [vmem:[#allocation14] sm:$0xff] (%p202_p4) }
 0x24a   :  { %1506 = vmatpush1.msra.mxu0 (%p202_p4), %v987_v53  ;;  %1577 = vmatpush1.msra.mxu1 (%p202_p4), %v1115_v54  ;;  %v1055_v52 = vld [vmem:[#allocation14 + $0x400] sm:$0xff] (%p202_p4)  ;;  %v1052_v53 = vld [vmem:[#allocation14 + $0x3e8] sm:$0xff] (%p202_p4) }
 0x24b   :  { %1507 = vmatprep.subr.mxu0 (%p202_p4), %v984_v55  ;;  %1578 = vmatprep.subr.mxu1 (%p202_p4), %v1112_v56  ;;  %v1180_v54 = vld [vmem:[#allocation14 + $0x7e8] sm:$0xff] (%p202_p4)  ;;  %v1051_v55 = vld [vmem:[#allocation14 + $0x3e0] sm:$0xff] (%p202_p4) }
 0x24c   :  { %1508 = vmatpush1.msra.mxu0 (%p202_p4), %v983_v57  ;;  %1579 = vmatpush1.msra.mxu1 (%p202_p4), %v1111_v58  ;;  %v1179_v56 = vld [vmem:[#allocation14 + $0x7e0] sm:$0xff] (%p202_p4)  ;;  %v1048_v57 = vld [vmem:[#allocation14 + $0x3c8] sm:$0xff] (%p202_p4) }
 0x24d   :  { %1509 = vmatprep.subr.mxu0 (%p202_p4), %v980_v59  ;;  %1580 = vmatprep.subr.mxu1 (%p202_p4), %v1108_v60  ;;  %v1176_v58 = vld [vmem:[#allocation14 + $0x7c8] sm:$0xff] (%p202_p4)  ;;  %v1047_v59 = vld [vmem:[#allocation14 + $0x3c0] sm:$0xff] (%p202_p4) }
 0x24e   :  { %1510 = vmatpush1.msra.mxu0 (%p202_p4), %v979_v61  ;;  %1581 = vmatpush1.msra.mxu1 (%p202_p4), %v1107_v62  ;;  %v1175_v60 = vld [vmem:[#allocation14 + $0x7c0] sm:$0xff] (%p202_p4)  ;;  %v1044_v61 = vld [vmem:[#allocation14 + $0x3a8] sm:$0xff] (%p202_p4) }
 0x24f   :  { %1511 = vmatprep.subr.mxu0 (%p202_p4), %v976_v63  ;;  %1582 = vmatprep.subr.mxu1 (%p202_p4), %v1104_v0  ;;  %v1172_v62 = vld [vmem:[#allocation14 + $0x7a8] sm:$0xff] (%p202_p4)  ;;  %v1043_v63 = vld [vmem:[#allocation14 + $0x3a0] sm:$0xff] (%p202_p4) }
 0x250   :  { %1512 = vmatpush1.msra.mxu0 (%p202_p4), %v975_v1  ;;  %1583 = vmatpush1.msra.mxu1 (%p202_p4), %v1103_v3  ;;  %v1171_v0 = vld [vmem:[#allocation14 + $0x7a0] sm:$0xff] (%p202_p4)  ;;  %v1040_v1 = vld [vmem:[#allocation14 + $0x388] sm:$0xff] (%p202_p4) }
 0x251   :  { %1513 = vmatprep.subr.mxu0 (%p202_p4), %v972_v4  ;;  %1584 = vmatprep.subr.mxu1 (%p202_p4), %v1100_v5  ;;  %v1168_v3 = vld [vmem:[#allocation14 + $0x788] sm:$0xff] (%p202_p4)  ;;  %v1039_v4 = vld [vmem:[#allocation14 + $0x380] sm:$0xff] (%p202_p4) }
 0x252   :  { %1514 = vmatpush1.msra.mxu0 (%p202_p4), %v971_v6  ;;  %1585 = vmatpush1.msra.mxu1 (%p202_p4), %v1099_v7  ;;  %v1167_v5 = vld [vmem:[#allocation14 + $0x780] sm:$0xff] (%p202_p4)  ;;  %v1036_v6 = vld [vmem:[#allocation14 + $0x368] sm:$0xff] (%p202_p4) }
 0x253   :  { %1515 = vmatprep.subr.mxu0 (%p202_p4), %v968_v8  ;;  %1586 = vmatprep.subr.mxu1 (%p202_p4), %v1096_v9  ;;  %v1164_v7 = vld [vmem:[#allocation14 + $0x768] sm:$0xff] (%p202_p4)  ;;  %v1035_v8 = vld [vmem:[#allocation14 + $0x360] sm:$0xff] (%p202_p4) }
 0x254   :  { %1516 = vmatpush1.msra.mxu0 (%p202_p4), %v967_v10  ;;  %1587 = vmatpush1.msra.mxu1 (%p202_p4), %v1095_v11  ;;  %v1163_v9 = vld [vmem:[#allocation14 + $0x760] sm:$0xff] (%p202_p4)  ;;  %v3073_v10 = vsub.s32 (%p202_p4), 0, %v3060_v29  ;;  %v3076_v11 = vsub.s32 (%p202_p4), 1, %v3060_v29 }
 0x255   :  { %1517 = vmatprep.subr.mxu0 (%p202_p4), %v964_v12  ;;  %1588 = vmatprep.subr.mxu1 (%p202_p4), %v1092_v13  ;;  %v865_v12 = vsub.s32 (%p202_p4), 2, %v3060_v29  ;;  %v1032_v13 = vld [vmem:[#allocation14 + $0x348] sm:$0xff] (%p202_p4) }
 0x256   :  { %1518 = vmatpush1.msra.mxu0 (%p202_p4), %v963_v14  ;;  %1589 = vmatpush1.msra.mxu1 (%p202_p4), %v1091_v15  ;;  %v1160_v14 = vld [vmem:[#allocation14 + $0x748] sm:$0xff] (%p202_p4)  ;;  %v869_v15 = vsub.s32 (%p202_p4), 3, %v3060_v29 }
 0x257   :  { %1519 = vmatprep.subr.mxu0 (%p202_p4), %v960_v16  ;;  %1590 = vmatprep.subr.mxu1 (%p202_p4), %v1088_v17  ;;  %v1031_v16 = vld [vmem:[#allocation14 + $0x340] sm:$0xff] (%p202_p4) }
 0x258   :  { %1520 = vmatpush1.msra.mxu0 (%p202_p4), %v959_v18  ;;  %1591 = vmatpush1.msra.mxu1 (%p202_p4), %v1087_v19  ;;  %v1159_v17 = vld [vmem:[#allocation14 + $0x740] sm:$0xff] (%p202_p4)  ;;  %v1028_v18 = vld [vmem:[#allocation14 + $0x328] sm:$0xff] (%p202_p4) }
 0x259   :  { %1521 = vmatprep.subr.mxu0 (%p202_p4), %v956_v20  ;;  %1592 = vmatprep.subr.mxu1 (%p202_p4), %v1084_v21  ;;  %v1156_v19 = vld [vmem:[#allocation14 + $0x728] sm:$0xff] (%p202_p4)  ;;  %v3080_v20 = vld [vmem:[#allocation12] sm:$0xff] (%p202_p4)  ;;  %v1027_v21 = vld [vmem:[#allocation14 + $0x320] sm:$0xff] (%p202_p4) }
 0x25a   :  { %1522 = vmatpush1.msra.mxu0 (%p202_p4), %v955_v22  ;;  %1593 = vmatpush1.msra.mxu1 (%p202_p4), %v1083_v23  ;;  %v1155_v22 = vld [vmem:[#allocation14 + $0x720] sm:$0xff] (%p202_p4)  ;;  %v858_v23 = vrot.slane (%p202_p4), %v3080_v20, %v3073_v10 }
 0x25b   :  { %1523 = vmatprep.subr.mxu0 (%p202_p4), %v952_v25  ;;  %1594 = vmatprep.subr.mxu1 (%p202_p4), %v1080_v26  ;;  %v862_v25 = vrot.slane (%p202_p4), %v3080_v20, %v3076_v11  ;;  %v866_v26 = vrot.slane (%p202_p4), %v3080_v20, %v865_v12 }
 0x25c   :  { %1524 = vmatpush1.msra.mxu0 (%p202_p4), %v951_v27  ;;  %1595 = vmatpush1.msra.mxu1 (%p202_p4), %v1079_v28  ;;  %v1024_v27 = vld [vmem:[#allocation14 + $0x308] sm:$0xff] (%p202_p4) }
 0x25d   :  { %v1152_v28 = vld [vmem:[#allocation14 + $0x708] sm:$0xff] (%p202_p4) }
 0x2e7   : > { %v580_v30 = vpop.f32.mrf.mxu0  ;;  %v651_v31 = vpop.f32.mrf.mxu1 }
 0x2e9   : > { %v582_v33 = vpop.f32.mrf.mxu0  ;;  %v653_v34 = vpop.f32.mrf.mxu1 }
 0x2ea   : > { %v808_v35 = vcombine.low %v580_v30, %v582_v33  ;;  %v809_v36 = vcombine.low %v651_v31, %v653_v34  ;;  %v948_v30 = vld [vmem:[#allocation14 + $0xa8] sm:$0xff] (%p202_p4)  ;;  %v947_v33 = vld [vmem:[#allocation14 + $0xa0] sm:$0xff] (%p202_p4) }
 0x2eb   :  { %v1076_v31 = vld [vmem:[#allocation14 + $0x4a8] sm:$0xff] (%p202_p4)  ;;  %v1075_v34 = vld [vmem:[#allocation14 + $0x4a0] sm:$0xff] (%p202_p4)  ;;  %1525 = vmatprep.subr.mxu0 (%p202_p4), %v948_v30  ;;  %v870_v30 = vrot.slane (%p202_p4), %v3080_v20, %v869_v15 }
 0x2ec   : > { %v816_v2 = vrot.slane %v808_v35, %v3063_v32  ;;  %v823_v37 = vrot.slane %v809_v36, %v3063_v32  ;;  %v944_v35 = vld [vmem:[#allocation14 + $0x88] sm:$0xff] (%p202_p4)  ;;  %1596 = vmatprep.subr.mxu1 (%p202_p4), %v1076_v31  ;;  %1526 = vmatpush1.msra.mxu0 (%p202_p4), %v947_v33  ;;  %v1023_v31 = vld [vmem:[#allocation14 + $0x300] sm:$0xff] (%p202_p4) }
 0x2ed   :  { %v1072_v36 = vld [vmem:[#allocation14 + $0x488] sm:$0xff] (%p202_p4)  ;;  %1597 = vmatpush1.msra.mxu1 (%p202_p4), %v1075_v34  ;;  %1527 = vmatprep.subr.mxu0 (%p202_p4), %v944_v35  ;;  %v1151_v33 = vld [vmem:[#allocation14 + $0x700] sm:$0xff] (%p202_p4)  ;;  %v887_v34 = vcombine.low (%p202_p4), %v858_v23, %v862_v25 }
 0x2ee   : > { %v824_v38 = vcombine.low %v816_v2, %v823_v37  ;;  %v943_v2 = vld [vmem:[#allocation14 + $0x80] sm:$0xff] (%p202_p4)  ;;  %1598 = vmatprep.subr.mxu1 (%p202_p4), %v1072_v36  ;;  %v1020_v35 = vld [vmem:[#allocation14 + $0x2e8] sm:$0xff] (%p202_p4) }
 0x2ef   :  { %v1071_v37 = vld [vmem:[#allocation14 + $0x480] sm:$0xff] (%p202_p4)  ;;  %1528 = vmatpush1.msra.mxu0 (%p202_p4), %v943_v2  ;;  %v1148_v36 = vld [vmem:[#allocation14 + $0x6e8] sm:$0xff] (%p202_p4)  ;;  %v888_v2 = vcombine.low (%p202_p4), %v866_v26, %v870_v30 }
 0x2f0   : > { %v844_v39 = vmax.f32 %v798_v24, %v824_v38  ;;  %v940_v24 = vld [vmem:[#allocation14 + $0x68] sm:$0xff] (%p202_p4)  ;;  %1599 = vmatpush1.msra.mxu1 (%p202_p4), %v1071_v37  ;;  %v1019_v37 = vld [vmem:[#allocation14 + $0x2e0] sm:$0xff] (%p202_p4) }
 0x2f1   :  { %v1068_v38 = vld [vmem:[#allocation14 + $0x468] sm:$0xff] (%p202_p4)  ;;  %1529 = vmatprep.subr.mxu0 (%p202_p4), %v940_v24  ;;  %v1147_v24 = vld [vmem:[#allocation14 + $0x6e0] sm:$0xff] (%p202_p4) }
 0x2f2   : > { %846 = vst [vmem:[#allocation2] sm:$0xff] %v844_v39  ;;  %v939_v39 = vld [vmem:[#allocation14 + $0x60] sm:$0xff] (%p202_p4)  ;;  %1600 = vmatprep.subr.mxu1 (%p202_p4), %v1068_v38  ;;  %v895_v38 = vrot.slane (%p202_p4), %v887_v34, %v3063_v32  ;;  %v1240_v23 = vld [vmem:[#allocation14 + $0x9c8] sm:$0xff] (%p202_p4) }
 0x2f3   :  { %1530 = vmatpush1.msra.mxu0 (%p202_p4), %v939_v39  ;;  %v1016_v39 = vld [vmem:[#allocation14 + $0x2c8] sm:$0xff] (%p202_p4)  ;;  %v1239_v26 = vld [vmem:[#allocation14 + $0x9c0] sm:$0xff] (%p202_p4) }
 0x2f4   :  { %v1368_v25 = vld [vmem:[#allocation14 + $0xdc8] sm:$0xff] (%p202_p4) }
 0x2f5   :  { %v1364_v30 = vld [vmem:[#allocation14 + $0xda8] sm:$0xff] (%p202_p4) }
 0x2f6   :  { %v1232_v34 = vld [vmem:[#allocation14 + $0x988] sm:$0xff] (%p202_p4) }
 0x308   : > { %v722_v40 = vpop.f32.mrf.mxu0  ;;  %v793_v41 = vpop.f32.mrf.mxu1 }
 0x30a   : > { %v724_v42 = vpop.f32.mrf.mxu0  ;;  %v795_v43 = vpop.f32.mrf.mxu1 }
 0x30b   : > { %v825_v44 = vcombine.low %v722_v40, %v724_v42  ;;  %v826_v45 = vcombine.low %v793_v41, %v795_v43  ;;  %v1067_v40 = vld [vmem:[#allocation14 + $0x460] sm:$0xff] (%p202_p4)  ;;  %v936_v41 = vld [vmem:[#allocation14 + $0x48] sm:$0xff] (%p202_p4) }
 0x30c   :  { %v1064_v42 = vld [vmem:[#allocation14 + $0x448] sm:$0xff] (%p202_p4)  ;;  %v935_v43 = vld [vmem:[#allocation14 + $0x40] sm:$0xff] (%p202_p4)  ;;  %1601 = vmatpush1.msra.mxu1 (%p202_p4), %v1067_v40  ;;  %1531 = vmatprep.subr.mxu0 (%p202_p4), %v936_v41  ;;  %v902_v41 = vrot.slane (%p202_p4), %v888_v2, %v3063_v32 }
 0x30d   : > { %v833_v46 = vrot.slane %v825_v44, %v3063_v32  ;;  %v840_v47 = vrot.slane %v826_v45, %v3063_v32  ;;  %v1063_v44 = vld [vmem:[#allocation14 + $0x440] sm:$0xff] (%p202_p4)  ;;  %v932_v45 = vld [vmem:[#allocation14 + $0x28] sm:$0xff] (%p202_p4)  ;;  %1602 = vmatprep.subr.mxu1 (%p202_p4), %v1064_v42  ;;  %1532 = vmatpush1.msra.mxu0 (%p202_p4), %v935_v43 }
 0x30e   :  { %1603 = vmatpush1.msra.mxu1 (%p202_p4), %v1063_v44  ;;  %1533 = vmatprep.subr.mxu0 (%p202_p4), %v932_v45  ;;  %v1144_v40 = vld [vmem:[#allocation14 + $0x6c8] sm:$0xff] (%p202_p4)  ;;  %v1015_v42 = vld [vmem:[#allocation14 + $0x2c0] sm:$0xff] (%p202_p4) }
 0x30f   : > { %v841_v49 = vcombine.low %v833_v46, %v840_v47  ;;  %204 = sbr.rel (!%p202_p4) target bundleno = 153 (0x99), region = 136  ;;  %v1060_v46 = vld [vmem:[#allocation14 + $0x428] sm:$0xff] (%p202_p4)  ;;  %v931_v47 = vld [vmem:[#allocation14 + $0x20] sm:$0xff] (%p202_p4) }
 0x310   :  { %1604 = vmatprep.subr.mxu1 (%p202_p4), %v1060_v46  ;;  %1534 = vmatpush1.msra.mxu0 (%p202_p4), %v931_v47  ;;  %v1143_v43 = vld [vmem:[#allocation14 + $0x6c0] sm:$0xff] (%p202_p4)  ;;  %v1012_v45 = vld [vmem:[#allocation14 + $0x2a8] sm:$0xff] (%p202_p4)  ;;  %v903_v47 = vcombine.low (%p202_p4), %v895_v38, %v902_v41 }
 0x311   : > { %v845_v50 = vmax.f32 %v799_v48, %v841_v49  ;;  %v1059_v48 = vld [vmem:[#allocation14 + $0x420] sm:$0xff] (%p202_p4)  ;;  %v928_v49 = vld [vmem:[#allocation14 + $0x8] sm:$0xff] (%p202_p4) }
 0x312   :  { %1605 = vmatpush1.msra.mxu1 (%p202_p4), %v1059_v48  ;;  %1535 = vmatprep.subr.mxu0 (%p202_p4), %v928_v49  ;;  %v851_v44 = vld [vmem:[#allocation2] sm:$0xff] (%p202_p4)  ;;  %v1140_v46 = vld [vmem:[#allocation14 + $0x6a8] sm:$0xff] (%p202_p4) }
 0x313   : > { %847 = vst [vmem:[#allocation2 + $0x8] sm:$0xff] %v845_v50  ;;  %v1056_v50 = vld [vmem:[#allocation14 + $0x408] sm:$0xff] (%p202_p4)  ;;  %1536 = vmatpush1.msra.mxu0 (%p202_p4), %v927_v51  ;;  %v1011_v48 = vld [vmem:[#allocation14 + $0x2a0] sm:$0xff] (%p202_p4) }
 0x314   :  { %1606 = vmatprep.subr.mxu1 %v1056_v50  ;;  %1537 = vmatprep.subr.mxu0 %v1052_v53  ;;  %v1139_v49 = vld [vmem:[#allocation14 + $0x6a0] sm:$0xff]  ;;  %v1008_v50 = vld [vmem:[#allocation14 + $0x288] sm:$0xff] }
 0x315   :  { %1607 = vmatpush1.msra.mxu1 %v1055_v52  ;;  %1538 = vmatpush2.msra.mxu0 %v1051_v55  ;;  %v1136_v51 = vld [vmem:[#allocation14 + $0x688] sm:$0xff]  ;;  %v923_v52 = vadd.f32 %v903_v47, %v851_v44  ;;  %v1007_v53 = vld [vmem:[#allocation14 + $0x280] sm:$0xff] }
 0x316   :  { %1608 = vmatprep.subr.mxu1 %v1180_v54  ;;  %1539 = vmatprep.subr.mxu0 %v1048_v57  ;;  %v1135_v54 = vld [vmem:[#allocation14 + $0x680] sm:$0xff]  ;;  %v1004_v55 = vld [vmem:[#allocation14 + $0x268] sm:$0xff] }
 0x317   :  { %1609 = vmatpush2.msra.mxu1 %v1179_v56  ;;  %1540 = vmatpush2.msra.mxu0 %v1047_v59  ;;  %v1132_v56 = vld [vmem:[#allocation14 + $0x668] sm:$0xff]  ;;  %v925_v57 = vmax.f32 %v923_v52, 0.0  ;;  %v1131_v59 = vld [vmem:[#allocation14 + $0x660] sm:$0xff] }
 0x318   :  { %1610 = vmatprep.subr.mxu1 %v1176_v58  ;;  %1541 = vmatprep.subr.mxu0 %v1044_v61  ;;  %v1003_v58 = vld [vmem:[#allocation14 + $0x260] sm:$0xff]  ;;  %v1128_v61 = vld [vmem:[#allocation14 + $0x648] sm:$0xff] }
 0x319   :  { %1611 = vmatpush2.msra.mxu1 %v1175_v60  ;;  %1542 = vmatpush2.msra.mxu0 %v1043_v63  ;;  %v1000_v60 = vld [vmem:[#allocation14 + $0x248] sm:$0xff]  ;;  %v1463_v63 = vcombine.high %v925_v57, %v925_v57  ;;  %v1359_v2 = vld [vmem:[#allocation14 + $0xd80] sm:$0xff] }
 0x31a   :  { %1612 = vmatprep.subr.mxu1 %v1172_v62  ;;  %1543 = vmatprep.subr.mxu0 %v1040_v1  ;;  %v3095_v62 = vrot.slane %v925_v57, %v3063_v32  ;;  %v1127_v1 = vld [vmem:[#allocation14 + $0x640] sm:$0xff]  ;;  %v1352_v41 = vld [vmem:[#allocation14 + $0xd48] sm:$0xff] }
 0x31b   :  { %1613 = vmatpush2.msra.mxu1 %v1171_v0  ;;  %1544 = vmatpush2.msra.mxu0 %v1039_v4  ;;  %v999_v0 = vld [vmem:[#allocation14 + $0x240] sm:$0xff]  ;;  %v1124_v4 = vld [vmem:[#allocation14 + $0x628] sm:$0xff] }
 0x31c   :  { %1614 = vmatprep.subr.mxu1 %v1168_v3  ;;  %1545 = vmatprep.subr.mxu0 %v1036_v6  ;;  %v996_v3 = vld [vmem:[#allocation14 + $0x228] sm:$0xff]  ;;  %v995_v6 = vld [vmem:[#allocation14 + $0x220] sm:$0xff] }
 0x31d   :  { %1615 = vmatpush2.msra.mxu1 %v1167_v5  ;;  %1546 = vmatpush2.msra.mxu0 %v1035_v8  ;;  %v3098_v5 = vrot.slane %v1463_v63, %v3063_v32  ;;  %v992_v8 = vld [vmem:[#allocation14 + $0x208] sm:$0xff]  ;;  %v1227_v38 = vld [vmem:[#allocation14 + $0x960] sm:$0xff] }
 0x31e   :  { %1616 = vmatprep.subr.mxu1 %v1164_v7  ;;  %1547 = vmatprep.subr.mxu0 %v1032_v13  ;;  %v1123_v7 = vld [vmem:[#allocation14 + $0x620] sm:$0xff]  ;;  %v3102_v13 = vcombine.high %v3095_v62, %v3095_v62  ;;  %v1220_v44 = vld [vmem:[#allocation14 + $0x928] sm:$0xff] }
 0x31f   :  { %1617 = vmatpush2.msra.mxu1 %v1163_v9  ;;  %1548 = vmatpush2.msra.mxu0 %v1031_v16  ;;  %v1120_v9 = vld [vmem:[#allocation14 + $0x608] sm:$0xff]  ;;  %v1119_v16 = vld [vmem:[#allocation14 + $0x600] sm:$0xff] }
 0x320   :  { %1618 = vmatprep.subr.mxu1 %v1160_v14  ;;  %1549 = vmatprep.subr.mxu0 %v1028_v18  ;;  %v991_v14 = vld [vmem:[#allocation14 + $0x200] sm:$0xff]  ;;  %v1244_v18 = vld [vmem:[#allocation14 + $0x9e8] sm:$0xff] }
 0x321   :  { %1619 = vmatpush2.msra.mxu1 %v1159_v17  ;;  %1550 = vmatpush2.msra.mxu0 %v1027_v21  ;;  %v3106_v17 = vcombine.high %v3098_v5, %v3098_v5  ;;  %v1243_v21 = vld [vmem:[#allocation14 + $0x9e0] sm:$0xff]  ;;  %v1212_v52 = vld [vmem:[#allocation14 + $0x8e8] sm:$0xff] }
 0x322   :  { %1620 = vmatprep.subr.mxu1 %v1156_v19  ;;  %1551 = vmatprep.subr.mxu0 %v1024_v27  ;;  %v1372_v19 = vld [vmem:[#allocation14 + $0xde8] sm:$0xff]  ;;  %v1367_v27 = vld [vmem:[#allocation14 + $0xdc0] sm:$0xff] }
 0x323   :  { %1621 = vmatpush2.msra.mxu1 %v1155_v22  ;;  %1552 = vmatpush2.msra.mxu0 %v1023_v31  ;;  %v1371_v22 = vld [vmem:[#allocation14 + $0xde0] sm:$0xff]  ;;  %v1336_v57 = vld [vmem:[#allocation14 + $0xcc8] sm:$0xff] }
 0x324   :  { %1622 = vmatprep.subr.mxu1 %v1152_v28  ;;  %1553 = vmatprep.subr.mxu0 %v1020_v35  ;;  %v1236_v28 = vld [vmem:[#allocation14 + $0x9a8] sm:$0xff]  ;;  %v1235_v31 = vld [vmem:[#allocation14 + $0x9a0] sm:$0xff] }
 0x325   :  { %1623 = vmatpush2.msra.mxu1 %v1151_v33  ;;  %1554 = vmatpush2.msra.mxu0 %v1019_v37  ;;  %v1363_v33 = vld [vmem:[#allocation14 + $0xda0] sm:$0xff]  ;;  %v1360_v35 = vld [vmem:[#allocation14 + $0xd88] sm:$0xff] }
 0x326   :  { %1624 = vmatprep.subr.mxu1 %v1148_v36  ;;  %1555 = vmatprep.subr.mxu0 %v1016_v39  ;;  %v1231_v36 = vld [vmem:[#allocation14 + $0x980] sm:$0xff]  ;;  %v1228_v37 = vld [vmem:[#allocation14 + $0x968] sm:$0xff] }
 0x327   :  { %1625 = vmatpush2.msra.mxu1 %v1147_v24  ;;  %1556 = vmatpush2.msra.mxu0 %v1015_v42  ;;  %v1356_v24 = vld [vmem:[#allocation14 + $0xd68] sm:$0xff]  ;;  %v1355_v39 = vld [vmem:[#allocation14 + $0xd60] sm:$0xff] }
 0x328   :  { %1626 = vmatprep.subr.mxu1 %v1144_v40  ;;  %1557 = vmatprep.subr.mxu0 %v1012_v45  ;;  %v1224_v40 = vld [vmem:[#allocation14 + $0x948] sm:$0xff]  ;;  %v1223_v42 = vld [vmem:[#allocation14 + $0x940] sm:$0xff] }
 0x329   :  { %1627 = vmatpush2.msra.mxu1 %v1143_v43  ;;  %1558 = vmatpush2.msra.mxu0 %v1011_v48  ;;  %v1351_v43 = vld [vmem:[#allocation14 + $0xd40] sm:$0xff]  ;;  %v1348_v45 = vld [vmem:[#allocation14 + $0xd28] sm:$0xff] }
 0x32a   :  { %1628 = vmatprep.subr.mxu1 %v1140_v46  ;;  %1559 = vmatprep.subr.mxu0 %v1008_v50  ;;  %v1219_v46 = vld [vmem:[#allocation14 + $0x920] sm:$0xff]  ;;  %v1216_v48 = vld [vmem:[#allocation14 + $0x908] sm:$0xff] }
 0x32b   :  { %1629 = vmatpush2.msra.mxu1 %v1139_v49  ;;  %1560 = vmatpush2.msra.mxu0 %v1007_v53  ;;  %v1347_v47 = vld [vmem:[#allocation14 + $0xd20] sm:$0xff]  ;;  %v1344_v49 = vld [vmem:[#allocation14 + $0xd08] sm:$0xff] }
 0x32c   :  { %1630 = vmatprep.subr.mxu1 %v1136_v51  ;;  %1561 = vmatprep.subr.mxu0 %v1004_v55  ;;  %v1215_v50 = vld [vmem:[#allocation14 + $0x900] sm:$0xff]  ;;  %v1340_v53 = vld [vmem:[#allocation14 + $0xce8] sm:$0xff] }
 0x32d   :  { %1631 = vmatpush2.msra.mxu1 %v1135_v54  ;;  %1562 = vmatpush2.msra.mxu0 %v1003_v58  ;;  %v1343_v51 = vld [vmem:[#allocation14 + $0xd00] sm:$0xff] }
 0x32e   :  { %1632 = vmatprep.subr.mxu1 %v1132_v56  ;;  %1563 = vmatprep.subr.mxu0 %v1000_v60  ;;  %v1211_v54 = vld [vmem:[#allocation14 + $0x8e0] sm:$0xff]  ;;  %v1208_v56 = vld [vmem:[#allocation14 + $0x8c8] sm:$0xff] }
 0x32f   :  { %1633 = vmatpush2.msra.mxu1 %v1131_v59  ;;  %1564 = vmatpush2.msra.mxu0 %v999_v0  ;;  %v1339_v55 = vld [vmem:[#allocation14 + $0xce0] sm:$0xff]  ;;  %v1204_v60 = vld [vmem:[#allocation14 + $0x8a8] sm:$0xff] }
 0x330   :  { %1634 = vmatprep.subr.mxu1 %v1128_v61  ;;  %1565 = vmatprep.subr.mxu0 %v996_v3  ;;  %v1207_v58 = vld [vmem:[#allocation14 + $0x8c0] sm:$0xff]  ;;  %v1332_v61 = vld [vmem:[#allocation14 + $0xca8] sm:$0xff] }
 0x331   :  { %1635 = vmatpush2.msra.mxu1 %v1127_v1  ;;  %1566 = vmatpush2.msra.mxu0 %v995_v6  ;;  %v1335_v59 = vld [vmem:[#allocation14 + $0xcc0] sm:$0xff]  ;;  %v1200_v1 = vld [vmem:[#allocation14 + $0x888] sm:$0xff] }
 0x332   :  { %1636 = vmatprep.subr.mxu1 %v1124_v4  ;;  %1567 = vmatprep.subr.mxu0 %v992_v8  ;;  %v1203_v63 = vld [vmem:[#allocation14 + $0x8a0] sm:$0xff]  ;;  %v1328_v3 = vld [vmem:[#allocation14 + $0xc88] sm:$0xff] }
 0x333   :  { %1637 = vmatpush2.msra.mxu1 %v1123_v7  ;;  %1568 = vmatpush2.msra.mxu0 %v991_v14  ;;  %v1331_v0 = vld [vmem:[#allocation14 + $0xca0] sm:$0xff]  ;;  %v1196_v7 = vld [vmem:[#allocation14 + $0x868] sm:$0xff] }
 0x334   :  { %1638 = vmatprep.subr.mxu1 %v1120_v9  ;;  %1569 = vmatprep.mubr.f32.mxu0 %v3102_v13  ;;  %v1199_v4 = vld [vmem:[#allocation14 + $0x880] sm:$0xff]  ;;  %v1324_v8 = vld [vmem:[#allocation14 + $0xc68] sm:$0xff] }
 0x335   :  { %1639 = vmatpush2.msra.mxu1 %v1119_v16  ;;  %1570 = vmatmul.mubr.f32.vlgmr.msra.gmra.mxu0 %v3095_v62  ;;  %v1327_v6 = vld [vmem:[#allocation14 + $0xc80] sm:$0xff]  ;;  %v1192_v16 = vld [vmem:[#allocation14 + $0x848] sm:$0xff] }
 0x336   :  { %1640 = vmatprep.mubr.f32.mxu1 %v3106_v17  ;;  %1647 = vmatprep.subr.mxu0 %v1244_v18  ;;  %v1195_v9 = vld [vmem:[#allocation14 + $0x860] sm:$0xff]  ;;  %v1320_v18 = vld [vmem:[#allocation14 + $0xc48] sm:$0xff] }
 0x337   :  { %1718 = vmatprep.subr.mxu1 %v1372_v19  ;;  %1641 = vmatmul.mubr.f32.vlgmr.msra.gmra.mxu1 %v3098_v5  ;;  %v1323_v14 = vld [vmem:[#allocation14 + $0xc60] sm:$0xff] }
 0x338   :  { %1648 = vmatpush1.msra.mxu0 %v1243_v21  ;;  %1719 = vmatpush1.msra.mxu1 %v1371_v22  ;;  %v1191_v19 = vld [vmem:[#allocation14 + $0x840] sm:$0xff]  ;;  %v873_v22 = vsub.s32 4, %v3060_v29 }
 0x339   :  { %1649 = vmatprep.subr.mxu0 %v1240_v23  ;;  %1720 = vmatprep.subr.mxu1 %v1368_v25  ;;  %v1319_v21 = vld [vmem:[#allocation14 + $0xc40] sm:$0xff]  ;;  %v1188_v23 = vld [vmem:[#allocation14 + $0x828] sm:$0xff] }
 0x33a   :  { %1650 = vmatpush1.msra.mxu0 %v1239_v26  ;;  %1721 = vmatpush1.msra.mxu1 %v1367_v27  ;;  %v1316_v25 = vld [vmem:[#allocation14 + $0xc28] sm:$0xff]  ;;  %v877_v26 = vsub.s32 5, %v3060_v29  ;;  %v881_v27 = vsub.s32 6, %v3060_v29 }
 0x33b   :  { %1651 = vmatprep.subr.mxu0 %v1236_v28  ;;  %1722 = vmatprep.subr.mxu1 %v1364_v30  ;;  %v885_v28 = vsub.s32 7, %v3060_v29  ;;  %v1187_v30 = vld [vmem:[#allocation14 + $0x820] sm:$0xff] }
 0x33c   :  { %1652 = vmatpush1.msra.mxu0 %v1235_v31  ;;  %1723 = vmatpush1.msra.mxu1 %v1363_v33  ;;  %v1315_v31 = vld [vmem:[#allocation14 + $0xc20] sm:$0xff]  ;;  %v1184_v33 = vld [vmem:[#allocation14 + $0x808] sm:$0xff] }
 0x33d   :  { %1653 = vmatprep.subr.mxu0 %v1232_v34  ;;  %1724 = vmatprep.subr.mxu1 %v1360_v35  ;;  %v1312_v34 = vld [vmem:[#allocation14 + $0xc08] sm:$0xff]  ;;  %v1183_v35 = vld [vmem:[#allocation14 + $0x800] sm:$0xff] }
 0x33e   :  { %1654 = vmatpush1.msra.mxu0 %v1231_v36  ;;  %1725 = vmatpush1.msra.mxu1 %v1359_v2  ;;  %v1311_v36 = vld [vmem:[#allocation14 + $0xc00] sm:$0xff]  ;;  %v874_v2 = vrot.slane %v3080_v20, %v873_v22  ;;  %v1276_v22 = vld [vmem:[#allocation14 + $0xae8] sm:$0xff] }
 0x33f   :  { %1655 = vmatprep.subr.mxu0 %v1228_v37  ;;  %1726 = vmatprep.subr.mxu1 %v1356_v24  ;;  %v1308_v37 = vld [vmem:[#allocation14 + $0xbe8] sm:$0xff]  ;;  %v2380_v29 = vld [vmem:[#allocation20 + $0x98] sm:$0xff] }
 0x340   :  { %1656 = vmatpush1.msra.mxu0 %v1227_v38  ;;  %1727 = vmatpush1.msra.mxu1 %v1355_v39  ;;  %v1436_v24 = vld [vmem:[#allocation14 + $0xfe8] sm:$0xff]  ;;  %v878_v38 = vrot.slane %v3080_v20, %v877_v26  ;;  %v882_v39 = vrot.slane %v3080_v20, %v881_v27  ;;  %v1275_v26 = vld [vmem:[#allocation14 + $0xae0] sm:$0xff] }
 0x341   :  { %1657 = vmatprep.subr.mxu0 %v1224_v40  ;;  %1728 = vmatprep.subr.mxu1 %v1352_v41  ;;  %v886_v40 = vrot.slane %v3080_v20, %v885_v28  ;;  %v1307_v41 = vld [vmem:[#allocation14 + $0xbe0] sm:$0xff]  ;;  %v1272_v28 = vld [vmem:[#allocation14 + $0xac8] sm:$0xff] }
 0x342   :  { %1658 = vmatpush1.msra.mxu0 %v1223_v42  ;;  %1729 = vmatpush1.msra.mxu1 %v1351_v43  ;;  %v1435_v42 = vld [vmem:[#allocation14 + $0xfe0] sm:$0xff]  ;;  %v1304_v43 = vld [vmem:[#allocation14 + $0xbc8] sm:$0xff] }
 0x343   :  { %1659 = vmatprep.subr.mxu0 %v1220_v44  ;;  %1730 = vmatprep.subr.mxu1 %v1348_v45  ;;  %v1432_v44 = vld [vmem:[#allocation14 + $0xfc8] sm:$0xff]  ;;  %v1303_v45 = vld [vmem:[#allocation14 + $0xbc0] sm:$0xff] }
 0x344   :  { %1660 = vmatpush1.msra.mxu0 %v1219_v46  ;;  %1731 = vmatpush1.msra.mxu1 %v1347_v47  ;;  %v1431_v46 = vld [vmem:[#allocation14 + $0xfc0] sm:$0xff]  ;;  %v1300_v47 = vld [vmem:[#allocation14 + $0xba8] sm:$0xff] }
 0x345   :  { %1661 = vmatprep.subr.mxu0 %v1216_v48  ;;  %1732 = vmatprep.subr.mxu1 %v1344_v49  ;;  %v1428_v48 = vld [vmem:[#allocation14 + $0xfa8] sm:$0xff]  ;;  %v904_v49 = vcombine.low %v874_v2, %v878_v38  ;;  %v1299_v20 = vld [vmem:[#allocation14 + $0xba0] sm:$0xff] }
 0x346   :  { %1662 = vmatpush1.msra.mxu0 %v1215_v50  ;;  %1733 = vmatpush1.msra.mxu1 %v1343_v51  ;;  %v905_v50 = vcombine.low %v882_v39, %v886_v40  ;;  %v1427_v51 = vld [vmem:[#allocation14 + $0xfa0] sm:$0xff]  ;;  %v1392_v38 = vld [vmem:[#allocation14 + $0xe88] sm:$0xff] }
 0x347   :  { %1663 = vmatprep.subr.mxu0 %v1212_v52  ;;  %1734 = vmatprep.subr.mxu1 %v1340_v53  ;;  %v1296_v52 = vld [vmem:[#allocation14 + $0xb88] sm:$0xff]  ;;  %v1403_v27 = vld [vmem:[#allocation14 + $0xee0] sm:$0xff] }
 0x348   :  { %1664 = vmatpush1.msra.mxu0 %v1211_v54  ;;  %1735 = vmatpush1.msra.mxu1 %v1339_v55  ;;  %v1424_v53 = vld [vmem:[#allocation14 + $0xf88] sm:$0xff]  ;;  %v1295_v54 = vld [vmem:[#allocation14 + $0xb80] sm:$0xff] }
 0x349   :  { %1665 = vmatprep.subr.mxu0 %v1208_v56  ;;  %1736 = vmatprep.subr.mxu1 %v1336_v57  ;;  %v1423_v55 = vld [vmem:[#allocation14 + $0xf80] sm:$0xff]  ;;  %v1292_v56 = vld [vmem:[#allocation14 + $0xb68] sm:$0xff] }
 0x34a   :  { %1666 = vmatpush1.msra.mxu0 %v1207_v58  ;;  %1737 = vmatpush1.msra.mxu1 %v1335_v59  ;;  %v1420_v57 = vld [vmem:[#allocation14 + $0xf68] sm:$0xff]  ;;  %v912_v58 = vrot.slane %v904_v49, %v3063_v32  ;;  %v919_v59 = vrot.slane %v905_v50, %v3063_v32  ;;  %v1267_v2 = vld [vmem:[#allocation14 + $0xaa0] sm:$0xff] }
 0x34b   :  { %1667 = vmatprep.subr.mxu0 %v1204_v60  ;;  %1738 = vmatprep.subr.mxu1 %v1332_v61  ;;  %v1291_v60 = vld [vmem:[#allocation14 + $0xb60] sm:$0xff] }
 0x34c   :  { %1668 = vmatpush1.msra.mxu0 %v1203_v63  ;;  %1739 = vmatpush1.msra.mxu1 %v1331_v0  ;;  %v1419_v61 = vld [vmem:[#allocation14 + $0xf60] sm:$0xff]  ;;  %v1288_v63 = vld [vmem:[#allocation14 + $0xb48] sm:$0xff] }
 0x34d   :  { %1669 = vmatprep.subr.mxu0 %v1200_v1  ;;  %1740 = vmatprep.subr.mxu1 %v1328_v3  ;;  %v1416_v0 = vld [vmem:[#allocation14 + $0xf48] sm:$0xff]  ;;  %v1287_v1 = vld [vmem:[#allocation14 + $0xb40] sm:$0xff] }
 0x34e   :  { %1670 = vmatpush1.msra.mxu0 %v1199_v4  ;;  %1741 = vmatpush1.msra.mxu1 %v1327_v6  ;;  %v1415_v3 = vld [vmem:[#allocation14 + $0xf40] sm:$0xff]  ;;  %v1284_v4 = vld [vmem:[#allocation14 + $0xb28] sm:$0xff] }
 0x34f   :  { %1671 = vmatprep.subr.mxu0 %v1196_v7  ;;  %1742 = vmatprep.subr.mxu1 %v1324_v8  ;;  %v1412_v6 = vld [vmem:[#allocation14 + $0xf28] sm:$0xff]  ;;  %v920_v7 = vcombine.low %v912_v58, %v919_v59  ;;  %v1283_v8 = vld [vmem:[#allocation14 + $0xb20] sm:$0xff] }
 0x350   :  { %1672 = vmatpush1.msra.mxu0 %v1195_v9  ;;  %1743 = vmatpush1.msra.mxu1 %v1323_v14  ;;  %v1411_v9 = vld [vmem:[#allocation14 + $0xf20] sm:$0xff]  ;;  %v852_v14 = vld [vmem:[#allocation2 + $0x8] sm:$0xff] }
 0x351   :  { %1673 = vmatprep.subr.mxu0 %v1192_v16  ;;  %1744 = vmatprep.subr.mxu1 %v1320_v18  ;;  %v1280_v16 = vld [vmem:[#allocation14 + $0xb08] sm:$0xff]  ;;  %v1263_v39 = vld [vmem:[#allocation14 + $0xa80] sm:$0xff] }
 0x352   :  { %1674 = vmatpush1.msra.mxu0 %v1191_v19  ;;  %1745 = vmatpush1.msra.mxu1 %v1319_v21  ;;  %v1408_v18 = vld [vmem:[#allocation14 + $0xf08] sm:$0xff]  ;;  %v1279_v19 = vld [vmem:[#allocation14 + $0xb00] sm:$0xff] }
 0x353   :  { %1675 = vmatprep.subr.mxu0 %v1188_v23  ;;  %1746 = vmatprep.subr.mxu1 %v1316_v25  ;;  %v1407_v21 = vld [vmem:[#allocation14 + $0xf00] sm:$0xff]  ;;  %v1404_v23 = vld [vmem:[#allocation14 + $0xee8] sm:$0xff]  ;;  %v924_v25 = vadd.f32 %v920_v7, %v852_v14  ;;  %v982_v7 = vld [vmem:[#allocation14 + $0x1b8] sm:$0xff] }
 0x354   :  { %1676 = vmatpush1.msra.mxu0 %v1187_v30  ;;  %1747 = vmatpush1.msra.mxu1 %v1315_v31  ;;  %v1400_v30 = vld [vmem:[#allocation14 + $0xec8] sm:$0xff]  ;;  %v1271_v31 = vld [vmem:[#allocation14 + $0xac0] sm:$0xff]  ;;  %v1109_v14 = vld [vmem:[#allocation14 + $0x5b0] sm:$0xff] }
 0x355   :  { %1677 = vmatprep.subr.mxu0 %v1184_v33  ;;  %1748 = vmatprep.subr.mxu1 %v1312_v34  ;;  %v1399_v33 = vld [vmem:[#allocation14 + $0xec0] sm:$0xff]  ;;  %v1268_v34 = vld [vmem:[#allocation14 + $0xaa8] sm:$0xff] }
 0x356   :  { %1678 = vmatpush1.msra.mxu0 %v1183_v35  ;;  %1749 = vmatpush1.msra.mxu1 %v1311_v36  ;;  %v1396_v35 = vld [vmem:[#allocation14 + $0xea8] sm:$0xff]  ;;  %v926_v36 = vmax.f32 %v924_v25, 0.0  ;;  %v1391_v40 = vld [vmem:[#allocation14 + $0xe80] sm:$0xff]  ;;  %v973_v25 = vld [vmem:[#allocation14 + $0x170] sm:$0xff] }
 0x357   :  { %1679 = vmatprep.subr.mxu0 %v1308_v37  ;;  %1750 = vmatprep.subr.mxu1 %v1436_v24  ;;  %v1395_v37 = vld [vmem:[#allocation14 + $0xea0] sm:$0xff]  ;;  %v1264_v24 = vld [vmem:[#allocation14 + $0xa88] sm:$0xff] }
 0x358   :  { %1680 = vmatpush2.msra.mxu0 %v1307_v41  ;;  %1751 = vmatpush2.msra.mxu1 %v1435_v42  ;;  %v1260_v41 = vld [vmem:[#allocation14 + $0xa68] sm:$0xff]  ;;  %v1255_v49 = vld [vmem:[#allocation14 + $0xa40] sm:$0xff] }
 0x359   :  { %1681 = vmatprep.subr.mxu0 %v1304_v43  ;;  %1752 = vmatprep.subr.mxu1 %v1432_v44  ;;  %v1388_v42 = vld [vmem:[#allocation14 + $0xe68] sm:$0xff]  ;;  %v1480_v43 = vcombine.high %v926_v36, %v926_v36  ;;  %v1259_v44 = vld [vmem:[#allocation14 + $0xa60] sm:$0xff] }
 0x35a   :  { %1682 = vmatpush2.msra.mxu0 %v1303_v45  ;;  %1753 = vmatpush2.msra.mxu1 %v1431_v46  ;;  %v1387_v45 = vld [vmem:[#allocation14 + $0xe60] sm:$0xff]  ;;  %v1256_v46 = vld [vmem:[#allocation14 + $0xa48] sm:$0xff] }
 0x35b   :  { %1683 = vmatprep.subr.mxu0 %v1300_v47  ;;  %1754 = vmatprep.subr.mxu1 %v1428_v48  ;;  %v1384_v47 = vld [vmem:[#allocation14 + $0xe48] sm:$0xff]  ;;  %v3123_v48 = vrot.slane %v926_v36, %v3063_v32  ;;  %v1383_v50 = vld [vmem:[#allocation14 + $0xe40] sm:$0xff]  ;;  %v1093_v36 = vld [vmem:[#allocation14 + $0x530] sm:$0xff] }
 0x35c   :  { %1684 = vmatpush2.msra.mxu0 %v1299_v20  ;;  %1755 = vmatpush2.msra.mxu1 %v1427_v51  ;;  %v1252_v20 = vld [vmem:[#allocation14 + $0xa28] sm:$0xff]  ;;  %v1247_v58 = vld [vmem:[#allocation14 + $0xa00] sm:$0xff] }
 0x35d   :  { %1685 = vmatprep.subr.mxu0 %v1296_v52  ;;  %1756 = vmatprep.subr.mxu1 %v1424_v53  ;;  %v1380_v51 = vld [vmem:[#allocation14 + $0xe28] sm:$0xff]  ;;  %v3126_v52 = vrot.slane %v1480_v43, %v3063_v32  ;;  %v1251_v53 = vld [vmem:[#allocation14 + $0xa20] sm:$0xff]  ;;  %v954_v43 = vld [vmem:[#allocation14 + $0xd8] sm:$0xff] }
 0x35e   :  { %1686 = vmatpush2.msra.mxu0 %v1295_v54  ;;  %1757 = vmatpush2.msra.mxu1 %v1423_v55  ;;  %v1379_v54 = vld [vmem:[#allocation14 + $0xe20] sm:$0xff]  ;;  %v1248_v55 = vld [vmem:[#allocation14 + $0xa08] sm:$0xff] }
 0x35f   :  { %1687 = vmatprep.subr.mxu0 %v1292_v56  ;;  %1758 = vmatprep.subr.mxu1 %v1420_v57  ;;  %v1376_v56 = vld [vmem:[#allocation14 + $0xe08] sm:$0xff]  ;;  %v3130_v57 = vcombine.high %v3123_v48, %v3123_v48  ;;  %v1375_v59 = vld [vmem:[#allocation14 + $0xe00] sm:$0xff]  ;;  %v3134_v32 = vcombine.high %v3126_v52, %v3126_v52 }
 0x360   :  { %1688 = vmatpush2.msra.mxu0 %v1291_v60  ;;  %1759 = vmatpush2.msra.mxu1 %v1419_v61  ;;  %v990_v60 = vld [vmem:[#allocation14 + $0x1f8] sm:$0xff] }
 0x361   :  { %1689 = vmatprep.subr.mxu0 %v1288_v63  ;;  %1760 = vmatprep.subr.mxu1 %v1416_v0  ;;  %v1118_v61 = vld [vmem:[#allocation14 + $0x5f8] sm:$0xff]  ;;  %v989_v63 = vld [vmem:[#allocation14 + $0x1f0] sm:$0xff] }
 0x362   :  { %1690 = vmatpush2.msra.mxu0 %v1287_v1  ;;  %1761 = vmatpush2.msra.mxu1 %v1415_v3  ;;  %v1117_v0 = vld [vmem:[#allocation14 + $0x5f0] sm:$0xff]  ;;  %v986_v1 = vld [vmem:[#allocation14 + $0x1d8] sm:$0xff] }
 0x363   :  { %1691 = vmatprep.subr.mxu0 %v1284_v4  ;;  %1762 = vmatprep.subr.mxu1 %v1412_v6  ;;  %v1114_v3 = vld [vmem:[#allocation14 + $0x5d8] sm:$0xff]  ;;  %v985_v4 = vld [vmem:[#allocation14 + $0x1d0] sm:$0xff] }
 0x364   :  { %1692 = vmatpush2.msra.mxu0 %v1283_v8  ;;  %1763 = vmatpush2.msra.mxu1 %v1411_v9  ;;  %v1113_v6 = vld [vmem:[#allocation14 + $0x5d0] sm:$0xff]  ;;  %v1110_v8 = vld [vmem:[#allocation14 + $0x5b8] sm:$0xff] }
 0x365   :  { %1693 = vmatprep.subr.mxu0 %v1280_v16  ;;  %1764 = vmatprep.subr.mxu1 %v1408_v18  ;;  %v981_v9 = vld [vmem:[#allocation14 + $0x1b0] sm:$0xff]  ;;  %v978_v16 = vld [vmem:[#allocation14 + $0x198] sm:$0xff] }
 0x366   :  { %1694 = vmatpush2.msra.mxu0 %v1279_v19  ;;  %1765 = vmatpush2.msra.mxu1 %v1407_v21  ;;  %v1106_v18 = vld [vmem:[#allocation14 + $0x598] sm:$0xff]  ;;  %v977_v19 = vld [vmem:[#allocation14 + $0x190] sm:$0xff] }
 0x367   :  { %1695 = vmatprep.subr.mxu0 %v1276_v22  ;;  %1766 = vmatprep.subr.mxu1 %v1404_v23  ;;  %v1105_v21 = vld [vmem:[#allocation14 + $0x590] sm:$0xff]  ;;  %v974_v22 = vld [vmem:[#allocation14 + $0x178] sm:$0xff] }
 0x368   :  { %1696 = vmatpush2.msra.mxu0 %v1275_v26  ;;  %1767 = vmatpush2.msra.mxu1 %v1403_v27  ;;  %v1102_v23 = vld [vmem:[#allocation14 + $0x578] sm:$0xff]  ;;  %v1101_v26 = vld [vmem:[#allocation14 + $0x570] sm:$0xff] }
 0x369   :  { %1697 = vmatprep.subr.mxu0 %v1272_v28  ;;  %1768 = vmatprep.subr.mxu1 %v1400_v30  ;;  %v970_v27 = vld [vmem:[#allocation14 + $0x158] sm:$0xff]  ;;  %v969_v30 = vld [vmem:[#allocation14 + $0x150] sm:$0xff] }
 0x36a   :  { %1698 = vmatpush2.msra.mxu0 %v1271_v31  ;;  %1769 = vmatpush2.msra.mxu1 %v1399_v33  ;;  %v1098_v28 = vld [vmem:[#allocation14 + $0x558] sm:$0xff]  ;;  %v1097_v31 = vld [vmem:[#allocation14 + $0x550] sm:$0xff] }
 0x36b   :  { %1699 = vmatprep.subr.mxu0 %v1268_v34  ;;  %1770 = vmatprep.subr.mxu1 %v1396_v35  ;;  %v966_v33 = vld [vmem:[#allocation14 + $0x138] sm:$0xff]  ;;  %v965_v35 = vld [vmem:[#allocation14 + $0x130] sm:$0xff] }
 0x36c   :  { %1700 = vmatpush2.msra.mxu0 %v1267_v2  ;;  %1771 = vmatpush2.msra.mxu1 %v1395_v37  ;;  %v1094_v34 = vld [vmem:[#allocation14 + $0x538] sm:$0xff] }
 0x36d   :  { %1701 = vmatprep.subr.mxu0 %v1264_v24  ;;  %1772 = vmatprep.subr.mxu1 %v1392_v38  ;;  %v962_v2 = vld [vmem:[#allocation14 + $0x118] sm:$0xff]  ;;  %v961_v24 = vld [vmem:[#allocation14 + $0x110] sm:$0xff] }
 0x36e   :  { %1702 = vmatpush2.msra.mxu0 %v1263_v39  ;;  %1773 = vmatpush2.msra.mxu1 %v1391_v40  ;;  %v1090_v37 = vld [vmem:[#allocation14 + $0x518] sm:$0xff]  ;;  %v1089_v38 = vld [vmem:[#allocation14 + $0x510] sm:$0xff] }
 0x36f   :  { %1703 = vmatprep.subr.mxu0 %v1260_v41  ;;  %1774 = vmatprep.subr.mxu1 %v1388_v42  ;;  %v958_v39 = vld [vmem:[#allocation14 + $0xf8] sm:$0xff]  ;;  %v957_v41 = vld [vmem:[#allocation14 + $0xf0] sm:$0xff] }
 0x370   :  { %1704 = vmatpush2.msra.mxu0 %v1259_v44  ;;  %1775 = vmatpush2.msra.mxu1 %v1387_v45  ;;  %v1086_v40 = vld [vmem:[#allocation14 + $0x4f8] sm:$0xff]  ;;  %v1085_v42 = vld [vmem:[#allocation14 + $0x4f0] sm:$0xff] }
 0x371   :  { %1705 = vmatprep.subr.mxu0 %v1256_v46  ;;  %1776 = vmatprep.subr.mxu1 %v1384_v47  ;;  %v1082_v44 = vld [vmem:[#allocation14 + $0x4d8] sm:$0xff]  ;;  %v953_v45 = vld [vmem:[#allocation14 + $0xd0] sm:$0xff] }
 0x372   :  { %1706 = vmatpush2.msra.mxu0 %v1255_v49  ;;  %1777 = vmatpush2.msra.mxu1 %v1383_v50  ;;  %v1081_v46 = vld [vmem:[#allocation14 + $0x4d0] sm:$0xff]  ;;  %v950_v47 = vld [vmem:[#allocation14 + $0xb8] sm:$0xff] }
 0x373   :  { %1707 = vmatprep.subr.mxu0 %v1252_v20  ;;  %1778 = vmatprep.subr.mxu1 %v1380_v51  ;;  %v1078_v49 = vld [vmem:[#allocation14 + $0x4b8] sm:$0xff]  ;;  %v949_v50 = vld [vmem:[#allocation14 + $0xb0] sm:$0xff] }
 0x374   :  { %1708 = vmatpush2.msra.mxu0 %v1251_v53  ;;  %1779 = vmatpush2.msra.mxu1 %v1379_v54  ;;  %v1077_v20 = vld [vmem:[#allocation14 + $0x4b0] sm:$0xff]  ;;  %v946_v51 = vld [vmem:[#allocation14 + $0x98] sm:$0xff] }
 0x375   :  { %1709 = vmatprep.subr.mxu0 %v1248_v55  ;;  %1780 = vmatprep.subr.mxu1 %v1376_v56  ;;  %v1074_v53 = vld [vmem:[#allocation14 + $0x498] sm:$0xff]  ;;  %v945_v54 = vld [vmem:[#allocation14 + $0x90] sm:$0xff] }
 0x376   :  { %1710 = vmatpush2.msra.mxu0 %v1247_v58  ;;  %1711 = vmatprep.mubr.f32.mxu0 %v3130_v57  ;;  %v1073_v55 = vld [vmem:[#allocation14 + $0x490] sm:$0xff]  ;;  %v942_v56 = vld [vmem:[#allocation14 + $0x78] sm:$0xff] }
 0x377   :  { %1781 = vmatpush2.msra.mxu1 %v1375_v59  ;;  %1712 = vmatmul.mubr.f32.vlgmr.msra.gmra.mxu0 %v3123_v48  ;;  %v1070_v58 = vld [vmem:[#allocation14 + $0x478] sm:$0xff]  ;;  %v941_v59 = vld [vmem:[#allocation14 + $0x70] sm:$0xff] }
 0x378   :  { %1782 = vmatprep.mubr.f32.mxu1 %v3134_v32  ;;  %1789 = vmatprep.subr.mxu0 %v990_v60  ;;  %v1069_v60 = vld [vmem:[#allocation14 + $0x470] sm:$0xff] }
 0x379   :  { %1860 = vmatprep.subr.mxu1 %v1118_v61  ;;  %1783 = vmatmul.mubr.f32.vlgmr.msra.gmra.mxu1 %v3126_v52  ;;  %v938_v61 = vld [vmem:[#allocation14 + $0x58] sm:$0xff] }
 0x37a   :  { %1790 = vmatpush1.msra.mxu0 %v989_v63  ;;  %1861 = vmatpush1.msra.mxu1 %v1117_v0  ;;  %v1066_v63 = vld [vmem:[#allocation14 + $0x458] sm:$0xff]  ;;  %v937_v0 = vld [vmem:[#allocation14 + $0x50] sm:$0xff] }
 0x37b   :  { %1791 = vmatprep.subr.mxu0 %v986_v1  ;;  %1862 = vmatprep.subr.mxu1 %v1114_v3  ;;  %v1065_v1 = vld [vmem:[#allocation14 + $0x450] sm:$0xff]  ;;  %v934_v3 = vld [vmem:[#allocation14 + $0x38] sm:$0xff] }
 0x37c   :  { %1792 = vmatpush1.msra.mxu0 %v985_v4  ;;  %1863 = vmatpush1.msra.mxu1 %v1113_v6  ;;  %v1062_v4 = vld [vmem:[#allocation14 + $0x438] sm:$0xff]  ;;  %v933_v6 = vld [vmem:[#allocation14 + $0x30] sm:$0xff] }
 0x37d   :  { %1793 = vmatprep.subr.mxu0 %v982_v7  ;;  %1864 = vmatprep.subr.mxu1 %v1110_v8  ;;  %v1061_v7 = vld [vmem:[#allocation14 + $0x430] sm:$0xff]  ;;  %v930_v8 = vld [vmem:[#allocation14 + $0x18] sm:$0xff] }
 0x37e   :  { %1794 = vmatpush1.msra.mxu0 %v981_v9  ;;  %1865 = vmatpush1.msra.mxu1 %v1109_v14  ;;  %v1058_v9 = vld [vmem:[#allocation14 + $0x418] sm:$0xff]  ;;  %v929_v14 = vld [vmem:[#allocation14 + $0x10] sm:$0xff] }
 0x37f   :  { %1795 = vmatprep.subr.mxu0 %v978_v16  ;;  %1866 = vmatprep.subr.mxu1 %v1106_v18  ;;  %v1057_v16 = vld [vmem:[#allocation14 + $0x410] sm:$0xff]  ;;  %v1054_v18 = vld [vmem:[#allocation14 + $0x3f8] sm:$0xff] }
 0x380   :  { %1796 = vmatpush1.msra.mxu0 %v977_v19  ;;  %1867 = vmatpush1.msra.mxu1 %v1105_v21  ;;  %v1182_v19 = vld [vmem:[#allocation14 + $0x7f8] sm:$0xff]  ;;  %v1053_v21 = vld [vmem:[#allocation14 + $0x3f0] sm:$0xff] }
 0x381   :  { %1797 = vmatprep.subr.mxu0 %v974_v22  ;;  %1868 = vmatprep.subr.mxu1 %v1102_v23  ;;  %v1181_v22 = vld [vmem:[#allocation14 + $0x7f0] sm:$0xff]  ;;  %v1050_v23 = vld [vmem:[#allocation14 + $0x3d8] sm:$0xff] }
 0x382   :  { %1798 = vmatpush1.msra.mxu0 %v973_v25  ;;  %1869 = vmatpush1.msra.mxu1 %v1101_v26  ;;  %v1178_v25 = vld [vmem:[#allocation14 + $0x7d8] sm:$0xff]  ;;  %v1049_v26 = vld [vmem:[#allocation14 + $0x3d0] sm:$0xff] }
 0x383   :  { %1799 = vmatprep.subr.mxu0 %v970_v27  ;;  %1870 = vmatprep.subr.mxu1 %v1098_v28  ;;  %v1177_v27 = vld [vmem:[#allocation14 + $0x7d0] sm:$0xff]  ;;  %v1046_v28 = vld [vmem:[#allocation14 + $0x3b8] sm:$0xff] }
 0x384   :  { %1800 = vmatpush1.msra.mxu0 %v969_v30  ;;  %1871 = vmatpush1.msra.mxu1 %v1097_v31  ;;  %v1174_v30 = vld [vmem:[#allocation14 + $0x7b8] sm:$0xff]  ;;  %v1045_v31 = vld [vmem:[#allocation14 + $0x3b0] sm:$0xff] }
 0x385   :  { %1801 = vmatprep.subr.mxu0 %v966_v33  ;;  %1872 = vmatprep.subr.mxu1 %v1094_v34  ;;  %v1173_v33 = vld [vmem:[#allocation14 + $0x7b0] sm:$0xff]  ;;  %v1042_v34 = vld [vmem:[#allocation14 + $0x398] sm:$0xff] }
 0x386   :  { %1802 = vmatpush1.msra.mxu0 %v965_v35  ;;  %1873 = vmatpush1.msra.mxu1 %v1093_v36  ;;  %v1170_v35 = vld [vmem:[#allocation14 + $0x798] sm:$0xff]  ;;  %v1041_v36 = vld [vmem:[#allocation14 + $0x390] sm:$0xff] }
 0x387   :  { %1803 = vmatprep.subr.mxu0 %v962_v2  ;;  %1874 = vmatprep.subr.mxu1 %v1090_v37  ;;  %v1169_v2 = vld [vmem:[#allocation14 + $0x790] sm:$0xff]  ;;  %v1038_v37 = vld [vmem:[#allocation14 + $0x378] sm:$0xff] }
 0x388   :  { %1804 = vmatpush1.msra.mxu0 %v961_v24  ;;  %1875 = vmatpush1.msra.mxu1 %v1089_v38  ;;  %v1166_v24 = vld [vmem:[#allocation14 + $0x778] sm:$0xff]  ;;  %v1037_v38 = vld [vmem:[#allocation14 + $0x370] sm:$0xff] }
 0x389   :  { %1805 = vmatprep.subr.mxu0 %v958_v39  ;;  %1876 = vmatprep.subr.mxu1 %v1086_v40  ;;  %v1165_v39 = vld [vmem:[#allocation14 + $0x770] sm:$0xff]  ;;  %v1034_v40 = vld [vmem:[#allocation14 + $0x358] sm:$0xff] }
 0x38a   :  { %1806 = vmatpush1.msra.mxu0 %v957_v41  ;;  %1877 = vmatpush1.msra.mxu1 %v1085_v42  ;;  %v1162_v41 = vld [vmem:[#allocation14 + $0x758] sm:$0xff]  ;;  %v1033_v42 = vld [vmem:[#allocation14 + $0x350] sm:$0xff] }
 0x38b   :  { %1807 = vmatprep.subr.mxu0 %v954_v43  ;;  %1878 = vmatprep.subr.mxu1 %v1082_v44  ;;  %v1161_v43 = vld [vmem:[#allocation14 + $0x750] sm:$0xff]  ;;  %v1030_v44 = vld [vmem:[#allocation14 + $0x338] sm:$0xff] }
 0x38c   :  { %1808 = vmatpush1.msra.mxu0 %v953_v45  ;;  %1879 = vmatpush1.msra.mxu1 %v1081_v46  ;;  %v1158_v45 = vld [vmem:[#allocation14 + $0x738] sm:$0xff]  ;;  %v1029_v46 = vld [vmem:[#allocation14 + $0x330] sm:$0xff] }
 0x38d   :  { %1809 = vmatprep.subr.mxu0 %v950_v47  ;;  %1880 = vmatprep.subr.mxu1 %v1078_v49  ;;  %v1157_v47 = vld [vmem:[#allocation14 + $0x730] sm:$0xff]  ;;  %v1026_v49 = vld [vmem:[#allocation14 + $0x318] sm:$0xff] }
 0x38e   :  { %1810 = vmatpush1.msra.mxu0 %v949_v50  ;;  %1881 = vmatpush1.msra.mxu1 %v1077_v20  ;;  %v1154_v50 = vld [vmem:[#allocation14 + $0x718] sm:$0xff]  ;;  %v1025_v20 = vld [vmem:[#allocation14 + $0x310] sm:$0xff] }
 0x38f   :  { %1811 = vmatprep.subr.mxu0 %v946_v51  ;;  %1882 = vmatprep.subr.mxu1 %v1074_v53  ;;  %v1153_v51 = vld [vmem:[#allocation14 + $0x710] sm:$0xff]  ;;  %v1022_v53 = vld [vmem:[#allocation14 + $0x2f8] sm:$0xff] }
 0x390   :  { %1812 = vmatpush1.msra.mxu0 %v945_v54  ;;  %1883 = vmatpush1.msra.mxu1 %v1073_v55  ;;  %v1150_v54 = vld [vmem:[#allocation14 + $0x6f8] sm:$0xff]  ;;  %v1021_v55 = vld [vmem:[#allocation14 + $0x2f0] sm:$0xff] }
 0x391   :  { %1813 = vmatprep.subr.mxu0 %v942_v56  ;;  %1884 = vmatprep.subr.mxu1 %v1070_v58  ;;  %v1149_v56 = vld [vmem:[#allocation14 + $0x6f0] sm:$0xff]  ;;  %v1018_v58 = vld [vmem:[#allocation14 + $0x2d8] sm:$0xff] }
 0x392   :  { %1814 = vmatpush1.msra.mxu0 %v941_v59  ;;  %1885 = vmatpush1.msra.mxu1 %v1069_v60  ;;  %v1146_v59 = vld [vmem:[#allocation14 + $0x6d8] sm:$0xff]  ;;  %v1017_v60 = vld [vmem:[#allocation14 + $0x2d0] sm:$0xff] }
 0x393   :  { %1815 = vmatprep.subr.mxu0 %v938_v61  ;;  %1886 = vmatprep.subr.mxu1 %v1066_v63  ;;  %v1145_v61 = vld [vmem:[#allocation14 + $0x6d0] sm:$0xff]  ;;  %v1014_v63 = vld [vmem:[#allocation14 + $0x2b8] sm:$0xff] }
 0x394   :  { %1816 = vmatpush1.msra.mxu0 %v937_v0  ;;  %1887 = vmatpush1.msra.mxu1 %v1065_v1  ;;  %v1142_v0 = vld [vmem:[#allocation14 + $0x6b8] sm:$0xff]  ;;  %v1013_v1 = vld [vmem:[#allocation14 + $0x2b0] sm:$0xff] }
 0x395   :  { %1817 = vmatprep.subr.mxu0 %v934_v3  ;;  %1888 = vmatprep.subr.mxu1 %v1062_v4  ;;  %v1141_v3 = vld [vmem:[#allocation14 + $0x6b0] sm:$0xff]  ;;  %v1010_v4 = vld [vmem:[#allocation14 + $0x298] sm:$0xff] }
 0x396   :  { %1818 = vmatpush1.msra.mxu0 %v933_v6  ;;  %1889 = vmatpush1.msra.mxu1 %v1061_v7  ;;  %v1138_v6 = vld [vmem:[#allocation14 + $0x698] sm:$0xff]  ;;  %v1009_v7 = vld [vmem:[#allocation14 + $0x290] sm:$0xff] }
 0x397   :  { %1819 = vmatprep.subr.mxu0 %v930_v8  ;;  %1890 = vmatprep.subr.mxu1 %v1058_v9  ;;  %v1137_v8 = vld [vmem:[#allocation14 + $0x690] sm:$0xff]  ;;  %v1006_v9 = vld [vmem:[#allocation14 + $0x278] sm:$0xff] }
 0x398   :  { %1820 = vmatpush1.msra.mxu0 %v929_v14  ;;  %1891 = vmatpush1.msra.mxu1 %v1057_v16  ;;  %v1134_v14 = vld [vmem:[#allocation14 + $0x678] sm:$0xff]  ;;  %v1005_v16 = vld [vmem:[#allocation14 + $0x270] sm:$0xff] }
 0x399   :  { %1821 = vmatprep.subr.mxu0 %v1054_v18  ;;  %1892 = vmatprep.subr.mxu1 %v1182_v19  ;;  %v1133_v18 = vld [vmem:[#allocation14 + $0x670] sm:$0xff]  ;;  %v1002_v19 = vld [vmem:[#allocation14 + $0x258] sm:$0xff] }
 0x39a   :  { %1822 = vmatpush2.msra.mxu0 %v1053_v21  ;;  %1893 = vmatpush2.msra.mxu1 %v1181_v22  ;;  %v1130_v21 = vld [vmem:[#allocation14 + $0x658] sm:$0xff]  ;;  %v1001_v22 = vld [vmem:[#allocation14 + $0x250] sm:$0xff] }
 0x39b   :  { %1823 = vmatprep.subr.mxu0 %v1050_v23  ;;  %1894 = vmatprep.subr.mxu1 %v1178_v25  ;;  %v1129_v23 = vld [vmem:[#allocation14 + $0x650] sm:$0xff]  ;;  %v998_v25 = vld [vmem:[#allocation14 + $0x238] sm:$0xff] }
 0x39c   :  { %1824 = vmatpush2.msra.mxu0 %v1049_v26  ;;  %1895 = vmatpush2.msra.mxu1 %v1177_v27  ;;  %v1126_v26 = vld [vmem:[#allocation14 + $0x638] sm:$0xff]  ;;  %v997_v27 = vld [vmem:[#allocation14 + $0x230] sm:$0xff] }
 0x39d   :  { %1825 = vmatprep.subr.mxu0 %v1046_v28  ;;  %1896 = vmatprep.subr.mxu1 %v1174_v30  ;;  %v1125_v28 = vld [vmem:[#allocation14 + $0x630] sm:$0xff]  ;;  %v994_v30 = vld [vmem:[#allocation14 + $0x218] sm:$0xff] }
 0x39e   :  { %1826 = vmatpush2.msra.mxu0 %v1045_v31  ;;  %1897 = vmatpush2.msra.mxu1 %v1173_v33  ;;  %v1122_v31 = vld [vmem:[#allocation14 + $0x618] sm:$0xff]  ;;  %v993_v33 = vld [vmem:[#allocation14 + $0x210] sm:$0xff] }
 0x39f   :  { %1827 = vmatprep.subr.mxu0 %v1042_v34  ;;  %1898 = vmatprep.subr.mxu1 %v1170_v35  ;;  %v1121_v34 = vld [vmem:[#allocation14 + $0x610] sm:$0xff]  ;;  %v1246_v35 = vld [vmem:[#allocation14 + $0x9f8] sm:$0xff] }
 0x3a0   :  { %1828 = vmatpush2.msra.mxu0 %v1041_v36  ;;  %1899 = vmatpush2.msra.mxu1 %v1169_v2  ;;  %v1374_v36 = vld [vmem:[#allocation14 + $0xdf8] sm:$0xff]  ;;  %v1245_v2 = vld [vmem:[#allocation14 + $0x9f0] sm:$0xff] }
 0x3a1   :  { %1829 = vmatprep.subr.mxu0 %v1038_v37  ;;  %1900 = vmatprep.subr.mxu1 %v1166_v24  ;;  %v1373_v37 = vld [vmem:[#allocation14 + $0xdf0] sm:$0xff]  ;;  %v1242_v24 = vld [vmem:[#allocation14 + $0x9d8] sm:$0xff] }
 0x3a2   :  { %1830 = vmatpush2.msra.mxu0 %v1037_v38  ;;  %1901 = vmatpush2.msra.mxu1 %v1165_v39  ;;  %v1370_v38 = vld [vmem:[#allocation14 + $0xdd8] sm:$0xff]  ;;  %v1241_v39 = vld [vmem:[#allocation14 + $0x9d0] sm:$0xff] }
 0x3a3   :  { %1831 = vmatprep.subr.mxu0 %v1034_v40  ;;  %1902 = vmatprep.subr.mxu1 %v1162_v41  ;;  %v1369_v40 = vld [vmem:[#allocation14 + $0xdd0] sm:$0xff]  ;;  %v1238_v41 = vld [vmem:[#allocation14 + $0x9b8] sm:$0xff] }
 0x3a4   :  { %1832 = vmatpush2.msra.mxu0 %v1033_v42  ;;  %1903 = vmatpush2.msra.mxu1 %v1161_v43  ;;  %v1237_v42 = vld [vmem:[#allocation14 + $0x9b0] sm:$0xff]  ;;  %v1234_v43 = vld [vmem:[#allocation14 + $0x998] sm:$0xff] }
 0x3a5   :  { %1833 = vmatprep.subr.mxu0 %v1030_v44  ;;  %1904 = vmatprep.subr.mxu1 %v1158_v45  ;;  %v1233_v44 = vld [vmem:[#allocation14 + $0x990] sm:$0xff] }
 0x3a6   :  { %1834 = vmatpush2.msra.mxu0 %v1029_v46  ;;  %1905 = vmatpush2.msra.mxu1 %v1157_v47  ;;  %v1361_v45 = vld [vmem:[#allocation14 + $0xd90] sm:$0xff]  ;;  %v1358_v46 = vld [vmem:[#allocation14 + $0xd78] sm:$0xff] }
 0x3a7   :  { %1835 = vmatprep.subr.mxu0 %v1026_v49  ;;  %1906 = vmatprep.subr.mxu1 %v1154_v50  ;;  %v1229_v47 = vld [vmem:[#allocation14 + $0x970] sm:$0xff]  ;;  %v1226_v50 = vld [vmem:[#allocation14 + $0x958] sm:$0xff] }
 0x3a8   :  { %1836 = vmatpush2.msra.mxu0 %v1025_v20  ;;  %1907 = vmatpush2.msra.mxu1 %v1153_v51  ;;  %v1357_v49 = vld [vmem:[#allocation14 + $0xd70] sm:$0xff]  ;;  %v1354_v20 = vld [vmem:[#allocation14 + $0xd58] sm:$0xff] }
 0x3a9   :  { %1837 = vmatprep.subr.mxu0 %v1022_v53  ;;  %1908 = vmatprep.subr.mxu1 %v1150_v54  ;;  %v1225_v51 = vld [vmem:[#allocation14 + $0x950] sm:$0xff]  ;;  %v1222_v54 = vld [vmem:[#allocation14 + $0x938] sm:$0xff] }
 0x3aa   :  { %1838 = vmatpush2.msra.mxu0 %v1021_v55  ;;  %1909 = vmatpush2.msra.mxu1 %v1149_v56  ;;  %v1353_v53 = vld [vmem:[#allocation14 + $0xd50] sm:$0xff]  ;;  %v1350_v55 = vld [vmem:[#allocation14 + $0xd38] sm:$0xff] }
 0x3ab   :  { %1839 = vmatprep.subr.mxu0 %v1018_v58  ;;  %1910 = vmatprep.subr.mxu1 %v1146_v59  ;;  %v1221_v56 = vld [vmem:[#allocation14 + $0x930] sm:$0xff]  ;;  %v1218_v59 = vld [vmem:[#allocation14 + $0x918] sm:$0xff] }
 0x3ac   :  { %1840 = vmatpush2.msra.mxu0 %v1017_v60  ;;  %1911 = vmatpush2.msra.mxu1 %v1145_v61  ;;  %v1349_v58 = vld [vmem:[#allocation14 + $0xd30] sm:$0xff]  ;;  %v1346_v60 = vld [vmem:[#allocation14 + $0xd18] sm:$0xff] }
 0x3ad   :  { %1841 = vmatprep.subr.mxu0 %v1014_v63  ;;  %1912 = vmatprep.subr.mxu1 %v1142_v0  ;;  %v1217_v61 = vld [vmem:[#allocation14 + $0x910] sm:$0xff]  ;;  %v1214_v0 = vld [vmem:[#allocation14 + $0x8f8] sm:$0xff] }
 0x3ae   :  { %1842 = vmatpush2.msra.mxu0 %v1013_v1  ;;  %1913 = vmatpush2.msra.mxu1 %v1141_v3  ;;  %v1345_v63 = vld [vmem:[#allocation14 + $0xd10] sm:$0xff]  ;;  %v1342_v1 = vld [vmem:[#allocation14 + $0xcf8] sm:$0xff] }
 0x3af   :  { %1843 = vmatprep.subr.mxu0 %v1010_v4  ;;  %1914 = vmatprep.subr.mxu1 %v1138_v6  ;;  %v1213_v3 = vld [vmem:[#allocation14 + $0x8f0] sm:$0xff]  ;;  %v1210_v6 = vld [vmem:[#allocation14 + $0x8d8] sm:$0xff] }
 0x3b0   :  { %1844 = vmatpush2.msra.mxu0 %v1009_v7  ;;  %1915 = vmatpush2.msra.mxu1 %v1137_v8  ;;  %v1341_v4 = vld [vmem:[#allocation14 + $0xcf0] sm:$0xff]  ;;  %v1338_v7 = vld [vmem:[#allocation14 + $0xcd8] sm:$0xff] }
 0x3b1   :  { %1845 = vmatprep.subr.mxu0 %v1006_v9  ;;  %1916 = vmatprep.subr.mxu1 %v1134_v14  ;;  %v1209_v8 = vld [vmem:[#allocation14 + $0x8d0] sm:$0xff]  ;;  %v1206_v14 = vld [vmem:[#allocation14 + $0x8b8] sm:$0xff] }
 0x3b2   :  { %1846 = vmatpush2.msra.mxu0 %v1005_v16  ;;  %1917 = vmatpush2.msra.mxu1 %v1133_v18  ;;  %v1337_v9 = vld [vmem:[#allocation14 + $0xcd0] sm:$0xff]  ;;  %v1334_v16 = vld [vmem:[#allocation14 + $0xcb8] sm:$0xff] }
 0x3b3   :  { %1847 = vmatprep.subr.mxu0 %v1002_v19  ;;  %1918 = vmatprep.subr.mxu1 %v1130_v21  ;;  %v1205_v18 = vld [vmem:[#allocation14 + $0x8b0] sm:$0xff]  ;;  %v1202_v21 = vld [vmem:[#allocation14 + $0x898] sm:$0xff] }
 0x3b4   :  { %1848 = vmatpush2.msra.mxu0 %v1001_v22  ;;  %1919 = vmatpush2.msra.mxu1 %v1129_v23  ;;  %v1333_v19 = vld [vmem:[#allocation14 + $0xcb0] sm:$0xff]  ;;  %v1330_v22 = vld [vmem:[#allocation14 + $0xc98] sm:$0xff] }
 0x3b5   :  { %1849 = vmatprep.subr.mxu0 %v998_v25  ;;  %1920 = vmatprep.subr.mxu1 %v1126_v26  ;;  %v1201_v23 = vld [vmem:[#allocation14 + $0x890] sm:$0xff]  ;;  %v1198_v26 = vld [vmem:[#allocation14 + $0x878] sm:$0xff] }
 0x3b6   :  { %1850 = vmatpush2.msra.mxu0 %v997_v27  ;;  %1921 = vmatpush2.msra.mxu1 %v1125_v28  ;;  %v1329_v25 = vld [vmem:[#allocation14 + $0xc90] sm:$0xff]  ;;  %v1326_v27 = vld [vmem:[#allocation14 + $0xc78] sm:$0xff] }
 0x3b7   :  { %1851 = vmatprep.subr.mxu0 %v994_v30  ;;  %1922 = vmatprep.subr.mxu1 %v1122_v31  ;;  %v1197_v28 = vld [vmem:[#allocation14 + $0x870] sm:$0xff]  ;;  %v1194_v31 = vld [vmem:[#allocation14 + $0x858] sm:$0xff] }
 0x3b8   :  { %1852 = vmatpush2.msra.mxu0 %v993_v33  ;;  %1853 = vmatprep.mubr.f32.mxu0 %v3102_v13  ;;  %v1366_v13 = vld [vmem:[#allocation14 + $0xdb8] sm:$0xff]  ;;  %v1325_v30 = vld [vmem:[#allocation14 + $0xc70] sm:$0xff] }
 0x3b9   :  { %1923 = vmatpush2.msra.mxu1 %v1121_v34  ;;  %1854 = vmatmul.mubr.f32.vlgmr.msra.gmra.mxu0 %v3095_v62  ;;  %v1365_v62 = vld [vmem:[#allocation14 + $0xdb0] sm:$0xff]  ;;  %v1322_v33 = vld [vmem:[#allocation14 + $0xc58] sm:$0xff] }
 0x3ba   :  { %1924 = vmatprep.mubr.f32.mxu1 %v3106_v17  ;;  %1931 = vmatprep.subr.mxu0 %v1246_v35  ;;  %v1362_v17 = vld [vmem:[#allocation14 + $0xd98] sm:$0xff]  ;;  %v1193_v34 = vld [vmem:[#allocation14 + $0x850] sm:$0xff] }
 0x3bb   :  { %2002 = vmatprep.subr.mxu1 %v1374_v36  ;;  %1925 = vmatmul.mubr.f32.vlgmr.msra.gmra.mxu1 %v3098_v5  ;;  %v1230_v5 = vld [vmem:[#allocation14 + $0x978] sm:$0xff]  ;;  %v1321_v35 = vld [vmem:[#allocation14 + $0xc50] sm:$0xff] }
 0x3bc   :  { %1932 = vmatpush1.msra.mxu0 %v1245_v2  ;;  %2003 = vmatpush1.msra.mxu1 %v1373_v37  ;;  %v1190_v36 = vld [vmem:[#allocation14 + $0x838] sm:$0xff]  ;;  %v1189_v37 = vld [vmem:[#allocation14 + $0x830] sm:$0xff] }
 0x3bd   :  { %1933 = vmatprep.subr.mxu0 %v1242_v24  ;;  %2004 = vmatprep.subr.mxu1 %v1370_v38  ;;  %v1318_v2 = vld [vmem:[#allocation14 + $0xc38] sm:$0xff]  ;;  %v1317_v24 = vld [vmem:[#allocation14 + $0xc30] sm:$0xff] }
 0x3be   :  { %1934 = vmatpush1.msra.mxu0 %v1241_v39  ;;  %2005 = vmatpush1.msra.mxu1 %v1369_v40  ;;  %v1186_v38 = vld [vmem:[#allocation14 + $0x818] sm:$0xff]  ;;  %v1185_v40 = vld [vmem:[#allocation14 + $0x810] sm:$0xff] }
 0x3bf   :  { %1935 = vmatprep.subr.mxu0 %v1238_v41  ;;  %2006 = vmatprep.subr.mxu1 %v1366_v13  ;;  %v1314_v39 = vld [vmem:[#allocation14 + $0xc18] sm:$0xff]  ;;  %v1313_v41 = vld [vmem:[#allocation14 + $0xc10] sm:$0xff] }
 0x3c0   :  { %1936 = vmatpush1.msra.mxu0 %v1237_v42  ;;  %2007 = vmatpush1.msra.mxu1 %v1365_v62  ;;  %v1310_v13 = vld [vmem:[#allocation14 + $0xbf8] sm:$0xff]  ;;  %v1309_v62 = vld [vmem:[#allocation14 + $0xbf0] sm:$0xff] }
 0x3c1   :  { %1937 = vmatprep.subr.mxu0 %v1234_v43  ;;  %2008 = vmatprep.subr.mxu1 %v1362_v17  ;;  %v1438_v42 = vld [vmem:[#allocation14 + $0xff8] sm:$0xff]  ;;  %v1437_v43 = vld [vmem:[#allocation14 + $0xff0] sm:$0xff] }
 0x3c2   :  { %1938 = vmatpush1.msra.mxu0 %v1233_v44  ;;  %2009 = vmatpush1.msra.mxu1 %v1361_v45  ;;  %v1306_v17 = vld [vmem:[#allocation14 + $0xbd8] sm:$0xff]  ;;  %v1305_v45 = vld [vmem:[#allocation14 + $0xbd0] sm:$0xff] }
 0x3c3   :  { %1939 = vmatprep.subr.mxu0 %v1230_v5  ;;  %2010 = vmatprep.subr.mxu1 %v1358_v46  ;;  %v1434_v44 = vld [vmem:[#allocation14 + $0xfd8] sm:$0xff]  ;;  %v1433_v5 = vld [vmem:[#allocation14 + $0xfd0] sm:$0xff] }
 0x3c4   :  { %1940 = vmatpush1.msra.mxu0 %v1229_v47  ;;  %2011 = vmatpush1.msra.mxu1 %v1357_v49  ;;  %v1302_v46 = vld [vmem:[#allocation14 + $0xbb8] sm:$0xff]  ;;  %v1301_v49 = vld [vmem:[#allocation14 + $0xbb0] sm:$0xff] }
 0x3c5   :  { %1941 = vmatprep.subr.mxu0 %v1226_v50  ;;  %2012 = vmatprep.subr.mxu1 %v1354_v20  ;;  %v1430_v47 = vld [vmem:[#allocation14 + $0xfb8] sm:$0xff]  ;;  %v1429_v50 = vld [vmem:[#allocation14 + $0xfb0] sm:$0xff] }
 0x3c6   :  { %1942 = vmatpush1.msra.mxu0 %v1225_v51  ;;  %2013 = vmatpush1.msra.mxu1 %v1353_v53  ;;  %v1298_v20 = vld [vmem:[#allocation14 + $0xb98] sm:$0xff]  ;;  %v1297_v53 = vld [vmem:[#allocation14 + $0xb90] sm:$0xff] }
 0x3c7   :  { %1943 = vmatprep.subr.mxu0 %v1222_v54  ;;  %2014 = vmatprep.subr.mxu1 %v1350_v55  ;;  %v1426_v51 = vld [vmem:[#allocation14 + $0xf98] sm:$0xff]  ;;  %v1425_v54 = vld [vmem:[#allocation14 + $0xf90] sm:$0xff] }
 0x3c8   :  { %1944 = vmatpush1.msra.mxu0 %v1221_v56  ;;  %2015 = vmatpush1.msra.mxu1 %v1349_v58  ;;  %v1294_v55 = vld [vmem:[#allocation14 + $0xb78] sm:$0xff]  ;;  %v1293_v58 = vld [vmem:[#allocation14 + $0xb70] sm:$0xff] }
 0x3c9   :  { %1945 = vmatprep.subr.mxu0 %v1218_v59  ;;  %2016 = vmatprep.subr.mxu1 %v1346_v60  ;;  %v1422_v56 = vld [vmem:[#allocation14 + $0xf78] sm:$0xff]  ;;  %v1421_v59 = vld [vmem:[#allocation14 + $0xf70] sm:$0xff] }
 0x3ca   :  { %1946 = vmatpush1.msra.mxu0 %v1217_v61  ;;  %2017 = vmatpush1.msra.mxu1 %v1345_v63  ;;  %v1290_v60 = vld [vmem:[#allocation14 + $0xb58] sm:$0xff]  ;;  %v1289_v63 = vld [vmem:[#allocation14 + $0xb50] sm:$0xff] }
 0x3cb   :  { %1947 = vmatprep.subr.mxu0 %v1214_v0  ;;  %2018 = vmatprep.subr.mxu1 %v1342_v1  ;;  %v1418_v61 = vld [vmem:[#allocation14 + $0xf58] sm:$0xff]  ;;  %v1417_v0 = vld [vmem:[#allocation14 + $0xf50] sm:$0xff] }
 0x3cc   :  { %1948 = vmatpush1.msra.mxu0 %v1213_v3  ;;  %2019 = vmatpush1.msra.mxu1 %v1341_v4  ;;  %v1286_v1 = vld [vmem:[#allocation14 + $0xb38] sm:$0xff]  ;;  %v1285_v4 = vld [vmem:[#allocation14 + $0xb30] sm:$0xff] }
 0x3cd   :  { %1949 = vmatprep.subr.mxu0 %v1210_v6  ;;  %2020 = vmatprep.subr.mxu1 %v1338_v7  ;;  %v1414_v3 = vld [vmem:[#allocation14 + $0xf38] sm:$0xff]  ;;  %v1413_v6 = vld [vmem:[#allocation14 + $0xf30] sm:$0xff] }
 0x3ce   :  { %1950 = vmatpush1.msra.mxu0 %v1209_v8  ;;  %2021 = vmatpush1.msra.mxu1 %v1337_v9  ;;  %v1282_v7 = vld [vmem:[#allocation14 + $0xb18] sm:$0xff]  ;;  %v1281_v9 = vld [vmem:[#allocation14 + $0xb10] sm:$0xff] }
 0x3cf   :  { %1951 = vmatprep.subr.mxu0 %v1206_v14  ;;  %2022 = vmatprep.subr.mxu1 %v1334_v16  ;;  %v1410_v8 = vld [vmem:[#allocation14 + $0xf18] sm:$0xff]  ;;  %v1409_v14 = vld [vmem:[#allocation14 + $0xf10] sm:$0xff] }
 0x3d0   :  { %1952 = vmatpush1.msra.mxu0 %v1205_v18  ;;  %2023 = vmatpush1.msra.mxu1 %v1333_v19  ;;  %v1278_v16 = vld [vmem:[#allocation14 + $0xaf8] sm:$0xff]  ;;  %v1277_v19 = vld [vmem:[#allocation14 + $0xaf0] sm:$0xff] }
 0x3d1   :  { %1953 = vmatprep.subr.mxu0 %v1202_v21  ;;  %2024 = vmatprep.subr.mxu1 %v1330_v22  ;;  %v1406_v18 = vld [vmem:[#allocation14 + $0xef8] sm:$0xff]  ;;  %v1405_v21 = vld [vmem:[#allocation14 + $0xef0] sm:$0xff] }
 0x3d2   :  { %1954 = vmatpush1.msra.mxu0 %v1201_v23  ;;  %2025 = vmatpush1.msra.mxu1 %v1329_v25  ;;  %v1274_v22 = vld [vmem:[#allocation14 + $0xad8] sm:$0xff]  ;;  %v1273_v25 = vld [vmem:[#allocation14 + $0xad0] sm:$0xff] }
 0x3d3   :  { %1955 = vmatprep.subr.mxu0 %v1198_v26  ;;  %2026 = vmatprep.subr.mxu1 %v1326_v27  ;;  %v1402_v23 = vld [vmem:[#allocation14 + $0xed8] sm:$0xff]  ;;  %v1401_v26 = vld [vmem:[#allocation14 + $0xed0] sm:$0xff] }
 0x3d4   :  { %1956 = vmatpush1.msra.mxu0 %v1197_v28  ;;  %2027 = vmatpush1.msra.mxu1 %v1325_v30  ;;  %v1270_v27 = vld [vmem:[#allocation14 + $0xab8] sm:$0xff]  ;;  %v1269_v30 = vld [vmem:[#allocation14 + $0xab0] sm:$0xff] }
 0x3d5   :  { %1957 = vmatprep.subr.mxu0 %v1194_v31  ;;  %2028 = vmatprep.subr.mxu1 %v1322_v33  ;;  %v1398_v28 = vld [vmem:[#allocation14 + $0xeb8] sm:$0xff]  ;;  %v1397_v31 = vld [vmem:[#allocation14 + $0xeb0] sm:$0xff] }
 0x3d6   :  { %1958 = vmatpush1.msra.mxu0 %v1193_v34  ;;  %2029 = vmatpush1.msra.mxu1 %v1321_v35  ;;  %v1266_v33 = vld [vmem:[#allocation14 + $0xa98] sm:$0xff]  ;;  %v1265_v35 = vld [vmem:[#allocation14 + $0xa90] sm:$0xff] }
 0x3d7   :  { %1959 = vmatprep.subr.mxu0 %v1190_v36  ;;  %2030 = vmatprep.subr.mxu1 %v1318_v2  ;;  %v1394_v34 = vld [vmem:[#allocation14 + $0xe98] sm:$0xff]  ;;  %v1393_v36 = vld [vmem:[#allocation14 + $0xe90] sm:$0xff] }
 0x3d8   :  { %1960 = vmatpush1.msra.mxu0 %v1189_v37  ;;  %2031 = vmatpush1.msra.mxu1 %v1317_v24  ;;  %v1262_v2 = vld [vmem:[#allocation14 + $0xa78] sm:$0xff]  ;;  %v1261_v24 = vld [vmem:[#allocation14 + $0xa70] sm:$0xff] }
 0x3d9   :  { %1961 = vmatprep.subr.mxu0 %v1186_v38  ;;  %2032 = vmatprep.subr.mxu1 %v1314_v39  ;;  %v1390_v37 = vld [vmem:[#allocation14 + $0xe78] sm:$0xff]  ;;  %v1389_v38 = vld [vmem:[#allocation14 + $0xe70] sm:$0xff] }
 0x3da   :  { %1962 = vmatpush1.msra.mxu0 %v1185_v40  ;;  %2033 = vmatpush1.msra.mxu1 %v1313_v41  ;;  %v1258_v39 = vld [vmem:[#allocation14 + $0xa58] sm:$0xff]  ;;  %v1257_v41 = vld [vmem:[#allocation14 + $0xa50] sm:$0xff] }
 0x3db   :  { %1963 = vmatprep.subr.mxu0 %v1310_v13  ;;  %2034 = vmatprep.subr.mxu1 %v1438_v42  ;;  %v1386_v40 = vld [vmem:[#allocation14 + $0xe58] sm:$0xff]  ;;  %v1385_v13 = vld [vmem:[#allocation14 + $0xe50] sm:$0xff] }
 0x3dc   :  { %1964 = vmatpush2.msra.mxu0 %v1309_v62  ;;  %2035 = vmatpush2.msra.mxu1 %v1437_v43  ;;  %v1254_v42 = vld [vmem:[#allocation14 + $0xa38] sm:$0xff]  ;;  %v1253_v43 = vld [vmem:[#allocation14 + $0xa30] sm:$0xff] }
 0x3dd   :  { %1965 = vmatprep.subr.mxu0 %v1306_v17  ;;  %2036 = vmatprep.subr.mxu1 %v1434_v44  ;;  %v1382_v62 = vld [vmem:[#allocation14 + $0xe38] sm:$0xff]  ;;  %v1381_v17 = vld [vmem:[#allocation14 + $0xe30] sm:$0xff] }
 0x3de   :  { %1966 = vmatpush2.msra.mxu0 %v1305_v45  ;;  %2037 = vmatpush2.msra.mxu1 %v1433_v5  ;;  %v1250_v44 = vld [vmem:[#allocation14 + $0xa18] sm:$0xff]  ;;  %v1249_v5 = vld [vmem:[#allocation14 + $0xa10] sm:$0xff] }
 0x3df   :  { %1967 = vmatprep.subr.mxu0 %v1302_v46  ;;  %2038 = vmatprep.subr.mxu1 %v1430_v47  ;;  %v1378_v45 = vld [vmem:[#allocation14 + $0xe18] sm:$0xff]  ;;  %v1377_v46 = vld [vmem:[#allocation14 + $0xe10] sm:$0xff] }
 0x3e0   :  { %1968 = vmatpush2.msra.mxu0 %v1301_v49  ;;  %2039 = vmatpush2.msra.mxu1 %v1429_v50  ;;  %v2108_v47 = vld [vmem:[#allocation17 + $0xf8] sm:$0xff]  ;;  %v2107_v49 = vld [vmem:[#allocation17 + $0xf0] sm:$0xff]  ;;  %v2106_v50 = vld [vmem:[#allocation17 + $0xe8] sm:$0xff] }
 0x3e1   :  { %1969 = vmatprep.subr.mxu0 %v1298_v20  ;;  %2040 = vmatprep.subr.mxu1 %v1426_v51  ;;  %v2105_v20 = vld [vmem:[#allocation17 + $0xe0] sm:$0xff]  ;;  %v2104_v51 = vld [vmem:[#allocation17 + $0xd8] sm:$0xff] }
 0x3e2   :  { %1970 = vmatpush2.msra.mxu0 %v1297_v53  ;;  %2041 = vmatpush2.msra.mxu1 %v1425_v54  ;;  %v2172_v53 = vld [vmem:[#allocation17 + $0x2f8] sm:$0xff]  ;;  %v2171_v54 = vld [vmem:[#allocation17 + $0x2f0] sm:$0xff] }
 0x3e3   :  { %1971 = vmatprep.subr.mxu0 %v1294_v55  ;;  %2042 = vmatprep.subr.mxu1 %v1422_v56  ;;  %v2170_v55 = vld [vmem:[#allocation17 + $0x2e8] sm:$0xff]  ;;  %v2103_v56 = vld [vmem:[#allocation17 + $0xd0] sm:$0xff] }
 0x3e4   :  { %1972 = vmatpush2.msra.mxu0 %v1293_v58  ;;  %2043 = vmatpush2.msra.mxu1 %v1421_v59  ;;  %v2102_v58 = vld [vmem:[#allocation17 + $0xc8] sm:$0xff]  ;;  %v2100_v59 = vld [vmem:[#allocation17 + $0xb8] sm:$0xff] }
 0x3e5   :  { %1973 = vmatprep.subr.mxu0 %v1290_v60  ;;  %2044 = vmatprep.subr.mxu1 %v1418_v61  ;;  %v2166_v60 = vld [vmem:[#allocation17 + $0x2c8] sm:$0xff]  ;;  %v2099_v61 = vld [vmem:[#allocation17 + $0xb0] sm:$0xff] }
 0x3e6   :  { %1974 = vmatpush2.msra.mxu0 %v1289_v63  ;;  %2045 = vmatpush2.msra.mxu1 %v1417_v0  ;;  %v2165_v63 = vld [vmem:[#allocation17 + $0x2c0] sm:$0xff]  ;;  %v2098_v0 = vld [vmem:[#allocation17 + $0xa8] sm:$0xff] }
 0x3e7   :  { %1975 = vmatprep.subr.mxu0 %v1286_v1  ;;  %2046 = vmatprep.subr.mxu1 %v1414_v3  ;;  %v2164_v1 = vld [vmem:[#allocation17 + $0x2b8] sm:$0xff]  ;;  %v2097_v3 = vld [vmem:[#allocation17 + $0xa0] sm:$0xff] }
 0x3e8   :  { %1976 = vmatpush2.msra.mxu0 %v1285_v4  ;;  %2047 = vmatpush2.msra.mxu1 %v1413_v6  ;;  %v2163_v4 = vld [vmem:[#allocation17 + $0x2b0] sm:$0xff]  ;;  %v2096_v6 = vld [vmem:[#allocation17 + $0x98] sm:$0xff] }
 0x3e9   :  { %1977 = vmatprep.subr.mxu0 %v1282_v7  ;;  %2048 = vmatprep.subr.mxu1 %v1410_v8  ;;  %v2162_v7 = vld [vmem:[#allocation17 + $0x2a8] sm:$0xff]  ;;  %v2095_v8 = vld [vmem:[#allocation17 + $0x90] sm:$0xff] }
 0x3ea   :  { %1978 = vmatpush2.msra.mxu0 %v1281_v9  ;;  %2049 = vmatpush2.msra.mxu1 %v1409_v14  ;;  %v2161_v9 = vld [vmem:[#allocation17 + $0x2a0] sm:$0xff]  ;;  %v2094_v14 = vld [vmem:[#allocation17 + $0x88] sm:$0xff] }
 0x3eb   :  { %1979 = vmatprep.subr.mxu0 %v1278_v16  ;;  %2050 = vmatprep.subr.mxu1 %v1406_v18  ;;  %v2160_v16 = vld [vmem:[#allocation17 + $0x298] sm:$0xff]  ;;  %v2093_v18 = vld [vmem:[#allocation17 + $0x80] sm:$0xff] }
 0x3ec   :  { %1980 = vmatpush2.msra.mxu0 %v1277_v19  ;;  %2051 = vmatpush2.msra.mxu1 %v1405_v21  ;;  %v2159_v19 = vld [vmem:[#allocation17 + $0x290] sm:$0xff]  ;;  %v2092_v21 = vld [vmem:[#allocation17 + $0x78] sm:$0xff] }
 0x3ed   :  { %1981 = vmatprep.subr.mxu0 %v1274_v22  ;;  %2052 = vmatprep.subr.mxu1 %v1402_v23  ;;  %v2158_v22 = vld [vmem:[#allocation17 + $0x288] sm:$0xff]  ;;  %v2091_v23 = vld [vmem:[#allocation17 + $0x70] sm:$0xff] }
 0x3ee   :  { %1982 = vmatpush2.msra.mxu0 %v1273_v25  ;;  %2053 = vmatpush2.msra.mxu1 %v1401_v26  ;;  %v2157_v25 = vld [vmem:[#allocation17 + $0x280] sm:$0xff]  ;;  %v2090_v26 = vld [vmem:[#allocation17 + $0x68] sm:$0xff] }
 0x3ef   :  { %1983 = vmatprep.subr.mxu0 %v1270_v27  ;;  %2054 = vmatprep.subr.mxu1 %v1398_v28  ;;  %v2156_v27 = vld [vmem:[#allocation17 + $0x278] sm:$0xff]  ;;  %v2089_v28 = vld [vmem:[#allocation17 + $0x60] sm:$0xff] }
 0x3f0   :  { %1984 = vmatpush2.msra.mxu0 %v1269_v30  ;;  %2055 = vmatpush2.msra.mxu1 %v1397_v31  ;;  %v2155_v30 = vld [vmem:[#allocation17 + $0x270] sm:$0xff]  ;;  %v2088_v31 = vld [vmem:[#allocation17 + $0x58] sm:$0xff] }
 0x3f1   :  { %1985 = vmatprep.subr.mxu0 %v1266_v33  ;;  %2056 = vmatprep.subr.mxu1 %v1394_v34  ;;  %v2154_v33 = vld [vmem:[#allocation17 + $0x268] sm:$0xff]  ;;  %v2087_v34 = vld [vmem:[#allocation17 + $0x50] sm:$0xff] }
 0x3f2   :  { %1986 = vmatpush2.msra.mxu0 %v1265_v35  ;;  %2057 = vmatpush2.msra.mxu1 %v1393_v36  ;;  %v2153_v35 = vld [vmem:[#allocation17 + $0x260] sm:$0xff]  ;;  %v2086_v36 = vld [vmem:[#allocation17 + $0x48] sm:$0xff] }
 0x3f3   :  { %1987 = vmatprep.subr.mxu0 %v1262_v2  ;;  %2058 = vmatprep.subr.mxu1 %v1390_v37  ;;  %v2152_v2 = vld [vmem:[#allocation17 + $0x258] sm:$0xff]  ;;  %v2085_v37 = vld [vmem:[#allocation17 + $0x40] sm:$0xff] }
 0x3f4   :  { %1988 = vmatpush2.msra.mxu0 %v1261_v24  ;;  %2059 = vmatpush2.msra.mxu1 %v1389_v38  ;;  %v2151_v24 = vld [vmem:[#allocation17 + $0x250] sm:$0xff]  ;;  %v2084_v38 = vld [vmem:[#allocation17 + $0x38] sm:$0xff] }
 0x3f5   :  { %1989 = vmatprep.subr.mxu0 %v1258_v39  ;;  %2060 = vmatprep.subr.mxu1 %v1386_v40  ;;  %v2150_v39 = vld [vmem:[#allocation17 + $0x248] sm:$0xff]  ;;  %v2083_v40 = vld [vmem:[#allocation17 + $0x30] sm:$0xff] }
 0x3f6   :  { %1990 = vmatpush2.msra.mxu0 %v1257_v41  ;;  %2061 = vmatpush2.msra.mxu1 %v1385_v13  ;;  %v2149_v41 = vld [vmem:[#allocation17 + $0x240] sm:$0xff]  ;;  %v2082_v13 = vld [vmem:[#allocation17 + $0x28] sm:$0xff] }
 0x3f7   :  { %1991 = vmatprep.subr.mxu0 %v1254_v42  ;;  %2062 = vmatprep.subr.mxu1 %v1382_v62  ;;  %v2148_v42 = vld [vmem:[#allocation17 + $0x238] sm:$0xff]  ;;  %v2081_v62 = vld [vmem:[#allocation17 + $0x20] sm:$0xff] }
 0x3f8   :  { %1992 = vmatpush2.msra.mxu0 %v1253_v43  ;;  %2063 = vmatpush2.msra.mxu1 %v1381_v17  ;;  %v2147_v43 = vld [vmem:[#allocation17 + $0x230] sm:$0xff]  ;;  %v2080_v17 = vld [vmem:[#allocation17 + $0x18] sm:$0xff] }
 0x3f9   :  { %1993 = vmatprep.subr.mxu0 %v1250_v44  ;;  %2064 = vmatprep.subr.mxu1 %v1378_v45  ;;  %v2146_v44 = vld [vmem:[#allocation17 + $0x228] sm:$0xff]  ;;  %v2079_v45 = vld [vmem:[#allocation17 + $0x10] sm:$0xff] }
 0x3fa   :  { %1994 = vmatpush2.msra.mxu0 %v1249_v5  ;;  %1995 = vmatprep.mubr.f32.mxu0 %v3130_v57  ;;  %v2169_v57 = vld [vmem:[#allocation17 + $0x2e0] sm:$0xff] }
 0x3fb   :  { %2065 = vmatpush2.msra.mxu1 %v1377_v46  ;;  %2066 = vmatprep.mubr.f32.mxu1 %v3134_v32  ;;  %v2168_v32 = vld [vmem:[#allocation17 + $0x2d8] sm:$0xff]  ;;  %v2145_v5 = vld [vmem:[#allocation17 + $0x220] sm:$0xff]  ;;  %v2078_v46 = vld [vmem:[#allocation17 + $0x8] sm:$0xff] }
 0x3fc   :  { %1996 = vmatmul.mubr.f32.vlgmr.msra.gmra.mxu0 %v3123_v48  ;;  %2067 = vmatmul.mubr.f32.vlgmr.msra.gmra.mxu1 %v3126_v52  ;;  %v2101_v48 = vld [vmem:[#allocation17 + $0xc0] sm:$0xff]  ;;  %v2167_v52 = vld [vmem:[#allocation17 + $0x2d0] sm:$0xff] }
 0x3fd   :  { %2217 = vmatprep.subr.mxu0 %v2108_v47  ;;  %2288 = vmatprep.subr.mxu1 %v2172_v53  ;;  %v2144_v47 = vld [vmem:[#allocation17 + $0x218] sm:$0xff]  ;;  %v2139_v53 = vld [vmem:[#allocation17 + $0x1f0] sm:$0xff] }
 0x3fe   :  { %2218 = vmatpush1.msra.mxu0 %v2107_v49  ;;  %2289 = vmatpush1.msra.mxu1 %v2171_v54  ;;  %v2077_v49 = vld [vmem:[#allocation17] sm:$0xff] }
 0x3ff   :  { %2219 = vmatprep.subr.mxu0 %v2106_v50  ;;  %2290 = vmatprep.subr.mxu1 %v2170_v55  ;;  %v2143_v50 = vld [vmem:[#allocation17 + $0x210] sm:$0xff]  ;;  %v2141_v54 = vld [vmem:[#allocation17 + $0x200] sm:$0xff]  ;;  %v2138_v55 = vld [vmem:[#allocation17 + $0x1e8] sm:$0xff] }
 0x400   :  { %2220 = vmatpush1.msra.mxu0 %v2105_v20  ;;  %2291 = vmatpush1.msra.mxu1 %v2169_v57  ;;  %v2140_v20 = vld [vmem:[#allocation17 + $0x1f8] sm:$0xff]  ;;  %v2137_v57 = vld [vmem:[#allocation17 + $0x1e0] sm:$0xff] }
 0x401   :  { %2221 = vmatprep.subr.mxu0 %v2104_v51  ;;  %2292 = vmatprep.subr.mxu1 %v2168_v32  ;;  %v2142_v51 = vld [vmem:[#allocation17 + $0x208] sm:$0xff]  ;;  %v2136_v32 = vld [vmem:[#allocation17 + $0x1d8] sm:$0xff] }
 0x402   :  { %2222 = vmatpush1.msra.mxu0 %v2103_v56  ;;  %2293 = vmatpush1.msra.mxu1 %v2167_v52  ;;  %v2204_v56 = vld [vmem:[#allocation17 + $0x3f8] sm:$0xff]  ;;  %v2135_v52 = vld [vmem:[#allocation17 + $0x1d0] sm:$0xff] }
 0x403   :  { %2223 = vmatprep.subr.mxu0 %v2102_v58  ;;  %2294 = vmatprep.subr.mxu1 %v2166_v60  ;;  %v2203_v58 = vld [vmem:[#allocation17 + $0x3f0] sm:$0xff]  ;;  %v2134_v60 = vld [vmem:[#allocation17 + $0x1c8] sm:$0xff] }
 0x404   :  { %2224 = vmatpush1.msra.mxu0 %v2101_v48  ;;  %2295 = vmatpush1.msra.mxu1 %v2165_v63  ;;  %v2202_v48 = vld [vmem:[#allocation17 + $0x3e8] sm:$0xff]  ;;  %v2133_v63 = vld [vmem:[#allocation17 + $0x1c0] sm:$0xff] }
 0x405   :  { %2225 = vmatprep.subr.mxu0 %v2100_v59  ;;  %2296 = vmatprep.subr.mxu1 %v2164_v1  ;;  %v2201_v59 = vld [vmem:[#allocation17 + $0x3e0] sm:$0xff]  ;;  %v2132_v1 = vld [vmem:[#allocation17 + $0x1b8] sm:$0xff] }
 0x406   :  { %2226 = vmatpush1.msra.mxu0 %v2099_v61  ;;  %2297 = vmatpush1.msra.mxu1 %v2163_v4  ;;  %v2200_v61 = vld [vmem:[#allocation17 + $0x3d8] sm:$0xff]  ;;  %v2131_v4 = vld [vmem:[#allocation17 + $0x1b0] sm:$0xff] }
 0x407   :  { %2227 = vmatprep.subr.mxu0 %v2098_v0  ;;  %2298 = vmatprep.subr.mxu1 %v2162_v7  ;;  %v2199_v0 = vld [vmem:[#allocation17 + $0x3d0] sm:$0xff]  ;;  %v2130_v7 = vld [vmem:[#allocation17 + $0x1a8] sm:$0xff] }
 0x408   :  { %2228 = vmatpush1.msra.mxu0 %v2097_v3  ;;  %2299 = vmatpush1.msra.mxu1 %v2161_v9  ;;  %v2198_v3 = vld [vmem:[#allocation17 + $0x3c8] sm:$0xff]  ;;  %v2129_v9 = vld [vmem:[#allocation17 + $0x1a0] sm:$0xff] }
 0x409   :  { %2229 = vmatprep.subr.mxu0 %v2096_v6  ;;  %2300 = vmatprep.subr.mxu1 %v2160_v16  ;;  %v2197_v6 = vld [vmem:[#allocation17 + $0x3c0] sm:$0xff]  ;;  %v2128_v16 = vld [vmem:[#allocation17 + $0x198] sm:$0xff] }
 0x40a   :  { %2230 = vmatpush1.msra.mxu0 %v2095_v8  ;;  %2301 = vmatpush1.msra.mxu1 %v2159_v19  ;;  %v2196_v8 = vld [vmem:[#allocation17 + $0x3b8] sm:$0xff]  ;;  %v2127_v19 = vld [vmem:[#allocation17 + $0x190] sm:$0xff] }
 0x40b   :  { %2231 = vmatprep.subr.mxu0 %v2094_v14  ;;  %2302 = vmatprep.subr.mxu1 %v2158_v22  ;;  %v2195_v14 = vld [vmem:[#allocation17 + $0x3b0] sm:$0xff]  ;;  %v2126_v22 = vld [vmem:[#allocation17 + $0x188] sm:$0xff] }
 0x40c   :  { %2232 = vmatpush1.msra.mxu0 %v2093_v18  ;;  %2303 = vmatpush1.msra.mxu1 %v2157_v25  ;;  %v2194_v18 = vld [vmem:[#allocation17 + $0x3a8] sm:$0xff]  ;;  %v2125_v25 = vld [vmem:[#allocation17 + $0x180] sm:$0xff] }
 0x40d   :  { %2233 = vmatprep.subr.mxu0 %v2092_v21  ;;  %2304 = vmatprep.subr.mxu1 %v2156_v27  ;;  %v2193_v21 = vld [vmem:[#allocation17 + $0x3a0] sm:$0xff]  ;;  %v2124_v27 = vld [vmem:[#allocation17 + $0x178] sm:$0xff] }
 0x40e   :  { %2234 = vmatpush1.msra.mxu0 %v2091_v23  ;;  %2305 = vmatpush1.msra.mxu1 %v2155_v30  ;;  %v2192_v23 = vld [vmem:[#allocation17 + $0x398] sm:$0xff] }
 0x40f   :  { %2235 = vmatprep.subr.mxu0 %v2090_v26  ;;  %2306 = vmatprep.subr.mxu1 %v2154_v33  ;;  %v2191_v26 = vld [vmem:[#allocation17 + $0x390] sm:$0xff]  ;;  %v3148_v30 = vld [vmem:[#allocation15] sm:$0xf]  ;;  %v2189_v33 = vld [vmem:[#allocation17 + $0x380] sm:$0xff] }
 0x410   :  { %2236 = vmatpush1.msra.mxu0 %v2089_v28  ;;  %2307 = vmatpush1.msra.mxu1 %v2153_v35  ;;  %v2190_v28 = vld [vmem:[#allocation17 + $0x388] sm:$0xff]  ;;  %v2188_v35 = vld [vmem:[#allocation17 + $0x378] sm:$0xff] }
 0x411   :  { %2237 = vmatprep.subr.mxu0 %v2088_v31  ;;  %2308 = vmatprep.subr.mxu1 %v2152_v2  ;;  %v2123_v31 = vld [vmem:[#allocation17 + $0x170] sm:$0xff]  ;;  %v2121_v2 = vld [vmem:[#allocation17 + $0x160] sm:$0xff] }
 0x412   :  { %2238 = vmatpush1.msra.mxu0 %v2087_v34  ;;  %2309 = vmatpush1.msra.mxu1 %v2151_v24  ;;  %v2122_v34 = vld [vmem:[#allocation17 + $0x168] sm:$0xff]  ;;  %v1444_v24 = vrot.slane %v3148_v30, %v3073_v10 }
 0x413   :  { %2239 = vmatprep.subr.mxu0 %v2086_v36  ;;  %2310 = vmatprep.subr.mxu1 %v2150_v39  ;;  %v1571_v36 = vpop.f32.mrf.mxu0  ;;  %v2186_v39 = vld [vmem:[#allocation17 + $0x368] sm:$0xff] }
 0x414   :  { %2240 = vmatpush1.msra.mxu0 %v2085_v37  ;;  %2311 = vmatpush1.msra.mxu1 %v2149_v41  ;;  %v2187_v37 = vld [vmem:[#allocation17 + $0x370] sm:$0xff]  ;;  %v2185_v41 = vld [vmem:[#allocation17 + $0x360] sm:$0xff] }
 0x415   :  { %2241 = vmatprep.subr.mxu0 %v2084_v38  ;;  %2312 = vmatprep.subr.mxu1 %v2148_v42  ;;  %v2120_v38 = vld [vmem:[#allocation17 + $0x158] sm:$0xff]  ;;  %v2118_v42 = vld [vmem:[#allocation17 + $0x148] sm:$0xff] }
 0x416   :  { %2242 = vmatpush1.msra.mxu0 %v2083_v40  ;;  %2313 = vmatpush1.msra.mxu1 %v2147_v43  ;;  %v2119_v40 = vld [vmem:[#allocation17 + $0x150] sm:$0xff]  ;;  %v1642_v43 = vpop.f32.mrf.mxu1 }
 0x417   :  { %2243 = vmatprep.subr.mxu0 %v2082_v13  ;;  %2314 = vmatprep.subr.mxu1 %v2146_v44  ;;  %v1448_v13 = vrot.slane %v3148_v30, %v3076_v11  ;;  %v2117_v44 = vld [vmem:[#allocation17 + $0x140] sm:$0xff] }
 0x418   :  { %2244 = vmatpush1.msra.mxu0 %v2081_v62  ;;  %2315 = vmatpush1.msra.mxu1 %v2145_v5  ;;  %v2184_v62 = vld [vmem:[#allocation17 + $0x358] sm:$0xff]  ;;  %v1572_v5 = vadd.f32 %v1571_v36, %v1444_v24  ;;  %v2370_v24 = vld [vmem:[#allocation20 + $0x48] sm:$0xff] }
 0x419   :  { %2245 = vmatprep.subr.mxu0 %v2080_v17  ;;  %2316 = vmatprep.subr.mxu1 %v2144_v47  ;;  %v1573_v17 = vpop.f32.mrf.mxu0  ;;  %v2115_v47 = vld [vmem:[#allocation17 + $0x130] sm:$0xff] }
 0x41a   :  { %2246 = vmatpush1.msra.mxu0 %v2079_v45  ;;  %2317 = vmatpush1.msra.mxu1 %v2143_v50  ;;  %v2183_v45 = vld [vmem:[#allocation17 + $0x350] sm:$0xff]  ;;  %v2114_v50 = vld [vmem:[#allocation17 + $0x128] sm:$0xff] }
 0x41b   :  { %2247 = vmatprep.subr.mxu0 %v2078_v46  ;;  %2318 = vmatprep.subr.mxu1 %v2142_v51  ;;  %v2116_v46 = vld [vmem:[#allocation17 + $0x138] sm:$0xff]  ;;  %v2113_v51 = vld [vmem:[#allocation17 + $0x120] sm:$0xff] }
 0x41c   :  { %2248 = vmatpush1.msra.mxu0 %v2077_v49  ;;  %2319 = vmatpush1.msra.mxu1 %v2141_v54  ;;  %v1574_v49 = vadd.f32 %v1573_v17, %v1448_v13  ;;  %v2112_v54 = vld [vmem:[#allocation17 + $0x118] sm:$0xff]  ;;  %v2381_v17 = vld [vmem:[#allocation20 + $0xa0] sm:$0xff] }
 0x41d   :  { %2249 = vmatprep.subr.mxu0 %v2140_v20  ;;  %2320 = vmatprep.subr.mxu1 %v2204_v56  ;;  %v1644_v20 = vpop.f32.mrf.mxu1  ;;  %v2111_v56 = vld [vmem:[#allocation17 + $0x110] sm:$0xff] }
 0x41e   :  { %2250 = vmatpush2.msra.mxu0 %v2139_v53  ;;  %2321 = vmatpush2.msra.mxu1 %v2203_v58  ;;  %v1643_v53 = vadd.f32 %v1642_v43, %v1572_v5  ;;  %v2387_v36 = vld [vmem:[#allocation20 + $0xd0] sm:$0xff]  ;;  %v2366_v43 = vld [vmem:[#allocation20 + $0x28] sm:$0xff]  ;;  %v1452_v5 = vrot.slane %v3148_v30, %v865_v12 }
 0x41f   :  { %2251 = vmatprep.subr.mxu0 %v2138_v55  ;;  %2322 = vmatprep.subr.mxu1 %v2202_v48  ;;  %v2383_v13 = vld [vmem:[#allocation20 + $0xb0] sm:$0xff] }
 0x420   :  { %2252 = vmatpush2.msra.mxu0 %v2137_v57  ;;  %2323 = vmatpush2.msra.mxu1 %v2201_v59  ;;  %v1645_v57 = vadd.f32 %v1644_v20, %v1574_v49  ;;  %v2109_v59 = vld [vmem:[#allocation17 + $0x100] sm:$0xff] }
 0x421   :  { %2253 = vmatprep.subr.mxu0 %v2136_v32  ;;  %2324 = vmatprep.subr.mxu1 %v2200_v61  ;;  %v2110_v32 = vld [vmem:[#allocation17 + $0x108] sm:$0xff] }
 0x422   :  { %2254 = vmatpush2.msra.mxu0 %v2135_v52  ;;  %2325 = vmatpush2.msra.mxu1 %v2199_v0  ;;  %v2182_v0 = vld [vmem:[#allocation17 + $0x348] sm:$0xff] }
 0x423   :  { %2255 = vmatprep.subr.mxu0 %v2134_v60  ;;  %2326 = vmatprep.subr.mxu1 %v2198_v3  ;;  %v2181_v3 = vld [vmem:[#allocation17 + $0x340] sm:$0xff] }
 0x424   :  { %2256 = vmatpush2.msra.mxu0 %v2133_v63  ;;  %2327 = vmatpush2.msra.mxu1 %v2197_v6 }
 0x425   :  { %2257 = vmatprep.subr.mxu0 %v2132_v1  ;;  %2328 = vmatprep.subr.mxu1 %v2196_v8 }
 0x426   :  { %2258 = vmatpush2.msra.mxu0 %v2131_v4  ;;  %2329 = vmatpush2.msra.mxu1 %v2195_v14  ;;  %v2180_v4 = vld [vmem:[#allocation17 + $0x338] sm:$0xff]  ;;  %v2177_v14 = vld [vmem:[#allocation17 + $0x320] sm:$0xff] }
 0x427   :  { %2259 = vmatprep.subr.mxu0 %v2130_v7  ;;  %2330 = vmatprep.subr.mxu1 %v2194_v18  ;;  %v2179_v7 = vld [vmem:[#allocation17 + $0x330] sm:$0xff] }
 0x428   :  { %2260 = vmatpush2.msra.mxu0 %v2129_v9  ;;  %2331 = vmatpush2.msra.mxu1 %v2193_v21  ;;  %v2178_v9 = vld [vmem:[#allocation17 + $0x328] sm:$0xff]  ;;  %v2175_v18 = vld [vmem:[#allocation17 + $0x310] sm:$0xff]  ;;  %v2173_v21 = vld [vmem:[#allocation17 + $0x300] sm:$0xff] }
 0x429   :  { %2261 = vmatprep.subr.mxu0 %v2128_v16  ;;  %2332 = vmatprep.subr.mxu1 %v2192_v23  ;;  %v2176_v16 = vld [vmem:[#allocation17 + $0x318] sm:$0xff] }
 0x42a   :  { %2262 = vmatpush2.msra.mxu0 %v2127_v19  ;;  %2333 = vmatpush2.msra.mxu1 %v2191_v26  ;;  %v2174_v19 = vld [vmem:[#allocation17 + $0x308] sm:$0xff]  ;;  %v2376_v23 = vld [vmem:[#allocation20 + $0x78] sm:$0xff]  ;;  %v2375_v26 = vld [vmem:[#allocation20 + $0x70] sm:$0xff] }
 0x42b   :  { %2263 = vmatprep.subr.mxu0 %v2126_v22  ;;  %2334 = vmatprep.subr.mxu1 %v2190_v28  ;;  %v2392_v22 = vld [vmem:[#allocation20 + $0xf8] sm:$0xff]  ;;  %v2374_v28 = vld [vmem:[#allocation20 + $0x68] sm:$0xff] }
 0x42c   :  { %2264 = vmatpush2.msra.mxu0 %v2125_v25  ;;  %2335 = vmatpush2.msra.mxu1 %v2189_v33  ;;  %v2391_v25 = vld [vmem:[#allocation20 + $0xf0] sm:$0xff]  ;;  %v2373_v33 = vld [vmem:[#allocation20 + $0x60] sm:$0xff] }
 0x42d   :  { %2265 = vmatprep.subr.mxu0 %v2124_v27  ;;  %2336 = vmatprep.subr.mxu1 %v2188_v35  ;;  %v2390_v27 = vld [vmem:[#allocation20 + $0xe8] sm:$0xff]  ;;  %v2372_v35 = vld [vmem:[#allocation20 + $0x58] sm:$0xff] }
 0x42e   :  { %2266 = vmatpush2.msra.mxu0 %v2123_v31  ;;  %2337 = vmatpush2.msra.mxu1 %v2187_v37  ;;  %v2389_v31 = vld [vmem:[#allocation20 + $0xe0] sm:$0xff]  ;;  %v2386_v37 = vld [vmem:[#allocation20 + $0xc8] sm:$0xff] }
 0x42f   :  { %2267 = vmatprep.subr.mxu0 %v2122_v34  ;;  %2338 = vmatprep.subr.mxu1 %v2186_v39  ;;  %v2388_v34 = vld [vmem:[#allocation20 + $0xd8] sm:$0xff]  ;;  %v2369_v39 = vld [vmem:[#allocation20 + $0x40] sm:$0xff] }
 0x430   :  { %2268 = vmatpush2.msra.mxu0 %v2121_v2  ;;  %2339 = vmatpush2.msra.mxu1 %v2185_v41  ;;  %v2371_v2 = vld [vmem:[#allocation20 + $0x50] sm:$0xff]  ;;  %v2368_v41 = vld [vmem:[#allocation20 + $0x38] sm:$0xff] }
 0x431   :  { %2269 = vmatprep.subr.mxu0 %v2120_v38  ;;  %2340 = vmatprep.subr.mxu1 %v2184_v62  ;;  %v2385_v38 = vld [vmem:[#allocation20 + $0xc0] sm:$0xff]  ;;  %v2382_v62 = vld [vmem:[#allocation20 + $0xa8] sm:$0xff] }
 0x432   :  { %2270 = vmatpush2.msra.mxu0 %v2119_v40  ;;  %2341 = vmatpush2.msra.mxu1 %v2183_v45  ;;  %v2384_v40 = vld [vmem:[#allocation20 + $0xb8] sm:$0xff] }
 0x433   :  { %2271 = vmatprep.subr.mxu0 %v2118_v42  ;;  %2342 = vmatprep.subr.mxu1 %v2182_v0  ;;  %v2367_v42 = vld [vmem:[#allocation20 + $0x30] sm:$0xff]  ;;  %v2362_v0 = vld [vmem:[#allocation20 + $0x8] sm:$0xff] }
 0x434   :  { %2272 = vmatpush2.msra.mxu0 %v2117_v44  ;;  %2343 = vmatpush2.msra.mxu1 %v2181_v3  ;;  %v2365_v44 = vld [vmem:[#allocation20 + $0x20] sm:$0xff] }
 0x435   :  { %2273 = vmatprep.subr.mxu0 %v2116_v46  ;;  %2344 = vmatprep.subr.mxu1 %v2180_v4  ;;  %v1456_v46 = vrot.slane %v3148_v30, %v869_v15  ;;  %v2364_v15 = vld [vmem:[#allocation20 + $0x18] sm:$0xff]  ;;  %v2379_v30 = vld [vmem:[#allocation20 + $0x90] sm:$0xff]  ;;  %v2361_v3 = vld [vmem:[#allocation20] sm:$0xff] }
 0x436   :  { %2274 = vmatpush2.msra.mxu0 %v2115_v47  ;;  %2345 = vmatpush2.msra.mxu1 %v2179_v7  ;;  %v2205_v4 = vld [vmem:[#allocation18] sm:$0x3] }
 0x437   :  { %v1713_v55 = vpop.f32.mrf.mxu0  ;;  %2275 = vmatprep.subr.mxu0 %v2114_v50  ;;  %2346 = vmatprep.subr.mxu1 %v2178_v9  ;;  %v2210_v7 = vrot.slane %v2205_v4, %v3073_v10 }
 0x438   :  { %v1714_v58 = vadd.f32 %v1713_v55, %v1643_v53  ;;  %2276 = vmatpush2.msra.mxu0 %v2113_v51  ;;  %2347 = vmatpush2.msra.mxu1 %v2177_v14 }
 0x439   :  { %v1784_v48 = vpop.f32.mrf.mxu1  ;;  %v1715_v52 = vpop.f32.mrf.mxu0  ;;  %2277 = vmatprep.subr.mxu0 %v2112_v54  ;;  %2348 = vmatprep.subr.mxu1 %v2176_v16 }
 0x43a   :  { %v1716_v60 = vadd.f32 %v1715_v52, %v1645_v57  ;;  %2278 = vmatpush2.msra.mxu0 %v2111_v56  ;;  %v1785_v61 = vadd.f32 %v1784_v48, %v1714_v58  ;;  %2349 = vmatpush2.msra.mxu1 %v2175_v18 }
 0x43b   :  { %v1786_v63 = vpop.f32.mrf.mxu1  ;;  %2279 = vmatprep.subr.mxu0 %v2110_v32  ;;  %2350 = vmatprep.subr.mxu1 %v2174_v19 }
 0x43c   :  { %v1787_v1 = vadd.f32 %v1786_v63, %v1716_v60  ;;  %2280 = vmatpush2.msra.mxu0 %v2109_v59  ;;  %v2073_v8 = vmax.f32 %v1785_v61, 0.0  ;;  %2351 = vmatpush2.msra.mxu1 %v2173_v21  ;;  %v2363_v61 = vld [vmem:[#allocation20 + $0x10] sm:$0xff]  ;;  %v2378_v63 = vld [vmem:[#allocation20 + $0x88] sm:$0xff] }
 0x43d   :  { %2517 = vmatprep.subr.mxu0 %v2392_v22 }
 0x43e   :  { %v2074_v6 = vmax.f32 %v1787_v1, 0.0  ;;  %v2377_v1 = vld [vmem:[#allocation20 + $0x80] sm:$0xff] }
 0x440   :  { %2281 = vmatprep.mubr.f32.mxu0 %v2074_v6 }
 0x441   :  { %2282 = vmatmul.mubr.f32.vlgmr.msra.gmra.mxu0 %v2073_v8  ;;  %v2214_v8 = vrot.slane %v2205_v4, %v3076_v11 }
 0x442   :  { %2518 = vmatpush3.msra.mxu0 %v2376_v23 }
 0x443   :  { %2519 = vmatprep.subr.mxu0 %v2391_v25 }
 0x444   :  { %2520 = vmatpush3.msra.mxu0 %v2375_v26 }
 0x445   :  { %2521 = vmatprep.subr.mxu0 %v2390_v27 }
 0x446   :  { %2522 = vmatpush3.msra.mxu0 %v2374_v28  ;;  %v2505_v28 = vld [vmem:[#allocation21] ss:$0 sm:$0xff] }
 0x447   :  { %2523 = vmatprep.subr.mxu0 %v2389_v31 }
 0x448   :  { %2524 = vmatpush3.msra.mxu0 %v2373_v33 }
 0x449   :  { %2525 = vmatprep.subr.mxu0 %v2388_v34 }
 0x44a   :  { %2526 = vmatpush3.msra.mxu0 %v2372_v35 }
 0x44b   :  { %2527 = vmatprep.subr.mxu0 %v2387_v36 }
 0x44c   :  { %2528 = vmatpush3.msra.mxu0 %v2371_v2 }
 0x44d   :  { %2529 = vmatprep.subr.mxu0 %v2386_v37 }
 0x44e   :  { %2530 = vmatpush3.msra.mxu0 %v2370_v24 }
 0x44f   :  { %2531 = vmatprep.subr.mxu0 %v2385_v38 }
 0x450   :  { %2532 = vmatpush3.msra.mxu0 %v2369_v39 }
 0x451   :  { %2533 = vmatprep.subr.mxu0 %v2384_v40 }
 0x452   :  { %2534 = vmatpush3.msra.mxu0 %v2368_v41 }
 0x453   :  { %2535 = vmatprep.subr.mxu0 %v2383_v13 }
 0x454   :  { %2536 = vmatpush3.msra.mxu0 %v2367_v42 }
 0x455   :  { %2537 = vmatprep.subr.mxu0 %v2382_v62 }
 0x456   :  { %2538 = vmatpush3.msra.mxu0 %v2366_v43 }
 0x457   :  { %2539 = vmatprep.subr.mxu0 %v2381_v17 }
 0x458   :  { %2540 = vmatpush3.msra.mxu0 %v2365_v44 }
 0x459   :  { %2541 = vmatprep.subr.mxu0 %v2380_v29 }
 0x45a   :  { %2542 = vmatpush3.msra.mxu0 %v2364_v15 }
 0x45b   :  { %2543 = vmatprep.subr.mxu0 %v2379_v30 }
 0x45c   :  { %2544 = vmatpush3.msra.mxu0 %v2363_v61 }
 0x45d   :  { %2545 = vmatprep.subr.mxu0 %v2378_v63 }
 0x45e   :  { %2546 = vmatpush3.msra.mxu0 %v2362_v0 }
 0x45f   :  { %2547 = vmatprep.subr.mxu0 %v2377_v1 }
 0x460   :  { %2548 = vmatpush3.msra.mxu0 %v2361_v3 }
 0x479   :  { %v1855_v45 = vpop.f32.mrf.mxu0 }
 0x47a   :  { %v1856_v50 = vadd.f32 %v1855_v45, %v1452_v5 }
 0x47b   :  { %v1926_v47 = vpop.f32.mrf.mxu1  ;;  %v1857_v49 = vpop.f32.mrf.mxu0 }
 0x47c   :  { %v1858_v20 = vadd.f32 %v1857_v49, %v1456_v46  ;;  %v1927_v53 = vadd.f32 %v1926_v47, %v1856_v50 }
 0x47d   :  { %v1928_v51 = vpop.f32.mrf.mxu1 }
 0x47e   :  { %v1929_v56 = vadd.f32 %v1928_v51, %v1858_v20 }
 0x4bc   :  { %v1997_v54 = vpop.f32.mrf.mxu0  ;;  %v2068_v55 = vpop.f32.mrf.mxu1 }
 0x4bd   :  { %v1998_v57 = vadd.f32 %v1997_v54, %v1927_v53 }
 0x4be   :  { %v1999_v58 = vpop.f32.mrf.mxu0  ;;  %v2070_v52 = vpop.f32.mrf.mxu1 }
 0x4bf   :  { %v2000_v32 = vadd.f32 %v1999_v58, %v1929_v56  ;;  %v2069_v48 = vadd.f32 %v2068_v55, %v1998_v57 }
 0x4c1   :  { %v2071_v59 = vadd.f32 %v2070_v52, %v2000_v32  ;;  %v2075_v60 = vmax.f32 %v2069_v48, 0.0 }
 0x4c3   :  { %v2076_v12 = vmax.f32 %v2071_v59, 0.0 }
 0x4c5   :  { %2352 = vmatprep.mubr.f32.mxu1 %v2076_v12 }
 0x4c6   :  { %2353 = vmatmul.mubr.f32.vlgmr.msra.gmra.mxu1 %v2075_v60 }
 0x501   :  { %v2283_v6 = vpop.f32.mrf.mxu0 }
 0x502   :  { %v2284_v14 = vadd.f32 %v2283_v6, %v2210_v7 }
 0x503   :  { %v2285_v9 = vpop.f32.mrf.mxu0 }
 0x504   :  { %v2286_v18 = vadd.f32 %v2285_v9, %v2214_v8 }
 0x586   :  { %v2354_v16 = vpop.f32.mrf.mxu1 }
 0x587   :  { %v2355_v19 = vadd.f32 %v2354_v16, %v2284_v14 }
 0x588   :  { %v2356_v21 = vpop.f32.mrf.mxu1 }
 0x589   :  { %v2357_v22 = vadd.f32 %v2356_v21, %v2286_v18  ;;  %v2359_v25 = vmax.f32 %v2355_v19, 0.0 }
 0x58b   :  { %v2360_v23 = vmax.f32 %v2357_v22, 0.0 }
 0x58d   :  { %2464 = vmatprep.mubr.f32.mxu0 %v2360_v23 }
 0x58e   :  { %2465 = vmatmul.mubr.f32.vlgmr.msra.gmra.mxu0 %v2359_v25 }
 0x64e   :  { %v2549_v26 = vpop.f32.mrf.mxu0 }
 0x650   :  { %v2550_v27 = vpop.f32.mrf.mxu0 }
 0x651   :  { %v2551_v31 = vadd.f32 %v2550_v27, %v2549_v26 }
 0x653   :  { %v2467_v10 = vadd.f32 %v2551_v31, %v2505_v28 }
 0x655   :  { %2470 = vst [vmem:[#allocation23] sm:$0x3] %v2467_v10 }
 0x656   :  { %2860 = shalt.err (!%p2857_p9)
}
 0x657   :  { %2480 = dma.vmem_to_hbm [thread:$0]  %s2478_s30, 32, %s3178_s13, [#allocation5]  }
 0x658   :  { %2887 = dma.done.wait [#allocation5], 32  }
 0x659   :  { %2888 = vsyncadd [#allocation5], 4294967264 }
 0x65a   :  { %2484 = vsyncpa [#allocation4], 1 }
 0x65b   :  { %2485 = vsyncpa [#allocation7], 1 }
 0x65c   :  { %2486 = vsyncpa [#allocation10], 1 }
 0x65d   :  { %2487 = vsyncpa [#allocation13], 1 }
 0x65e   :  { %2488 = vsyncpa [#allocation16], 1 }
 0x65f   :  { %2489 = vsyncpa [#allocation19], 1 }
 0x660   :  { %2490 = vsyncpa [#allocation22], 1 }
 0x661   :  { %2491 = vsyncpa [#allocation5], 1 }

</bundles_post_ra>
